<compile_context>
chip_gen: v6e
topology: v6e:2x2x1
jax: 0.10.0
libtpu: 0.0.40
codegen_flags: <defaults>
</compile_context>

<pallas_src>
import math
import functools

import jax
import jax.numpy as jnp
from jax.experimental import pallas as pl
from jax.experimental.pallas import tpu as pltpu

NEG_SLOPE = 0.01  # torch.nn.LeakyReLU default negative_slope


# --------------------------- in-kernel helpers --------------------------------

def _leaky_relu(x):
    return jnp.where(x > 0, x, NEG_SLOPE * x)


def _sigmoid(x):
    # Single-EUP-op sigmoid; avoids exp(-x) overflow and the extra reciprocal.
    return 0.5 * (jnp.tanh(0.5 * x) + 1.0)


def _softmax_rows(x):
    m = jnp.max(x, axis=-1, keepdims=True)
    p = jnp.exp(x - m)
    return p / jnp.sum(p, axis=-1, keepdims=True)


def _edge_encoder(n, w1, b1, w2t, b2):
    """For every node pair (i,j): sigmoid(leaky_relu((n_i-n_j)^2 @ W1 + b1) @ W2 + b2).

    w2t is the second-layer weight pre-transposed to (1, H): the hidden->1
    projection is a broadcast-mul + lane reduce, so the result is produced as
    (N, N) directly (no (N*N, 1) lane-1 store, no wrapper reshape).
    """
    N, F = n.shape
    H = w1.shape[1]
    d = n[:, None, :] - n[None, :, :]                 # (N, N, F) pairwise diff
    d2 = (d * d).reshape(N * N, F)                    # collapse leading dims
    h = _leaky_relu(jnp.dot(d2, w1, preferred_element_type=jnp.float32) + b1)
    h = h.reshape(N, N, H)
    logits = jnp.sum(h * w2t, axis=-1) + b2           # (N, N); b2 is (1,1)
    return _sigmoid(logits)


def _mlp_pair(a, b, w1, b1, w2, b2):
    """MLP(concat(a, b)) with the concat folded into a split W1."""
    da = a.shape[1]
    h = (jnp.dot(a, w1[:da, :], preferred_element_type=jnp.float32)
         + jnp.dot(b, w1[da:, :], preferred_element_type=jnp.float32)
         + b1)
    h = _leaky_relu(h)
    return _sigmoid(jnp.dot(h, w2, preferred_element_type=jnp.float32) + b2)


# --------------------------- fused forward kernel -----------------------------

def _make_forward_kernel(layers, num_nodes, feat):
    N, F = num_nodes, feat
    Hf, Hn = F // 2, N // 2

    def kernel(ni_ref, l_ref,
               ie_w1_ref, ie_vec_ref,        # (layers+1, F, Hf), (layers+1, 3, Hf)
               de_w1_ref, de_vec_ref,        # (layers,   N, Hn), (layers,   3, Hn)
               i2d_w1_ref, i2d_w2_ref, i2d_vec_ref,
               d2i_w1_ref, d2i_w2_ref, d2i_vec_ref,
               yins_ref, ydis_ref):
        ni = ni_ref[0]            # Node_ins_0, (N, F)
        lbl = l_ref[0]            # labels, (N, C)

        def ins_edge(nodes, e):
            v = ie_vec_ref[e]                      # (3, Hf): [b1 | w2^T | b2(pad)]
            return _edge_encoder(nodes, ie_w1_ref[e],
                                 v[0:1, :], v[1:2, :], v[2:3, 0:1])

        def dis_edge(nodes, e):
            v = de_vec_ref[e]                      # (3, Hn)
            return _edge_encoder(nodes, de_w1_ref[e],
                                 v[0:1, :], v[1:2, :], v[2:3, 0:1])

        # Edge_ins_0.
        ei = ins_edge(ni, 0)

        # Node_dis_0: labeled rows -> same-label indicator, unlabeled -> uniform.
        # Gram-matrix form (labels are one-hot): avoids the (N,N,C) intermediate.
        sq = jnp.sum(lbl * lbl, axis=-1, keepdims=True)                  # (N, 1)
        gram = jnp.einsum('ic,jc->ij', lbl, lbl,
                          preferred_element_type=jnp.float32)            # (N, N)
        flag = (sq > 0.5).astype(jnp.float32)                            # labeled?
        same = (gram > 0.5).astype(jnp.float32)
        nd = same * flag + (1.0 / N) * (1.0 - flag)

        # NOTE: the PyTorch model computes Edge_dis_0 = initDisEdge(Node_dis_0)
        # and overwrites it in the layer loop before any use; it is dead code,
        # so its parameters are not even shipped to this kernel.

        # Hoisted off-diagonal mask, reused by every layer.
        ii = jax.lax.broadcasted_iota(jnp.int32, (N, N), 0)
        jj = jax.lax.broadcasted_iota(jnp.int32, (N, N), 1)
        offdiag = (ii != jj).astype(jnp.float32)

        hi = i2d_w1_ref.shape[2]      # ins2Dis hidden width
        oi = i2d_w2_ref.shape[2]      # ins2Dis output width (= N)
        hd = d2i_w1_ref.shape[2]      # dis2Ins hidden width
        od = d2i_w2_ref.shape[2]      # dis2Ins output width (= F)

        for i in range(layers):
            # insEdgeEncoder fused with the elementwise product with previous Ei.
            ei = ins_edge(ni, i + 1) * ei

            # Ins2Dis: MLP(concat(Nd, Ei)).
            v = i2d_vec_ref[i]                                  # (2, max(hi, oi))
            nd = _mlp_pair(nd, ei, i2d_w1_ref[i], v[0:1, :hi],
                           i2d_w2_ref[i], v[1:2, :oi])

            # disEdgeEncoder.
            ed = dis_edge(nd, i)

            # Dis2Ins: zero diag(Ed), aggregate neighbours, MLP(concat(Ni, agg)).
            agg = jnp.dot(ed * offdiag, ni, preferred_element_type=jnp.float32)
            v = d2i_vec_ref[i]                                  # (2, max(hd, od))
            ni = _mlp_pair(ni, agg, d2i_w1_ref[i], v[0:1, :hd],
                           d2i_w2_ref[i], v[1:2, :od])

            # Per-layer distribution readout: softmax(Ed @ L).
            ydis_ref[0, i] = _softmax_rows(
                jnp.dot(ed, lbl, preferred_element_type=jnp.float32))

        yins_ref[0] = _softmax_rows(
            jnp.dot(ei, lbl, preferred_element_type=jnp.float32))

    return kernel


# --------------------------- parameters ---------------------------------------

def _init_mlp(key, in_dim, hidden_dim, out_dim):
    """MLP(in -> hidden -> out); xavier_uniform weights, torch-default uniform biases."""
    k1, k2, k3, k4 = jax.random.split(key, 4)
    lim1 = math.sqrt(6.0 / (in_dim + hidden_dim))
    lim2 = math.sqrt(6.0 / (hidden_dim + out_dim))
    bb1 = 1.0 / math.sqrt(in_dim)
    bb2 = 1.0 / math.sqrt(hidden_dim)
    w1 = jax.random.uniform(k1, (in_dim, hidden_dim), jnp.float32, -lim1, lim1)
    b1 = jax.random.uniform(k2, (1, hidden_dim), jnp.float32, -bb1, bb1)
    w2 = jax.random.uniform(k3, (hidden_dim, out_dim), jnp.float32, -lim2, lim2)
    b2 = jax.random.uniform(k4, (1, out_dim), jnp.float32, -bb2, bb2)
    return (w1, b1, w2, b2)


def init_discriminator_params(key, layers, ins_node_feature, ins_node_size):
    F, N = ins_node_feature, ins_node_size
    keys = jax.random.split(key, 2 + 4 * layers)
    params = {
        "initInsEdge": _init_mlp(keys[0], F, F // 2, 1),
        # initDisEdge kept for structural fidelity with the PyTorch module, but its
        # output is overwritten before use, so it is never sent to the kernel.
        "initDisEdge": _init_mlp(keys[1], N, N // 2, 1),
        "insEdgeEncoder": [],
        "disEdgeEncoder": [],
        "ins2Dis": [],
        "dis2Ins": [],
    }
    idx = 2
    for _ in range(layers):
        params["insEdgeEncoder"].append(_init_mlp(keys[idx], F, F // 2, 1)); idx += 1
        params["disEdgeEncoder"].append(_init_mlp(keys[idx], N, N // 2, 1)); idx += 1
        params["ins2Dis"].append(_init_mlp(keys[idx], 2 * N, N + N // 2, N)); idx += 1
        params["dis2Ins"].append(_init_mlp(keys[idx], 2 * F, F + F // 2, F)); idx += 1
    return params


# --------------------------- parameter packing ---------------------------------

def _pack_params(params):
    """Stack the many tiny parameter arrays into 10 lane-dense slabs."""

    def edge_vec(p):
        _, b1, w2, b2 = p
        H = b1.shape[1]
        b2p = jnp.pad(b2, ((0, 0), (0, H - 1)))
        return jnp.concatenate([b1, jnp.transpose(w2), b2p], axis=0)   # (3, H)

    def mlp_vec(p):
        _, b1, _, b2 = p
        W = max(b1.shape[1], b2.shape[1])
        b1p = jnp.pad(b1, ((0, 0), (0, W - b1.shape[1])))
        b2p = jnp.pad(b2, ((0, 0), (0, W - b2.shape[1])))
        return jnp.concatenate([b1p, b2p], axis=0)                     # (2, W)

    def edge_slabs(plist):
        w1 = jnp.stack([p[0] for p in plist])                          # (L, in, H)
        vec = jnp.stack([edge_vec(p) for p in plist])                  # (L, 3, H)
        return w1, vec

    def mlp_slabs(plist):
        w1 = jnp.stack([p[0] for p in plist])                          # (L, in, H)
        w2 = jnp.stack([p[2] for p in plist])                          # (L, H, out)
        vec = jnp.stack([mlp_vec(p) for p in plist])                   # (L, 2, W)
        return w1, w2, vec

    ie_w1, ie_vec = edge_slabs([params["initInsEdge"]] + params["insEdgeEncoder"])
    de_w1, de_vec = edge_slabs(params["disEdgeEncoder"])
    i2d_w1, i2d_w2, i2d_vec = mlp_slabs(params["ins2Dis"])
    d2i_w1, d2i_w2, d2i_vec = mlp_slabs(params["dis2Ins"])
    return (ie_w1, ie_vec, de_w1, de_vec,
            i2d_w1, i2d_w2, i2d_vec, d2i_w1, d2i_w2, d2i_vec)


# --------------------------- forward wrapper -----------------------------------

def discriminator_forward(params, layers, X, L):
    """Batched DiscriminatorNet.forward.  X: (B, N, Fx), L: (B, N, C)."""
    B, N, _ = X.shape
    C = L.shape[-1]
    Ni0 = jnp.concatenate([X, L], axis=-1)            # (B, N, F) one-time prep
    F = Ni0.shape[-1]

    slabs = _pack_params(params)
    kernel = _make_forward_kernel(layers, N, F)

    def graph_spec(shape):     # per-graph block, pipelined over the grid
        return pl.BlockSpec((1,) + shape, lambda b: (b,) + (0,) * len(shape))

    def const_spec(arr):       # weight slab: block 0 every step -> stays resident
        return pl.BlockSpec(arr.shape, lambda b: (0,) * arr.ndim)

    yins, ydis = pl.pallas_call(
        kernel,
        grid=(B,),
        out_shape=(jax.ShapeDtypeStruct((B, N, C), jnp.float32),
                   jax.ShapeDtypeStruct((B, layers, N, C), jnp.float32)),
        in_specs=[graph_spec((N, F)), graph_spec((N, C))]
                 + [const_spec(s) for s in slabs],
        out_specs=(graph_spec((N, C)), graph_spec((layers, N, C))),
        compiler_params=pltpu.CompilerParams(
            dimension_semantics=("parallel",)),
    )(Ni0, L, *slabs)

    return yins, [ydis[:, i] for i in range(layers)]


# --------------------------- main -----------------------------------------------

if __name__ == "__main__":
    B = 4           # graphs per batch (amortizes launch + weight DMA, feeds both v7x TCs)
    NK = 8          # node_size == ins_node_size
    FX = 24         # raw WSN feature width
    C = 8           # label width
    F = FX + C      # ins_node_feature = cat(X, L) width = 32
    LAYERS = 2

    key = jax.random.PRNGKey(0)
    kx, kp = jax.random.split(key, 2)

    X = jax.random.normal(kx, (B, NK, FX), jnp.float32)
    lab = (jnp.arange(B)[:, None] + jnp.arange(NK)[None, :]) % C
    onehot = jax.nn.one_hot(lab, C, dtype=jnp.float32)
    labeled_mask = (jnp.arange(NK) < NK // 2).astype(jnp.float32)[None, :, None]
    L = onehot * labeled_mask   # first half labeled, second half all-zero (unlabeled)

    params = init_discriminator_params(kp, LAYERS, F, NK)

    fwd = jax.jit(functools.partial(discriminator_forward, params, LAYERS))
    Yins, Ydis = fwd(X, L)
    jax.block_until_ready((Yins, Ydis))

    assert Yins.shape == (B, NK, C)
    assert len(Ydis) == LAYERS and all(y.shape == (B, NK, C) for y in Ydis)
    assert bool(jnp.all(jnp.isfinite(Yins)))
    assert bool(jnp.all(jnp.abs(jnp.sum(Yins, axis=-1) - 1.0) < 1e-5))
    print("KERNEL_OK")
</pallas_src>

<mosaic_0001>
module attributes {stable_mosaic.version = 11 : i64} {
  func.func @kernel(%arg0: i32, %arg1: memref<1x8x32xf32, #tpu.memory_space<vmem>>, %arg2: memref<1x8x8xf32, #tpu.memory_space<vmem>>, %arg3: memref<3x32x16xf32, #tpu.memory_space<vmem>>, %arg4: memref<3x3x16xf32, #tpu.memory_space<vmem>>, %arg5: memref<2x8x4xf32, #tpu.memory_space<vmem>>, %arg6: memref<2x3x4xf32, #tpu.memory_space<vmem>>, %arg7: memref<2x16x12xf32, #tpu.memory_space<vmem>>, %arg8: memref<2x12x8xf32, #tpu.memory_space<vmem>>, %arg9: memref<2x2x12xf32, #tpu.memory_space<vmem>>, %arg10: memref<2x64x48xf32, #tpu.memory_space<vmem>>, %arg11: memref<2x48x32xf32, #tpu.memory_space<vmem>>, %arg12: memref<2x2x48xf32, #tpu.memory_space<vmem>>, %arg13: memref<1x8x8xf32, #tpu.memory_space<vmem>>, %arg14: memref<1x2x8x8xf32, #tpu.memory_space<vmem>>) attributes {dimension_semantics = [#tpu.dimension_semantics<parallel>], iteration_bounds = array<i64: 4>, scalar_prefetch = 0 : i64, scratch_operands = 0 : i64, tpu.core_type = #tpu.core_type<tc>, window_params = [{transform_indices = @transform_0, window_bounds = array<i64: 1, 8, 32>}, {transform_indices = @transform_1, window_bounds = array<i64: 1, 8, 8>}, {pipeline_mode = #tpu.pipeline_mode<synchronous>, transform_indices = @transform_2, window_bounds = array<i64: 3, 32, 16>}, {pipeline_mode = #tpu.pipeline_mode<synchronous>, transform_indices = @transform_3, window_bounds = array<i64: 3, 3, 16>}, {pipeline_mode = #tpu.pipeline_mode<synchronous>, transform_indices = @transform_4, window_bounds = array<i64: 2, 8, 4>}, {pipeline_mode = #tpu.pipeline_mode<synchronous>, transform_indices = @transform_5, window_bounds = array<i64: 2, 3, 4>}, {pipeline_mode = #tpu.pipeline_mode<synchronous>, transform_indices = @transform_6, window_bounds = array<i64: 2, 16, 12>}, {pipeline_mode = #tpu.pipeline_mode<synchronous>, transform_indices = @transform_7, window_bounds = array<i64: 2, 12, 8>}, {pipeline_mode = #tpu.pipeline_mode<synchronous>, transform_indices = @transform_8, window_bounds = array<i64: 2, 2, 12>}, {pipeline_mode = #tpu.pipeline_mode<synchronous>, transform_indices = @transform_9, window_bounds = array<i64: 2, 64, 48>}, {pipeline_mode = #tpu.pipeline_mode<synchronous>, transform_indices = @transform_10, window_bounds = array<i64: 2, 48, 32>}, {pipeline_mode = #tpu.pipeline_mode<synchronous>, transform_indices = @transform_11, window_bounds = array<i64: 2, 2, 48>}, {transform_indices = @transform_12, window_bounds = array<i64: 1, 8, 8>}, {transform_indices = @transform_13, window_bounds = array<i64: 1, 2, 8, 8>}]} {
    %c0 = arith.constant 0 : index
    %c0_0 = arith.constant 0 : index
    %c0_1 = arith.constant 0 : index
    %0 = vector.load %arg1[%c0, %c0_0, %c0_1] : memref<1x8x32xf32, #tpu.memory_space<vmem>>, vector<1x8x32xf32>
    %1 = vector.shape_cast %0 : vector<1x8x32xf32> to vector<8x32xf32>
    %c0_2 = arith.constant 0 : index
    %c0_3 = arith.constant 0 : index
    %c0_4 = arith.constant 0 : index
    %2 = vector.load %arg2[%c0_2, %c0_3, %c0_4] : memref<1x8x8xf32, #tpu.memory_space<vmem>>, vector<1x8x8xf32>
    %3 = vector.shape_cast %2 : vector<1x8x8xf32> to vector<8x8xf32>
    %c0_5 = arith.constant 0 : index
    %c0_6 = arith.constant 0 : index
    %c0_7 = arith.constant 0 : index
    %4 = vector.load %arg4[%c0_5, %c0_6, %c0_7] : memref<3x3x16xf32, #tpu.memory_space<vmem>>, vector<1x3x16xf32>
    %5 = vector.shape_cast %4 : vector<1x3x16xf32> to vector<3x16xf32>
    %c0_8 = arith.constant 0 : index
    %c0_9 = arith.constant 0 : index
    %c0_10 = arith.constant 0 : index
    %6 = vector.load %arg3[%c0_8, %c0_9, %c0_10] : memref<3x32x16xf32, #tpu.memory_space<vmem>>, vector<1x32x16xf32>
    %7 = vector.shape_cast %6 : vector<1x32x16xf32> to vector<32x16xf32>
    %8 = vector.extract_strided_slice %5 {offsets = [0, 0], sizes = [1, 16], strides = [1, 1]} : vector<3x16xf32> to vector<1x16xf32>
    %9 = vector.extract_strided_slice %5 {offsets = [1, 0], sizes = [1, 16], strides = [1, 1]} : vector<3x16xf32> to vector<1x16xf32>
    %10 = vector.extract_strided_slice %5 {offsets = [2, 0], sizes = [1, 1], strides = [1, 1]} : vector<3x16xf32> to vector<1x1xf32>
    %11 = vector.shape_cast %1 : vector<8x32xf32> to vector<8x1x32xf32>
    %12 = vector.shape_cast %1 : vector<8x32xf32> to vector<1x8x32xf32>
    %13 = vector.broadcast %11 : vector<8x1x32xf32> to vector<8x8x32xf32>
    %14 = vector.broadcast %12 : vector<1x8x32xf32> to vector<8x8x32xf32>
    %15 = arith.subf %13, %14 : vector<8x8x32xf32>
    %16 = arith.mulf %15, %15 : vector<8x8x32xf32>
    %17 = vector.shape_cast %16 : vector<8x8x32xf32> to vector<64x32xf32>
    %cst = arith.constant dense<0.000000e+00> : vector<64x16xf32>
    %18 = tpu.matmul %17, %7, %cst {dimension_numbers = #tpu.dot_dimension_numbers<[1], [0], [0], [1], [0, 0, 1, 1], [], []>} : vector<64x32xf32>, vector<32x16xf32>, vector<64x16xf32> -> vector<64x16xf32>
    %19 = vector.broadcast %8 : vector<1x16xf32> to vector<64x16xf32>
    %20 = arith.addf %18, %19 : vector<64x16xf32>
    %cst_11 = arith.constant 0.000000e+00 : f32
    %21 = vector.broadcast %cst_11 : f32 to vector<64x16xf32>
    %22 = arith.cmpf ogt, %20, %21 : vector<64x16xf32>
    %cst_12 = arith.constant 0.00999999977 : f32
    %23 = vector.broadcast %cst_12 : f32 to vector<64x16xf32>
    %24 = arith.mulf %23, %20 : vector<64x16xf32>
    %25 = arith.select %22, %20, %24 : vector<64x16xi1>, vector<64x16xf32>
    %26 = vector.shape_cast %25 : vector<64x16xf32> to vector<8x8x16xf32>
    %27 = vector.shape_cast %9 : vector<1x16xf32> to vector<1x1x16xf32>
    %28 = vector.broadcast %27 : vector<1x1x16xf32> to vector<8x8x16xf32>
    %29 = arith.mulf %26, %28 : vector<8x8x16xf32>
    %cst_13 = arith.constant dense<0.000000e+00> : vector<8x8xf32>
    %30 = vector.multi_reduction <add>, %29, %cst_13 [2] : vector<8x8x16xf32> to vector<8x8xf32>
    %31 = vector.broadcast %10 : vector<1x1xf32> to vector<8x8xf32>
    %32 = arith.addf %30, %31 : vector<8x8xf32>
    %cst_14 = arith.constant 5.000000e-01 : f32
    %33 = vector.broadcast %cst_14 : f32 to vector<8x8xf32>
    %34 = arith.mulf %33, %32 : vector<8x8xf32>
    %35 = math.tanh %34 : vector<8x8xf32>
    %cst_15 = arith.constant 1.000000e+00 : f32
    %36 = vector.broadcast %cst_15 : f32 to vector<8x8xf32>
    %37 = arith.addf %35, %36 : vector<8x8xf32>
    %cst_16 = arith.constant 5.000000e-01 : f32
    %38 = vector.broadcast %cst_16 : f32 to vector<8x8xf32>
    %39 = arith.mulf %38, %37 : vector<8x8xf32>
    %40 = arith.mulf %3, %3 : vector<8x8xf32>
    %cst_17 = arith.constant dense<0.000000e+00> : vector<8xf32>
    %41 = vector.multi_reduction <add>, %40, %cst_17 [1] : vector<8x8xf32> to vector<8xf32>
    %42 = vector.shape_cast %41 : vector<8xf32> to vector<8x1xf32>
    "tpu.trace_start"() <{level = 10 : i32, message = "ic,jc->ij"}> : () -> ()
    %cst_18 = arith.constant dense<0.000000e+00> : vector<8x8xf32>
    %43 = tpu.matmul %3, %3, %cst_18 {dimension_numbers = #tpu.dot_dimension_numbers<[1], [1], [0], [0], [0, 0, 1, 0], [], []>} : vector<8x8xf32>, vector<8x8xf32>, vector<8x8xf32> -> vector<8x8xf32>
    %cst_19 = arith.constant 5.000000e-01 : f32
    "tpu.trace_stop"() : () -> ()
    %44 = vector.broadcast %cst_19 : f32 to vector<8x1xf32>
    %45 = arith.cmpf ogt, %42, %44 : vector<8x1xf32>
    %46 = arith.extui %45 : vector<8x1xi1> to vector<8x1xi32>
    %47 = arith.sitofp %46 : vector<8x1xi32> to vector<8x1xf32>
    %cst_20 = arith.constant 5.000000e-01 : f32
    %48 = vector.broadcast %cst_20 : f32 to vector<8x8xf32>
    %49 = arith.cmpf ogt, %43, %48 : vector<8x8xf32>
    %50 = arith.extui %49 : vector<8x8xi1> to vector<8x8xi32>
    %51 = arith.sitofp %50 : vector<8x8xi32> to vector<8x8xf32>
    %52 = vector.broadcast %47 : vector<8x1xf32> to vector<8x8xf32>
    %53 = arith.mulf %51, %52 : vector<8x8xf32>
    %cst_21 = arith.constant 1.000000e+00 : f32
    %54 = vector.broadcast %cst_21 : f32 to vector<8x1xf32>
    %55 = arith.subf %54, %47 : vector<8x1xf32>
    %cst_22 = arith.constant 1.250000e-01 : f32
    %56 = vector.broadcast %cst_22 : f32 to vector<8x1xf32>
    %57 = arith.mulf %56, %55 : vector<8x1xf32>
    %58 = vector.broadcast %57 : vector<8x1xf32> to vector<8x8xf32>
    %59 = arith.addf %53, %58 : vector<8x8xf32>
    %60 = tpu.iota {dimensions = array<i32: 0>} : vector<8x8xi32>
    %61 = tpu.iota {dimensions = array<i32: 1>} : vector<8x8xi32>
    %62 = arith.cmpi ne, %60, %61 : vector<8x8xi32>
    %63 = arith.extui %62 : vector<8x8xi1> to vector<8x8xi32>
    %64 = arith.sitofp %63 : vector<8x8xi32> to vector<8x8xf32>
    %c1 = arith.constant 1 : index
    %c0_23 = arith.constant 0 : index
    %c0_24 = arith.constant 0 : index
    %65 = vector.load %arg4[%c1, %c0_23, %c0_24] : memref<3x3x16xf32, #tpu.memory_space<vmem>>, vector<1x3x16xf32>
    %66 = vector.shape_cast %65 : vector<1x3x16xf32> to vector<3x16xf32>
    %c1_25 = arith.constant 1 : index
    %c0_26 = arith.constant 0 : index
    %c0_27 = arith.constant 0 : index
    %67 = vector.load %arg3[%c1_25, %c0_26, %c0_27] : memref<3x32x16xf32, #tpu.memory_space<vmem>>, vector<1x32x16xf32>
    %68 = vector.shape_cast %67 : vector<1x32x16xf32> to vector<32x16xf32>
    %69 = vector.extract_strided_slice %66 {offsets = [0, 0], sizes = [1, 16], strides = [1, 1]} : vector<3x16xf32> to vector<1x16xf32>
    %70 = vector.extract_strided_slice %66 {offsets = [1, 0], sizes = [1, 16], strides = [1, 1]} : vector<3x16xf32> to vector<1x16xf32>
    %71 = vector.extract_strided_slice %66 {offsets = [2, 0], sizes = [1, 1], strides = [1, 1]} : vector<3x16xf32> to vector<1x1xf32>
    %72 = vector.shape_cast %1 : vector<8x32xf32> to vector<8x1x32xf32>
    %73 = vector.shape_cast %1 : vector<8x32xf32> to vector<1x8x32xf32>
    %74 = vector.broadcast %72 : vector<8x1x32xf32> to vector<8x8x32xf32>
    %75 = vector.broadcast %73 : vector<1x8x32xf32> to vector<8x8x32xf32>
    %76 = arith.subf %74, %75 : vector<8x8x32xf32>
    %77 = arith.mulf %76, %76 : vector<8x8x32xf32>
    %78 = vector.shape_cast %77 : vector<8x8x32xf32> to vector<64x32xf32>
    %cst_28 = arith.constant dense<0.000000e+00> : vector<64x16xf32>
    %79 = tpu.matmul %78, %68, %cst_28 {dimension_numbers = #tpu.dot_dimension_numbers<[1], [0], [0], [1], [0, 0, 1, 1], [], []>} : vector<64x32xf32>, vector<32x16xf32>, vector<64x16xf32> -> vector<64x16xf32>
    %80 = vector.broadcast %69 : vector<1x16xf32> to vector<64x16xf32>
    %81 = arith.addf %79, %80 : vector<64x16xf32>
    %cst_29 = arith.constant 0.000000e+00 : f32
    %82 = vector.broadcast %cst_29 : f32 to vector<64x16xf32>
    %83 = arith.cmpf ogt, %81, %82 : vector<64x16xf32>
    %cst_30 = arith.constant 0.00999999977 : f32
    %84 = vector.broadcast %cst_30 : f32 to vector<64x16xf32>
    %85 = arith.mulf %84, %81 : vector<64x16xf32>
    %86 = arith.select %83, %81, %85 : vector<64x16xi1>, vector<64x16xf32>
    %87 = vector.shape_cast %86 : vector<64x16xf32> to vector<8x8x16xf32>
    %88 = vector.shape_cast %70 : vector<1x16xf32> to vector<1x1x16xf32>
    %89 = vector.broadcast %88 : vector<1x1x16xf32> to vector<8x8x16xf32>
    %90 = arith.mulf %87, %89 : vector<8x8x16xf32>
    %cst_31 = arith.constant dense<0.000000e+00> : vector<8x8xf32>
    %91 = vector.multi_reduction <add>, %90, %cst_31 [2] : vector<8x8x16xf32> to vector<8x8xf32>
    %92 = vector.broadcast %71 : vector<1x1xf32> to vector<8x8xf32>
    %93 = arith.addf %91, %92 : vector<8x8xf32>
    %cst_32 = arith.constant 5.000000e-01 : f32
    %94 = vector.broadcast %cst_32 : f32 to vector<8x8xf32>
    %95 = arith.mulf %94, %93 : vector<8x8xf32>
    %96 = math.tanh %95 : vector<8x8xf32>
    %cst_33 = arith.constant 1.000000e+00 : f32
    %97 = vector.broadcast %cst_33 : f32 to vector<8x8xf32>
    %98 = arith.addf %96, %97 : vector<8x8xf32>
    %cst_34 = arith.constant 5.000000e-01 : f32
    %99 = vector.broadcast %cst_34 : f32 to vector<8x8xf32>
    %100 = arith.mulf %99, %98 : vector<8x8xf32>
    %101 = arith.mulf %100, %39 : vector<8x8xf32>
    %c0_35 = arith.constant 0 : index
    %c0_36 = arith.constant 0 : index
    %c0_37 = arith.constant 0 : index
    %102 = vector.load %arg9[%c0_35, %c0_36, %c0_37] : memref<2x2x12xf32, #tpu.memory_space<vmem>>, vector<1x2x12xf32>
    %103 = vector.shape_cast %102 : vector<1x2x12xf32> to vector<2x12xf32>
    %c0_38 = arith.constant 0 : index
    %c0_39 = arith.constant 0 : index
    %c0_40 = arith.constant 0 : index
    %104 = vector.load %arg7[%c0_38, %c0_39, %c0_40] : memref<2x16x12xf32, #tpu.memory_space<vmem>>, vector<1x16x12xf32>
    %105 = vector.shape_cast %104 : vector<1x16x12xf32> to vector<16x12xf32>
    %106 = vector.extract_strided_slice %103 {offsets = [0, 0], sizes = [1, 12], strides = [1, 1]} : vector<2x12xf32> to vector<1x12xf32>
    %c0_41 = arith.constant 0 : index
    %c0_42 = arith.constant 0 : index
    %c0_43 = arith.constant 0 : index
    %107 = vector.load %arg8[%c0_41, %c0_42, %c0_43] : memref<2x12x8xf32, #tpu.memory_space<vmem>>, vector<1x12x8xf32>
    %108 = vector.shape_cast %107 : vector<1x12x8xf32> to vector<12x8xf32>
    %109 = vector.extract_strided_slice %103 {offsets = [1, 0], sizes = [1, 8], strides = [1, 1]} : vector<2x12xf32> to vector<1x8xf32>
    %110 = vector.extract_strided_slice %105 {offsets = [0, 0], sizes = [8, 12], strides = [1, 1]} : vector<16x12xf32> to vector<8x12xf32>
    %cst_44 = arith.constant dense<0.000000e+00> : vector<8x12xf32>
    %111 = tpu.matmul %59, %110, %cst_44 {dimension_numbers = #tpu.dot_dimension_numbers<[1], [0], [0], [1], [0, 0, 1, 1], [], []>} : vector<8x8xf32>, vector<8x12xf32>, vector<8x12xf32> -> vector<8x12xf32>
    %112 = vector.extract_strided_slice %105 {offsets = [8, 0], sizes = [8, 12], strides = [1, 1]} : vector<16x12xf32> to vector<8x12xf32>
    %cst_45 = arith.constant dense<0.000000e+00> : vector<8x12xf32>
    %113 = tpu.matmul %101, %112, %cst_45 {dimension_numbers = #tpu.dot_dimension_numbers<[1], [0], [0], [1], [0, 0, 1, 1], [], []>} : vector<8x8xf32>, vector<8x12xf32>, vector<8x12xf32> -> vector<8x12xf32>
    %114 = arith.addf %111, %113 : vector<8x12xf32>
    %115 = vector.broadcast %106 : vector<1x12xf32> to vector<8x12xf32>
    %116 = arith.addf %114, %115 : vector<8x12xf32>
    %cst_46 = arith.constant 0.000000e+00 : f32
    %117 = vector.broadcast %cst_46 : f32 to vector<8x12xf32>
    %118 = arith.cmpf ogt, %116, %117 : vector<8x12xf32>
    %cst_47 = arith.constant 0.00999999977 : f32
    %119 = vector.broadcast %cst_47 : f32 to vector<8x12xf32>
    %120 = arith.mulf %119, %116 : vector<8x12xf32>
    %121 = arith.select %118, %116, %120 : vector<8x12xi1>, vector<8x12xf32>
    %cst_48 = arith.constant dense<0.000000e+00> : vector<8x8xf32>
    %122 = tpu.matmul %121, %108, %cst_48 {dimension_numbers = #tpu.dot_dimension_numbers<[1], [0], [0], [1], [0, 0, 1, 1], [], []>} : vector<8x12xf32>, vector<12x8xf32>, vector<8x8xf32> -> vector<8x8xf32>
    %123 = vector.broadcast %109 : vector<1x8xf32> to vector<8x8xf32>
    %124 = arith.addf %122, %123 : vector<8x8xf32>
    %cst_49 = arith.constant 5.000000e-01 : f32
    %125 = vector.broadcast %cst_49 : f32 to vector<8x8xf32>
    %126 = arith.mulf %125, %124 : vector<8x8xf32>
    %127 = math.tanh %126 : vector<8x8xf32>
    %cst_50 = arith.constant 1.000000e+00 : f32
    %128 = vector.broadcast %cst_50 : f32 to vector<8x8xf32>
    %129 = arith.addf %127, %128 : vector<8x8xf32>
    %cst_51 = arith.constant 5.000000e-01 : f32
    %130 = vector.broadcast %cst_51 : f32 to vector<8x8xf32>
    %131 = arith.mulf %130, %129 : vector<8x8xf32>
    %c0_52 = arith.constant 0 : index
    %c0_53 = arith.constant 0 : index
    %c0_54 = arith.constant 0 : index
    %132 = vector.load %arg6[%c0_52, %c0_53, %c0_54] : memref<2x3x4xf32, #tpu.memory_space<vmem>>, vector<1x3x4xf32>
    %133 = vector.shape_cast %132 : vector<1x3x4xf32> to vector<3x4xf32>
    %c0_55 = arith.constant 0 : index
    %c0_56 = arith.constant 0 : index
    %c0_57 = arith.constant 0 : index
    %134 = vector.load %arg5[%c0_55, %c0_56, %c0_57] : memref<2x8x4xf32, #tpu.memory_space<vmem>>, vector<1x8x4xf32>
    %135 = vector.shape_cast %134 : vector<1x8x4xf32> to vector<8x4xf32>
    %136 = vector.extract_strided_slice %133 {offsets = [0, 0], sizes = [1, 4], strides = [1, 1]} : vector<3x4xf32> to vector<1x4xf32>
    %137 = vector.extract_strided_slice %133 {offsets = [1, 0], sizes = [1, 4], strides = [1, 1]} : vector<3x4xf32> to vector<1x4xf32>
    %138 = vector.extract_strided_slice %133 {offsets = [2, 0], sizes = [1, 1], strides = [1, 1]} : vector<3x4xf32> to vector<1x1xf32>
    %139 = vector.shape_cast %131 : vector<8x8xf32> to vector<8x1x8xf32>
    %140 = vector.shape_cast %131 : vector<8x8xf32> to vector<1x8x8xf32>
    %141 = vector.broadcast %139 : vector<8x1x8xf32> to vector<8x8x8xf32>
    %142 = vector.broadcast %140 : vector<1x8x8xf32> to vector<8x8x8xf32>
    %143 = arith.subf %141, %142 : vector<8x8x8xf32>
    %144 = arith.mulf %143, %143 : vector<8x8x8xf32>
    %145 = vector.shape_cast %144 : vector<8x8x8xf32> to vector<64x8xf32>
    %cst_58 = arith.constant dense<0.000000e+00> : vector<64x4xf32>
    %146 = tpu.matmul %145, %135, %cst_58 {dimension_numbers = #tpu.dot_dimension_numbers<[1], [0], [0], [1], [0, 0, 1, 1], [], []>} : vector<64x8xf32>, vector<8x4xf32>, vector<64x4xf32> -> vector<64x4xf32>
    %147 = vector.broadcast %136 : vector<1x4xf32> to vector<64x4xf32>
    %148 = arith.addf %146, %147 : vector<64x4xf32>
    %cst_59 = arith.constant 0.000000e+00 : f32
    %149 = vector.broadcast %cst_59 : f32 to vector<64x4xf32>
    %150 = arith.cmpf ogt, %148, %149 : vector<64x4xf32>
    %cst_60 = arith.constant 0.00999999977 : f32
    %151 = vector.broadcast %cst_60 : f32 to vector<64x4xf32>
    %152 = arith.mulf %151, %148 : vector<64x4xf32>
    %153 = arith.select %150, %148, %152 : vector<64x4xi1>, vector<64x4xf32>
    %154 = vector.shape_cast %153 : vector<64x4xf32> to vector<8x8x4xf32>
    %155 = vector.shape_cast %137 : vector<1x4xf32> to vector<1x1x4xf32>
    %156 = vector.broadcast %155 : vector<1x1x4xf32> to vector<8x8x4xf32>
    %157 = arith.mulf %154, %156 : vector<8x8x4xf32>
    %cst_61 = arith.constant dense<0.000000e+00> : vector<8x8xf32>
    %158 = vector.multi_reduction <add>, %157, %cst_61 [2] : vector<8x8x4xf32> to vector<8x8xf32>
    %159 = vector.broadcast %138 : vector<1x1xf32> to vector<8x8xf32>
    %160 = arith.addf %158, %159 : vector<8x8xf32>
    %cst_62 = arith.constant 5.000000e-01 : f32
    %161 = vector.broadcast %cst_62 : f32 to vector<8x8xf32>
    %162 = arith.mulf %161, %160 : vector<8x8xf32>
    %163 = math.tanh %162 : vector<8x8xf32>
    %cst_63 = arith.constant 1.000000e+00 : f32
    %164 = vector.broadcast %cst_63 : f32 to vector<8x8xf32>
    %165 = arith.addf %163, %164 : vector<8x8xf32>
    %cst_64 = arith.constant 5.000000e-01 : f32
    %166 = vector.broadcast %cst_64 : f32 to vector<8x8xf32>
    %167 = arith.mulf %166, %165 : vector<8x8xf32>
    %168 = arith.mulf %167, %64 : vector<8x8xf32>
    %cst_65 = arith.constant dense<0.000000e+00> : vector<8x32xf32>
    %169 = tpu.matmul %168, %1, %cst_65 {dimension_numbers = #tpu.dot_dimension_numbers<[1], [0], [0], [1], [0, 0, 1, 1], [], []>} : vector<8x8xf32>, vector<8x32xf32>, vector<8x32xf32> -> vector<8x32xf32>
    %c0_66 = arith.constant 0 : index
    %c0_67 = arith.constant 0 : index
    %c0_68 = arith.constant 0 : index
    %170 = vector.load %arg12[%c0_66, %c0_67, %c0_68] : memref<2x2x48xf32, #tpu.memory_space<vmem>>, vector<1x2x48xf32>
    %171 = vector.shape_cast %170 : vector<1x2x48xf32> to vector<2x48xf32>
    %c0_69 = arith.constant 0 : index
    %c0_70 = arith.constant 0 : index
    %c0_71 = arith.constant 0 : index
    %172 = vector.load %arg10[%c0_69, %c0_70, %c0_71] : memref<2x64x48xf32, #tpu.memory_space<vmem>>, vector<1x64x48xf32>
    %173 = vector.shape_cast %172 : vector<1x64x48xf32> to vector<64x48xf32>
    %174 = vector.extract_strided_slice %171 {offsets = [0, 0], sizes = [1, 48], strides = [1, 1]} : vector<2x48xf32> to vector<1x48xf32>
    %c0_72 = arith.constant 0 : index
    %c0_73 = arith.constant 0 : index
    %c0_74 = arith.constant 0 : index
    %175 = vector.load %arg11[%c0_72, %c0_73, %c0_74] : memref<2x48x32xf32, #tpu.memory_space<vmem>>, vector<1x48x32xf32>
    %176 = vector.shape_cast %175 : vector<1x48x32xf32> to vector<48x32xf32>
    %177 = vector.extract_strided_slice %171 {offsets = [1, 0], sizes = [1, 32], strides = [1, 1]} : vector<2x48xf32> to vector<1x32xf32>
    %178 = vector.extract_strided_slice %173 {offsets = [0, 0], sizes = [32, 48], strides = [1, 1]} : vector<64x48xf32> to vector<32x48xf32>
    %cst_75 = arith.constant dense<0.000000e+00> : vector<8x48xf32>
    %179 = tpu.matmul %1, %178, %cst_75 {dimension_numbers = #tpu.dot_dimension_numbers<[1], [0], [0], [1], [0, 0, 1, 1], [], []>} : vector<8x32xf32>, vector<32x48xf32>, vector<8x48xf32> -> vector<8x48xf32>
    %180 = vector.extract_strided_slice %173 {offsets = [32, 0], sizes = [32, 48], strides = [1, 1]} : vector<64x48xf32> to vector<32x48xf32>
    %cst_76 = arith.constant dense<0.000000e+00> : vector<8x48xf32>
    %181 = tpu.matmul %169, %180, %cst_76 {dimension_numbers = #tpu.dot_dimension_numbers<[1], [0], [0], [1], [0, 0, 1, 1], [], []>} : vector<8x32xf32>, vector<32x48xf32>, vector<8x48xf32> -> vector<8x48xf32>
    %182 = arith.addf %179, %181 : vector<8x48xf32>
    %183 = vector.broadcast %174 : vector<1x48xf32> to vector<8x48xf32>
    %184 = arith.addf %182, %183 : vector<8x48xf32>
    %cst_77 = arith.constant 0.000000e+00 : f32
    %185 = vector.broadcast %cst_77 : f32 to vector<8x48xf32>
    %186 = arith.cmpf ogt, %184, %185 : vector<8x48xf32>
    %cst_78 = arith.constant 0.00999999977 : f32
    %187 = vector.broadcast %cst_78 : f32 to vector<8x48xf32>
    %188 = arith.mulf %187, %184 : vector<8x48xf32>
    %189 = arith.select %186, %184, %188 : vector<8x48xi1>, vector<8x48xf32>
    %cst_79 = arith.constant dense<0.000000e+00> : vector<8x32xf32>
    %190 = tpu.matmul %189, %176, %cst_79 {dimension_numbers = #tpu.dot_dimension_numbers<[1], [0], [0], [1], [0, 0, 1, 1], [], []>} : vector<8x48xf32>, vector<48x32xf32>, vector<8x32xf32> -> vector<8x32xf32>
    %191 = vector.broadcast %177 : vector<1x32xf32> to vector<8x32xf32>
    %192 = arith.addf %190, %191 : vector<8x32xf32>
    %cst_80 = arith.constant 5.000000e-01 : f32
    %193 = vector.broadcast %cst_80 : f32 to vector<8x32xf32>
    %194 = arith.mulf %193, %192 : vector<8x32xf32>
    %195 = math.tanh %194 : vector<8x32xf32>
    %cst_81 = arith.constant 1.000000e+00 : f32
    %196 = vector.broadcast %cst_81 : f32 to vector<8x32xf32>
    %197 = arith.addf %195, %196 : vector<8x32xf32>
    %cst_82 = arith.constant 5.000000e-01 : f32
    %198 = vector.broadcast %cst_82 : f32 to vector<8x32xf32>
    %199 = arith.mulf %198, %197 : vector<8x32xf32>
    %cst_83 = arith.constant dense<0.000000e+00> : vector<8x8xf32>
    %200 = tpu.matmul %167, %3, %cst_83 {dimension_numbers = #tpu.dot_dimension_numbers<[1], [0], [0], [1], [0, 0, 1, 1], [], []>} : vector<8x8xf32>, vector<8x8xf32>, vector<8x8xf32> -> vector<8x8xf32>
    %cst_84 = arith.constant dense<0xFF800000> : vector<8xf32>
    %201 = vector.multi_reduction <maximumf>, %200, %cst_84 [1] : vector<8x8xf32> to vector<8xf32>
    %202 = vector.shape_cast %201 : vector<8xf32> to vector<8x1xf32>
    %203 = vector.broadcast %202 : vector<8x1xf32> to vector<8x8xf32>
    %204 = arith.subf %200, %203 : vector<8x8xf32>
    %205 = math.exp %204 : vector<8x8xf32>
    %cst_85 = arith.constant dense<0.000000e+00> : vector<8xf32>
    %206 = vector.multi_reduction <add>, %205, %cst_85 [1] : vector<8x8xf32> to vector<8xf32>
    %207 = vector.shape_cast %206 : vector<8xf32> to vector<8x1xf32>
    %208 = vector.broadcast %207 : vector<8x1xf32> to vector<8x8xf32>
    %209 = arith.divf %205, %208 : vector<8x8xf32>
    %c0_86 = arith.constant 0 : index
    %c0_87 = arith.constant 0 : index
    %c0_88 = arith.constant 0 : index
    %c0_89 = arith.constant 0 : index
    %210 = vector.load %arg14[%c0_86, %c0_87, %c0_88, %c0_89] : memref<1x2x8x8xf32, #tpu.memory_space<vmem>>, vector<1x1x8x8xf32>
    %211 = vector.shape_cast %210 : vector<1x1x8x8xf32> to vector<8x8xf32>
    %212 = vector.shape_cast %209 : vector<8x8xf32> to vector<1x1x8x8xf32>
    tpu.vector_store %arg14[%c0_86, %c0_87, %c0_88, %c0_89], %212 {strides = array<i32>} : memref<1x2x8x8xf32, #tpu.memory_space<vmem>>, vector<1x1x8x8xf32>,
    %c2 = arith.constant 2 : index
    %c0_90 = arith.constant 0 : index
    %c0_91 = arith.constant 0 : index
    %213 = vector.load %arg4[%c2, %c0_90, %c0_91] : memref<3x3x16xf32, #tpu.memory_space<vmem>>, vector<1x3x16xf32>
    %214 = vector.shape_cast %213 : vector<1x3x16xf32> to vector<3x16xf32>
    %c2_92 = arith.constant 2 : index
    %c0_93 = arith.constant 0 : index
    %c0_94 = arith.constant 0 : index
    %215 = vector.load %arg3[%c2_92, %c0_93, %c0_94] : memref<3x32x16xf32, #tpu.memory_space<vmem>>, vector<1x32x16xf32>
    %216 = vector.shape_cast %215 : vector<1x32x16xf32> to vector<32x16xf32>
    %217 = vector.extract_strided_slice %214 {offsets = [0, 0], sizes = [1, 16], strides = [1, 1]} : vector<3x16xf32> to vector<1x16xf32>
    %218 = vector.extract_strided_slice %214 {offsets = [1, 0], sizes = [1, 16], strides = [1, 1]} : vector<3x16xf32> to vector<1x16xf32>
    %219 = vector.extract_strided_slice %214 {offsets = [2, 0], sizes = [1, 1], strides = [1, 1]} : vector<3x16xf32> to vector<1x1xf32>
    %220 = vector.shape_cast %199 : vector<8x32xf32> to vector<8x1x32xf32>
    %221 = vector.shape_cast %199 : vector<8x32xf32> to vector<1x8x32xf32>
    %222 = vector.broadcast %220 : vector<8x1x32xf32> to vector<8x8x32xf32>
    %223 = vector.broadcast %221 : vector<1x8x32xf32> to vector<8x8x32xf32>
    %224 = arith.subf %222, %223 : vector<8x8x32xf32>
    %225 = arith.mulf %224, %224 : vector<8x8x32xf32>
    %226 = vector.shape_cast %225 : vector<8x8x32xf32> to vector<64x32xf32>
    %cst_95 = arith.constant dense<0.000000e+00> : vector<64x16xf32>
    %227 = tpu.matmul %226, %216, %cst_95 {dimension_numbers = #tpu.dot_dimension_numbers<[1], [0], [0], [1], [0, 0, 1, 1], [], []>} : vector<64x32xf32>, vector<32x16xf32>, vector<64x16xf32> -> vector<64x16xf32>
    %228 = vector.broadcast %217 : vector<1x16xf32> to vector<64x16xf32>
    %229 = arith.addf %227, %228 : vector<64x16xf32>
    %cst_96 = arith.constant 0.000000e+00 : f32
    %230 = vector.broadcast %cst_96 : f32 to vector<64x16xf32>
    %231 = arith.cmpf ogt, %229, %230 : vector<64x16xf32>
    %cst_97 = arith.constant 0.00999999977 : f32
    %232 = vector.broadcast %cst_97 : f32 to vector<64x16xf32>
    %233 = arith.mulf %232, %229 : vector<64x16xf32>
    %234 = arith.select %231, %229, %233 : vector<64x16xi1>, vector<64x16xf32>
    %235 = vector.shape_cast %234 : vector<64x16xf32> to vector<8x8x16xf32>
    %236 = vector.shape_cast %218 : vector<1x16xf32> to vector<1x1x16xf32>
    %237 = vector.broadcast %236 : vector<1x1x16xf32> to vector<8x8x16xf32>
    %238 = arith.mulf %235, %237 : vector<8x8x16xf32>
    %cst_98 = arith.constant dense<0.000000e+00> : vector<8x8xf32>
    %239 = vector.multi_reduction <add>, %238, %cst_98 [2] : vector<8x8x16xf32> to vector<8x8xf32>
    %240 = vector.broadcast %219 : vector<1x1xf32> to vector<8x8xf32>
    %241 = arith.addf %239, %240 : vector<8x8xf32>
    %cst_99 = arith.constant 5.000000e-01 : f32
    %242 = vector.broadcast %cst_99 : f32 to vector<8x8xf32>
    %243 = arith.mulf %242, %241 : vector<8x8xf32>
    %244 = math.tanh %243 : vector<8x8xf32>
    %cst_100 = arith.constant 1.000000e+00 : f32
    %245 = vector.broadcast %cst_100 : f32 to vector<8x8xf32>
    %246 = arith.addf %244, %245 : vector<8x8xf32>
    %cst_101 = arith.constant 5.000000e-01 : f32
    %247 = vector.broadcast %cst_101 : f32 to vector<8x8xf32>
    %248 = arith.mulf %247, %246 : vector<8x8xf32>
    %249 = arith.mulf %248, %101 : vector<8x8xf32>
    %c1_102 = arith.constant 1 : index
    %c0_103 = arith.constant 0 : index
    %c0_104 = arith.constant 0 : index
    %250 = vector.load %arg9[%c1_102, %c0_103, %c0_104] : memref<2x2x12xf32, #tpu.memory_space<vmem>>, vector<1x2x12xf32>
    %251 = vector.shape_cast %250 : vector<1x2x12xf32> to vector<2x12xf32>
    %c1_105 = arith.constant 1 : index
    %c0_106 = arith.constant 0 : index
    %c0_107 = arith.constant 0 : index
    %252 = vector.load %arg7[%c1_105, %c0_106, %c0_107] : memref<2x16x12xf32, #tpu.memory_space<vmem>>, vector<1x16x12xf32>
    %253 = vector.shape_cast %252 : vector<1x16x12xf32> to vector<16x12xf32>
    %254 = vector.extract_strided_slice %251 {offsets = [0, 0], sizes = [1, 12], strides = [1, 1]} : vector<2x12xf32> to vector<1x12xf32>
    %c1_108 = arith.constant 1 : index
    %c0_109 = arith.constant 0 : index
    %c0_110 = arith.constant 0 : index
    %255 = vector.load %arg8[%c1_108, %c0_109, %c0_110] : memref<2x12x8xf32, #tpu.memory_space<vmem>>, vector<1x12x8xf32>
    %256 = vector.shape_cast %255 : vector<1x12x8xf32> to vector<12x8xf32>
    %257 = vector.extract_strided_slice %251 {offsets = [1, 0], sizes = [1, 8], strides = [1, 1]} : vector<2x12xf32> to vector<1x8xf32>
    %258 = vector.extract_strided_slice %253 {offsets = [0, 0], sizes = [8, 12], strides = [1, 1]} : vector<16x12xf32> to vector<8x12xf32>
    %cst_111 = arith.constant dense<0.000000e+00> : vector<8x12xf32>
    %259 = tpu.matmul %131, %258, %cst_111 {dimension_numbers = #tpu.dot_dimension_numbers<[1], [0], [0], [1], [0, 0, 1, 1], [], []>} : vector<8x8xf32>, vector<8x12xf32>, vector<8x12xf32> -> vector<8x12xf32>
    %260 = vector.extract_strided_slice %253 {offsets = [8, 0], sizes = [8, 12], strides = [1, 1]} : vector<16x12xf32> to vector<8x12xf32>
    %cst_112 = arith.constant dense<0.000000e+00> : vector<8x12xf32>
    %261 = tpu.matmul %249, %260, %cst_112 {dimension_numbers = #tpu.dot_dimension_numbers<[1], [0], [0], [1], [0, 0, 1, 1], [], []>} : vector<8x8xf32>, vector<8x12xf32>, vector<8x12xf32> -> vector<8x12xf32>
    %262 = arith.addf %259, %261 : vector<8x12xf32>
    %263 = vector.broadcast %254 : vector<1x12xf32> to vector<8x12xf32>
    %264 = arith.addf %262, %263 : vector<8x12xf32>
    %cst_113 = arith.constant 0.000000e+00 : f32
    %265 = vector.broadcast %cst_113 : f32 to vector<8x12xf32>
    %266 = arith.cmpf ogt, %264, %265 : vector<8x12xf32>
    %cst_114 = arith.constant 0.00999999977 : f32
    %267 = vector.broadcast %cst_114 : f32 to vector<8x12xf32>
    %268 = arith.mulf %267, %264 : vector<8x12xf32>
    %269 = arith.select %266, %264, %268 : vector<8x12xi1>, vector<8x12xf32>
    %cst_115 = arith.constant dense<0.000000e+00> : vector<8x8xf32>
    %270 = tpu.matmul %269, %256, %cst_115 {dimension_numbers = #tpu.dot_dimension_numbers<[1], [0], [0], [1], [0, 0, 1, 1], [], []>} : vector<8x12xf32>, vector<12x8xf32>, vector<8x8xf32> -> vector<8x8xf32>
    %271 = vector.broadcast %257 : vector<1x8xf32> to vector<8x8xf32>
    %272 = arith.addf %270, %271 : vector<8x8xf32>
    %cst_116 = arith.constant 5.000000e-01 : f32
    %273 = vector.broadcast %cst_116 : f32 to vector<8x8xf32>
    %274 = arith.mulf %273, %272 : vector<8x8xf32>
    %275 = math.tanh %274 : vector<8x8xf32>
    %cst_117 = arith.constant 1.000000e+00 : f32
    %276 = vector.broadcast %cst_117 : f32 to vector<8x8xf32>
    %277 = arith.addf %275, %276 : vector<8x8xf32>
    %cst_118 = arith.constant 5.000000e-01 : f32
    %278 = vector.broadcast %cst_118 : f32 to vector<8x8xf32>
    %279 = arith.mulf %278, %277 : vector<8x8xf32>
    %c1_119 = arith.constant 1 : index
    %c0_120 = arith.constant 0 : index
    %c0_121 = arith.constant 0 : index
    %280 = vector.load %arg6[%c1_119, %c0_120, %c0_121] : memref<2x3x4xf32, #tpu.memory_space<vmem>>, vector<1x3x4xf32>
    %281 = vector.shape_cast %280 : vector<1x3x4xf32> to vector<3x4xf32>
    %c1_122 = arith.constant 1 : index
    %c0_123 = arith.constant 0 : index
    %c0_124 = arith.constant 0 : index
    %282 = vector.load %arg5[%c1_122, %c0_123, %c0_124] : memref<2x8x4xf32, #tpu.memory_space<vmem>>, vector<1x8x4xf32>
    %283 = vector.shape_cast %282 : vector<1x8x4xf32> to vector<8x4xf32>
    %284 = vector.extract_strided_slice %281 {offsets = [0, 0], sizes = [1, 4], strides = [1, 1]} : vector<3x4xf32> to vector<1x4xf32>
    %285 = vector.extract_strided_slice %281 {offsets = [1, 0], sizes = [1, 4], strides = [1, 1]} : vector<3x4xf32> to vector<1x4xf32>
    %286 = vector.extract_strided_slice %281 {offsets = [2, 0], sizes = [1, 1], strides = [1, 1]} : vector<3x4xf32> to vector<1x1xf32>
    %287 = vector.shape_cast %279 : vector<8x8xf32> to vector<8x1x8xf32>
    %288 = vector.shape_cast %279 : vector<8x8xf32> to vector<1x8x8xf32>
    %289 = vector.broadcast %287 : vector<8x1x8xf32> to vector<8x8x8xf32>
    %290 = vector.broadcast %288 : vector<1x8x8xf32> to vector<8x8x8xf32>
    %291 = arith.subf %289, %290 : vector<8x8x8xf32>
    %292 = arith.mulf %291, %291 : vector<8x8x8xf32>
    %293 = vector.shape_cast %292 : vector<8x8x8xf32> to vector<64x8xf32>
    %cst_125 = arith.constant dense<0.000000e+00> : vector<64x4xf32>
    %294 = tpu.matmul %293, %283, %cst_125 {dimension_numbers = #tpu.dot_dimension_numbers<[1], [0], [0], [1], [0, 0, 1, 1], [], []>} : vector<64x8xf32>, vector<8x4xf32>, vector<64x4xf32> -> vector<64x4xf32>
    %295 = vector.broadcast %284 : vector<1x4xf32> to vector<64x4xf32>
    %296 = arith.addf %294, %295 : vector<64x4xf32>
    %cst_126 = arith.constant 0.000000e+00 : f32
    %297 = vector.broadcast %cst_126 : f32 to vector<64x4xf32>
    %298 = arith.cmpf ogt, %296, %297 : vector<64x4xf32>
    %cst_127 = arith.constant 0.00999999977 : f32
    %299 = vector.broadcast %cst_127 : f32 to vector<64x4xf32>
    %300 = arith.mulf %299, %296 : vector<64x4xf32>
    %301 = arith.select %298, %296, %300 : vector<64x4xi1>, vector<64x4xf32>
    %302 = vector.shape_cast %301 : vector<64x4xf32> to vector<8x8x4xf32>
    %303 = vector.shape_cast %285 : vector<1x4xf32> to vector<1x1x4xf32>
    %304 = vector.broadcast %303 : vector<1x1x4xf32> to vector<8x8x4xf32>
    %305 = arith.mulf %302, %304 : vector<8x8x4xf32>
    %cst_128 = arith.constant dense<0.000000e+00> : vector<8x8xf32>
    %306 = vector.multi_reduction <add>, %305, %cst_128 [2] : vector<8x8x4xf32> to vector<8x8xf32>
    %307 = vector.broadcast %286 : vector<1x1xf32> to vector<8x8xf32>
    %308 = arith.addf %306, %307 : vector<8x8xf32>
    %cst_129 = arith.constant 5.000000e-01 : f32
    %309 = vector.broadcast %cst_129 : f32 to vector<8x8xf32>
    %310 = arith.mulf %309, %308 : vector<8x8xf32>
    %311 = math.tanh %310 : vector<8x8xf32>
    %cst_130 = arith.constant 1.000000e+00 : f32
    %312 = vector.broadcast %cst_130 : f32 to vector<8x8xf32>
    %313 = arith.addf %311, %312 : vector<8x8xf32>
    %cst_131 = arith.constant 5.000000e-01 : f32
    %314 = vector.broadcast %cst_131 : f32 to vector<8x8xf32>
    %315 = arith.mulf %314, %313 : vector<8x8xf32>
    %cst_132 = arith.constant dense<0.000000e+00> : vector<8x8xf32>
    %316 = tpu.matmul %315, %3, %cst_132 {dimension_numbers = #tpu.dot_dimension_numbers<[1], [0], [0], [1], [0, 0, 1, 1], [], []>} : vector<8x8xf32>, vector<8x8xf32>, vector<8x8xf32> -> vector<8x8xf32>
    %cst_133 = arith.constant dense<0xFF800000> : vector<8xf32>
    %317 = vector.multi_reduction <maximumf>, %316, %cst_133 [1] : vector<8x8xf32> to vector<8xf32>
    %318 = vector.shape_cast %317 : vector<8xf32> to vector<8x1xf32>
    %319 = vector.broadcast %318 : vector<8x1xf32> to vector<8x8xf32>
    %320 = arith.subf %316, %319 : vector<8x8xf32>
    %321 = math.exp %320 : vector<8x8xf32>
    %cst_134 = arith.constant dense<0.000000e+00> : vector<8xf32>
    %322 = vector.multi_reduction <add>, %321, %cst_134 [1] : vector<8x8xf32> to vector<8xf32>
    %323 = vector.shape_cast %322 : vector<8xf32> to vector<8x1xf32>
    %324 = vector.broadcast %323 : vector<8x1xf32> to vector<8x8xf32>
    %325 = arith.divf %321, %324 : vector<8x8xf32>
    %c0_135 = arith.constant 0 : index
    %c1_136 = arith.constant 1 : index
    %c0_137 = arith.constant 0 : index
    %c0_138 = arith.constant 0 : index
    %326 = vector.load %arg14[%c0_135, %c1_136, %c0_137, %c0_138] : memref<1x2x8x8xf32, #tpu.memory_space<vmem>>, vector<1x1x8x8xf32>
    %327 = vector.shape_cast %326 : vector<1x1x8x8xf32> to vector<8x8xf32>
    %328 = vector.shape_cast %325 : vector<8x8xf32> to vector<1x1x8x8xf32>
    tpu.vector_store %arg14[%c0_135, %c1_136, %c0_137, %c0_138], %328 {strides = array<i32>} : memref<1x2x8x8xf32, #tpu.memory_space<vmem>>, vector<1x1x8x8xf32>,
    %cst_139 = arith.constant dense<0.000000e+00> : vector<8x8xf32>
    %329 = tpu.matmul %249, %3, %cst_139 {dimension_numbers = #tpu.dot_dimension_numbers<[1], [0], [0], [1], [0, 0, 1, 1], [], []>} : vector<8x8xf32>, vector<8x8xf32>, vector<8x8xf32> -> vector<8x8xf32>
    %cst_140 = arith.constant dense<0xFF800000> : vector<8xf32>
    %330 = vector.multi_reduction <maximumf>, %329, %cst_140 [1] : vector<8x8xf32> to vector<8xf32>
    %331 = vector.shape_cast %330 : vector<8xf32> to vector<8x1xf32>
    %332 = vector.broadcast %331 : vector<8x1xf32> to vector<8x8xf32>
    %333 = arith.subf %329, %332 : vector<8x8xf32>
    %334 = math.exp %333 : vector<8x8xf32>
    %cst_141 = arith.constant dense<0.000000e+00> : vector<8xf32>
    %335 = vector.multi_reduction <add>, %334, %cst_141 [1] : vector<8x8xf32> to vector<8xf32>
    %336 = vector.shape_cast %335 : vector<8xf32> to vector<8x1xf32>
    %337 = vector.broadcast %336 : vector<8x1xf32> to vector<8x8xf32>
    %338 = arith.divf %334, %337 : vector<8x8xf32>
    %c0_142 = arith.constant 0 : index
    %c0_143 = arith.constant 0 : index
    %c0_144 = arith.constant 0 : index
    %339 = vector.load %arg13[%c0_142, %c0_143, %c0_144] : memref<1x8x8xf32, #tpu.memory_space<vmem>>, vector<1x8x8xf32>
    %340 = vector.shape_cast %339 : vector<1x8x8xf32> to vector<8x8xf32>
    %341 = vector.shape_cast %338 : vector<8x8xf32> to vector<1x8x8xf32>
    tpu.vector_store %arg13[%c0_142, %c0_143, %c0_144], %341 {strides = array<i32>} : memref<1x8x8xf32, #tpu.memory_space<vmem>>, vector<1x8x8xf32>,
    return
  }
  func.func @transform_0(%arg0: i32) -> (i32, i32, i32) {
    %c0_i32 = arith.constant 0 : i32
    %c0_i32_0 = arith.constant 0 : i32
    %c0_i32_1 = arith.constant 0 : i32
    return %arg0, %c0_i32, %c0_i32_0 : i32, i32, i32
  }
  func.func @transform_1(%arg0: i32) -> (i32, i32, i32) {
    %c0_i32 = arith.constant 0 : i32
    %c0_i32_0 = arith.constant 0 : i32
    %c0_i32_1 = arith.constant 0 : i32
    return %arg0, %c0_i32, %c0_i32_0 : i32, i32, i32
  }
  func.func @transform_2(%arg0: i32) -> (i32, i32, i32) {
    %c0_i32 = arith.constant 0 : i32
    %c0_i32_0 = arith.constant 0 : i32
    %c0_i32_1 = arith.constant 0 : i32
    %c0_i32_2 = arith.constant 0 : i32
    return %c0_i32, %c0_i32_0, %c0_i32_1 : i32, i32, i32
  }
  func.func @transform_3(%arg0: i32) -> (i32, i32, i32) {
    %c0_i32 = arith.constant 0 : i32
    %c0_i32_0 = arith.constant 0 : i32
    %c0_i32_1 = arith.constant 0 : i32
    %c0_i32_2 = arith.constant 0 : i32
    return %c0_i32, %c0_i32_0, %c0_i32_1 : i32, i32, i32
  }
  func.func @transform_4(%arg0: i32) -> (i32, i32, i32) {
    %c0_i32 = arith.constant 0 : i32
    %c0_i32_0 = arith.constant 0 : i32
    %c0_i32_1 = arith.constant 0 : i32
    %c0_i32_2 = arith.constant 0 : i32
    return %c0_i32, %c0_i32_0, %c0_i32_1 : i32, i32, i32
  }
  func.func @transform_5(%arg0: i32) -> (i32, i32, i32) {
    %c0_i32 = arith.constant 0 : i32
    %c0_i32_0 = arith.constant 0 : i32
    %c0_i32_1 = arith.constant 0 : i32
    %c0_i32_2 = arith.constant 0 : i32
    return %c0_i32, %c0_i32_0, %c0_i32_1 : i32, i32, i32
  }
  func.func @transform_6(%arg0: i32) -> (i32, i32, i32) {
    %c0_i32 = arith.constant 0 : i32
    %c0_i32_0 = arith.constant 0 : i32
    %c0_i32_1 = arith.constant 0 : i32
    %c0_i32_2 = arith.constant 0 : i32
    return %c0_i32, %c0_i32_0, %c0_i32_1 : i32, i32, i32
  }
  func.func @transform_7(%arg0: i32) -> (i32, i32, i32) {
    %c0_i32 = arith.constant 0 : i32
    %c0_i32_0 = arith.constant 0 : i32
    %c0_i32_1 = arith.constant 0 : i32
    %c0_i32_2 = arith.constant 0 : i32
    return %c0_i32, %c0_i32_0, %c0_i32_1 : i32, i32, i32
  }
  func.func @transform_8(%arg0: i32) -> (i32, i32, i32) {
    %c0_i32 = arith.constant 0 : i32
    %c0_i32_0 = arith.constant 0 : i32
    %c0_i32_1 = arith.constant 0 : i32
    %c0_i32_2 = arith.constant 0 : i32
    return %c0_i32, %c0_i32_0, %c0_i32_1 : i32, i32, i32
  }
  func.func @transform_9(%arg0: i32) -> (i32, i32, i32) {
    %c0_i32 = arith.constant 0 : i32
    %c0_i32_0 = arith.constant 0 : i32
    %c0_i32_1 = arith.constant 0 : i32
    %c0_i32_2 = arith.constant 0 : i32
    return %c0_i32, %c0_i32_0, %c0_i32_1 : i32, i32, i32
  }
  func.func @transform_10(%arg0: i32) -> (i32, i32, i32) {
    %c0_i32 = arith.constant 0 : i32
    %c0_i32_0 = arith.constant 0 : i32
    %c0_i32_1 = arith.constant 0 : i32
    %c0_i32_2 = arith.constant 0 : i32
    return %c0_i32, %c0_i32_0, %c0_i32_1 : i32, i32, i32
  }
  func.func @transform_11(%arg0: i32) -> (i32, i32, i32) {
    %c0_i32 = arith.constant 0 : i32
    %c0_i32_0 = arith.constant 0 : i32
    %c0_i32_1 = arith.constant 0 : i32
    %c0_i32_2 = arith.constant 0 : i32
    return %c0_i32, %c0_i32_0, %c0_i32_1 : i32, i32, i32
  }
  func.func @transform_12(%arg0: i32) -> (i32, i32, i32) {
    %c0_i32 = arith.constant 0 : i32
    %c0_i32_0 = arith.constant 0 : i32
    %c0_i32_1 = arith.constant 0 : i32
    return %arg0, %c0_i32, %c0_i32_0 : i32, i32, i32
  }
  func.func @transform_13(%arg0: i32) -> (i32, i32, i32, i32) {
    %c0_i32 = arith.constant 0 : i32
    %c0_i32_0 = arith.constant 0 : i32
    %c0_i32_1 = arith.constant 0 : i32
    %c0_i32_2 = arith.constant 0 : i32
    return %arg0, %c0_i32, %c0_i32_0, %c0_i32_1 : i32, i32, i32, i32
  }
}

</mosaic_0001>

<bundles_post_ra>
// kernel: discriminator_forward.1
= control target key start
LH: loop header
LB: loop body
LE: loop exit
PB: predicated region body
PF: predicated region fallthrough
CT: control target
= control target key end

     0   :  { %s5529_s0 = inlined_call_operand.vmem [shape: f32[4,8,32], index: 0, kind: input, shape index: {}]   ;;  %s5530_s1 = inlined_call_operand.vmem [shape: f32[4,8,8], index: 1, kind: input, shape index: {}]   ;;  %s5531_s2 = inlined_call_operand.hbm [shape: f32[3,32,16], index: 2, kind: input, shape index: {}]   ;;  %s5532_s3 = inlined_call_operand.vmem [shape: f32[3,3,16], index: 3, kind: input, shape index: {}]   ;;  %s5533_s4 = inlined_call_operand.hbm [shape: f32[2,8,4], index: 4, kind: input, shape index: {}]   ;;  %s5534_s5 = inlined_call_operand.hbm [shape: f32[2,3,4], index: 5, kind: input, shape index: {}]   ;;  %s5535_s6 = inlined_call_operand.vmem [shape: f32[2,16,12], index: 6, kind: input, shape index: {}]   ;;  %s5536_s7 = inlined_call_operand.vmem [shape: f32[2,12,8], index: 7, kind: input, shape index: {}]   ;;  %s5537_s8 = inlined_call_operand.hbm [shape: f32[2,2,12], index: 8, kind: input, shape index: {}]   ;;  %s5538_s9 = inlined_call_operand.hbm [shape: f32[2,64,48], index: 9, kind: input, shape index: {}]   ;;  %s5539_s10 = inlined_call_operand.hbm [shape: f32[2,48,32], index: 10, kind: input, shape index: {}]   ;;  %s5540_s11 = inlined_call_operand.vmem [shape: f32[2,2,48], index: 11, kind: input, shape index: {}]   ;;  %s5541_s12 = inlined_call_operand.hbm [shape: f32[4,8,8], index: 12, kind: output, shape index: {0}]   ;;  %s5542_s13 = inlined_call_operand.vmem [shape: f32[4,2,8,8], index: 13, kind: output, shape index: {1}]  }
   0x1   :  { %5556 = sst [smem:[#allocation25_spill]] %s5531_s2 }
   0x2   :  { %5557 = sst [smem:[#allocation26_spill]] %s5533_s4 }
   0x3   :  { %19 = vsyncpa [#allocation3], 0 }
   0x4   :  { %20 = vsyncpa [#allocation6], 0 }
   0x5   :  { %21 = vsyncpa [#allocation9], 0 }
   0x6   :  { %22 = vsyncpa [#allocation12], 0 }
   0x7   :  { %23 = vsyncpa [#allocation4], 0 }
   0x8   :  { %25 = vsyncpa [#allocation4 + $0x1], 0  ;;  %s4780_s25 = smov 0   ;;  %s4782_s26 = smov 0  }
   0x9   :  { %s4784_s27 = smov 0   ;;  %s4786_s28 = smov 0  }
   0xa LB: > { %5558 = sst [smem:[#allocation19_spill]] %s4679_s25  ;;  %s4801_s29 = sadd.s32 4294967295, %s4691_s28   ;;  %s4691_s28 = sphi %s4786_s28, %s5587_s28   ;;  %s4687_s27 = sphi %s4784_s27, %s5589_s27   ;;  %s4683_s26 = sphi %s4782_s26, %s5591_s26   ;;  %s4679_s25 = sphi %s4780_s25, %s5590_s25  }
   0xb   : > { %5559 = sst [smem:[#allocation20_spill]] %s4687_s27  ;;  %s3863_s30 = sadd.s32 4294967294, %s4691_s28  }
   0xc   : > { %5560 = sst [smem:[#allocation21_spill]] %s4691_s28  ;;  %s4805_s14 = sadd.s32 1, %s4691_s28  }
   0xd   : > { %5561 = sst [smem:[#allocation22_spill]] %s4805_s14  ;;  %s300_s15 = sadd.s32 1, %s4687_s27 }
   0xe   : > { %s297_s16 = ssub.s32 %s4691_s28, %s4805_s14  ;;  %p310_p0 = scmp.ne.s32.totalorder %s4687_s27, %s4683_s26 }
   0xf   : > { %p298_p1 = scmp.eq.s32.totalorder %s297_s16, 0  ;;  %p311_p2 = scmp.eq.s32.totalorder %s4801_s29, 3 }
  0x10   : > { %p316_p3 = scmp.ne.s32.totalorder %s4683_s26, %s4679_s25  ;;  %p317_p4 = scmp.eq.s32.totalorder %s3863_s30, 3 }
  0x11   : > { %s4816_s17 = scalar_select %p298_p1, %s4687_s27, %s300_s15  }
  0x12   : > { %p4818_p5 = por %p311_p2, %p310_p0  ;;  %p4822_p6 = por %p317_p4, %p316_p3 }
  0x13   : > { %5562 = sst [smem:[#allocation23_spill]] %s4816_s17  ;;  %p3864_p7 = scmp.ge.s32.totalorder %s4691_s28, 1 }
  0x14   : > { %s5564_s19 = scalar_select %p4822_p6, 1, 0 }
  0x15   : > { %p350_p8 = scmp.lt.s32.totalorder %s4691_s28, 5  ;;  %p5553_p9 = scmp.eq.s32.totalorder %s4801_s29, 0 }
  0x16   : > { %5565 = sst [smem:[#allocation24_spill]] %s5564_s19  ;;  %s4693_s21 = smov [#allocation5]  }
  0x17   : > { %p4829_p10 = pnand %p3864_p7, %p350_p8  ;;  %s378_s22 = sshll.u32 %s4693_s21, 4  ;;  %s379_s22 = int_to_ptr.vmem [resolvable:$true] %s378_s22 }
  0x18   : > { %s4694_s24 = smov [#allocation8]   ;;  %s4470_s16 = scalar_lea.vmem %s379_s22, 256 }
  0x19   : > { %p4271_p11 = pneg %p4829_p10  ;;  %s410_s30 = sshll.u32 %s4694_s24, 4  ;;  %s411_s30 = int_to_ptr.vmem [resolvable:$true] %s410_s30 }
  0x1a   : > { %p4471_p0 = scmp.ne.s32.totalorder %s379_s22, %s4470_s16  ;;  %p4478_p3 = scmp.lt.s32.totalorder %s379_s22, %s379_s22 }
  0x1b   : > { %p4837_p12 = pnand %p5553_p9, %p4271_p11  ;;  %p4479_p4 = scmp.lt.s32.totalorder %s4470_s16, %s4470_s16 }
  0x1d   : > { %p4843_p13 = pneg %p4837_p12  ;;  %p4480_p7 = por %p4479_p4, %p4478_p3 }
  0x1f   : > { %p4473_p1 = pnand %p4471_p0, %p4843_p13 }
  0x21   : > { %p4474_p2 = pneg %p4473_p1 }
  0x23   : > { %p4481_p8 = pnand %p4480_p7, %p4474_p2 }
  0x25   : > { %4484 = shalt.err (!%p4481_p8)
}
  0x26   : > { %s5549_s21 = smov 128   ;;  %s5551_s24 = smov 8  }
  0x27   : > { %s5569_s4 = sld [smem:[#allocation26_spill]]  ;;  %s4496_s14 = scalar_lea.vmem %s411_s30, 64 }
  0x28   : > { %p4497_p11 = scmp.ne.s32.totalorder %s411_s30, %s4496_s14  ;;  %p4504_p3 = scmp.lt.s32.totalorder %s411_s30, %s411_s30 }
  0x29   : > { %p4505_p2 = scmp.lt.s32.totalorder %s4496_s14, %s4496_s14 }
  0x2a   : > { %p4499_p0 = pnand %p4497_p11, %p4843_p13 }
  0x2b   : > { %p4506_p4 = por %p4505_p2, %p4504_p3 }
  0x2c   : > { %p4500_p1 = pneg %p4499_p0 }
  0x2d   : > { %4277 = dma.hbm_to_vmem [thread:$0]  (!%p4837_p12), %s5569_s4, 256, %s379_s22, [#allocation6], %s5549_s21, %s5549_s21, %s5551_s24  }
  0x2e   : > { %p4507_p7 = pnand %p4506_p4, %p4500_p1 }
  0x30   : > { %4510 = shalt.err (!%p4507_p7)
}
  0x31   : > { %s4697_s16 = smov 32   ;;  %s4698_s19 = smov 2  }
  0x32   : > { %4283 = dma.hbm_to_vmem [thread:$0]  (!%p4837_p12), %s5537_s8, 64, %s411_s30, [#allocation9], %s4697_s16, %s4697_s16, %s4698_s19  }
  0x33   : > { %s4699_s27 = smov [#allocation2]   ;;  %s4700_s22 = smov [#allocation7]  }
  0x34   : > { %s362_s17 = sshll.u32 %s4699_s27, 4  ;;  %s391_s21 = sshll.u32 %s4700_s22, 4  ;;  %s363_s17 = int_to_ptr.vmem [resolvable:$true] %s362_s17  ;;  %s392_s21 = int_to_ptr.vmem [resolvable:$true] %s391_s21 }
  0x35   : > { %s4522_s24 = scalar_lea.vmem %s363_s17, 1536  ;;  %p4530_p1 = scmp.lt.s32.totalorder %s363_s17, %s363_s17 }
  0x36   : > { %p4523_p8 = scmp.ne.s32.totalorder %s363_s17, %s4522_s24  ;;  %p4531_p3 = scmp.lt.s32.totalorder %s4522_s24, %s4522_s24 }
  0x38   : > { %p4525_p11 = pnand %p4523_p8, %p4843_p13  ;;  %p4532_p2 = por %p4531_p3, %p4530_p1 }
  0x3a   : > { %p4526_p0 = pneg %p4525_p11 }
  0x3c   : > { %p4533_p4 = pnand %p4532_p2, %p4526_p0 }
  0x3e   : > { %4536 = shalt.err (!%p4533_p4)
}
  0x3f   : > { %s5570_s25 = smov 8   ;;  %s5571_s28 = smov 128  }
  0x40   : > { %s5572_s2 = sld [smem:[#allocation25_spill]]  ;;  %s4548_s30 = scalar_lea.vmem %s392_s21, 128 }
  0x41   : > { %p4549_p7 = scmp.ne.s32.totalorder %s392_s21, %s4548_s30  ;;  %p4556_p9 = scmp.lt.s32.totalorder %s392_s21, %s392_s21 }
  0x42   : > { %p4557_p6 = scmp.lt.s32.totalorder %s4548_s30, %s4548_s30 }
  0x43   : > { %p4551_p8 = pnand %p4549_p7, %p4843_p13 }
  0x44   : > { %p4558_p1 = por %p4557_p6, %p4556_p9 }
  0x45   : > { %p4552_p11 = pneg %p4551_p8 }
  0x46   : > { %4274 = dma.hbm_to_vmem [thread:$0]  (!%p4837_p12), %s5572_s2, 1536, %s363_s17, [#allocation3], %s5571_s28, %s5571_s28, %s5570_s25  }
  0x47   : > { %p4559_p0 = pnand %p4558_p1, %p4552_p11 }
  0x49   : > { %4562 = shalt.err (!%p4559_p0)
}
  0x4a   : > { %s4701_s24 = smov 64   ;;  %s4702_s16 = smov 4  }
  0x4b   : > { %4280 = dma.hbm_to_vmem [thread:$0]  (!%p4837_p12), %s5534_s5, 128, %s392_s21, [#allocation6], %s4701_s24, %s4701_s24, %s4702_s16  }
  0x4c   : > { %s4703_s17 = smov [#allocation10]   ;;  %s4704_s19 = smov [#allocation11]  }
  0x4d   : > { %s423_s14 = sshll.u32 %s4703_s17, 4  ;;  %s436_s2 = sshll.u32 %s4704_s19, 4  ;;  %s424_s14 = int_to_ptr.vmem [resolvable:$true] %s423_s14  ;;  %s437_s2 = int_to_ptr.vmem [resolvable:$true] %s436_s2 }
  0x4e   : > { %s4574_s4 = scalar_lea.vmem %s424_s14, 2048  ;;  %p4582_p2 = scmp.lt.s32.totalorder %s424_s14, %s424_s14 }
  0x4f   : > { %p4575_p3 = scmp.ne.s32.totalorder %s424_s14, %s4574_s4  ;;  %p4583_p4 = scmp.lt.s32.totalorder %s4574_s4, %s4574_s4 }
  0x51   : > { %p4577_p6 = pnand %p4575_p3, %p4843_p13  ;;  %p4584_p7 = por %p4583_p4, %p4582_p2 }
  0x53   : > { %p4578_p9 = pneg %p4577_p6 }
  0x55   : > { %p4585_p8 = pnand %p4584_p7, %p4578_p9 }
  0x57   : > { %4588 = shalt.err (!%p4585_p8)
}
  0x58   : > { %4286 = dma.hbm_to_vmem [thread:$0]  (!%p4837_p12), %s5538_s9, 2048, %s424_s14, [#allocation9], %s5571_s28, %s5571_s28, %s5570_s25  }
  0x59   : > { %s4600_s24 = scalar_lea.vmem %s437_s2, 1536  ;;  %p4608_p3 = scmp.lt.s32.totalorder %s437_s2, %s437_s2 }
  0x5a   : > { %p4601_p11 = scmp.ne.s32.totalorder %s437_s2, %s4600_s24  ;;  %p4609_p6 = scmp.lt.s32.totalorder %s4600_s24, %s4600_s24 }
  0x5c   : > { %p4603_p1 = pnand %p4601_p11, %p4843_p13  ;;  %p4610_p2 = por %p4609_p6, %p4608_p3 }
  0x5e   : > { %p4604_p0 = pneg %p4603_p1 }
  0x60   : > { %p4611_p9 = pnand %p4610_p2, %p4604_p0 }
  0x62   : > { %4614 = shalt.err (!%p4611_p9)
}
  0x63   : > { %4289 = dma.hbm_to_vmem [thread:$0]  (!%p4837_p12), %s5539_s10, 1536, %s437_s2, [#allocation12], %s5571_s28, %s5571_s28, %s5570_s25  }
  0x64   : > { %469 = sbr.rel (%p4829_p10) target bundleno = 3811 (0xee3), region = 68  ;;  %p5573_p13 = scmp.eq.s32.totalorder (!%p4829_p10), %s4801_s29, 0 }
  0x69   : > { %4658 = dma.done.wait (%p5573_p13), [#allocation3], 1536   ;;  %p5574_p4 = pmov %p5573_p13 }
  0x6b   : > { %4660 = vsyncadd (%p5574_p4), [#allocation3], 4294965760  ;;  %p5575_p7 = pmov %p5574_p4 }
  0x6c   : > { %p5576_p8 = pmov %p5574_p4 }
  0x6d   : > { %4662 = dma.done.wait (%p5575_p7), [#allocation6], 384  }
  0x6e   : > { %4664 = vsyncadd (%p5576_p8), [#allocation6], 4294966912  ;;  %p5577_p11 = pmov %p5574_p4 }
  0x6f   : > { %p5578_p12 = pmov %p5574_p4 }
  0x70   : > { %4666 = dma.done.wait (%p5577_p11), [#allocation9], 2112  }
  0x71   : > { %4668 = vsyncadd (%p5578_p12), [#allocation9], 4294965184  ;;  %p5579_p10 = pmov %p5574_p4 }
  0x72   : > { %p5580_p1 = pmov %p5574_p4 }
  0x73   : > { %4670 = dma.done.wait (%p5579_p10), [#allocation12], 1536  }
  0x74   : > { %4672 = vsyncadd (%p5580_p1), [#allocation12], 4294965760  ;;  %p541_p0 = scmp.lt.s32.totalorder %s4801_s29, 3  ;;  %v566_v0 = vlaneseq  ;;  %v4705_v1 = vmov 0.0   ;;  %vm4706_vm0 = vmmov 0   ;;  %vm908_vm1 = vcmask 64512  }
  0x75   : > { %4071 = vmatprep.subr.mxu1 %v4705_v1  ;;  %4073 = vmatprep.mubr.msk.f32.mxu1 %vm4706_vm0, %v4705_v1  ;;  %v4707_v2 = vmov 1966171168   ;;  %v560_v9 = vld [vmem:[#allocation2 + $0x18] sm:$0xff]  ;;  %v559_v11 = vld [vmem:[#allocation2 + $0x10] sm:$0xff]  ;;  %v558_v15 = vld [vmem:[#allocation2 + $0x8] sm:$0xff]  ;;  %vm671_vm2 = vcmask 261120  }
  0x76   : > { %s4924_s2 = scalar_select %p541_p0, %s4801_s29, 3  ;;  %v564_v3 = vunpack.c.l.s4 %v4707_v2  ;;  %v4927_v4 = vshrl.u32 %v566_v0, 7  ;;  %4051 = vmatprep.subr.mxu0 %v560_v9  ;;  %v1008_v10 = vld [vmem:[#allocation2 + $0x38] sm:$0xff]  ;;  %v1007_v16 = vld [vmem:[#allocation2 + $0x30] sm:$0xff]  ;;  %v557_v20 = vld [vmem:[#allocation2] sm:$0xff]  ;;  %vm837_vm5 = vcmask 130048  }
  0x77   : > { %4052 = vmatpush3.msra.mxu0 %v560_v9  ;;  %v1006_v21 = vld [vmem:[#allocation2 + $0x28] sm:$0xff]  ;;  %v1005_v27 = vld [vmem:[#allocation2 + $0x20] sm:$0xff]  ;;  %s3952_s24 = sshll.u32 %s4801_s29, 7  ;;  %s4709_s29 = smov [#allocation13]  }
  0x78   : > { %s3880_s20 = sshll.u32 %s4924_s2, 3  ;;  %v565_v5 = vunpack.c.0.s8 %v564_v3  ;;  %v4954_v13 = vsub.s32 0, %v4927_v4  ;;  %4053 = vmatprep.subr.mxu0 %v559_v11  ;;  %v556_v55 = vld [vmem:[%s5532_s3] sm:$0x7]  ;;  %v3897_v56 = vld [vmem:[%s5532_s3 + $0x4] sm:$0x7]  ;;  %s5491_s15 = scalar_lea.hbm %s5541_s12, %s3952_s24 }
  0x79   : > { %s4933_s25 = scalar_lea.vmem %s5529_s0, %s3880_s20  ;;  %s4938_s22 = scalar_lea.vmem %s5530_s1, %s3880_s20  ;;  %4054 = vmatpush3.msra.mxu0 %v559_v11  ;;  %v863_v57 = vrot.slane %v556_v55, 2  ;;  %v1179_v58 = vrot.slane %v3897_v56, 2  ;;  %v5018_v63 = vsub.s32 1, %v4927_v4 }
  0x7a   : > { %v4941_v6 = vsub.s32 %v565_v5, %v4927_v4  ;;  %v4944_v7 = vld [vmem:[%s4933_s25] sm:$0xff]  ;;  %4055 = vmatprep.subr.mxu0 %v558_v15  ;;  %v5012_v61 = vrot.slane %v556_v55, %v4954_v13  ;;  %v5015_v62 = vrot.slane %v3897_v56, %v4954_v13  ;;  %s4619_s17 = sshll.u32 %s4709_s29, 4  ;;  %s4620_s17 = int_to_ptr.vmem [resolvable:$false] %s4619_s17 }
  0x7b   : > { %v4947_v8 = vld [vmem:[%s4938_s22] sm:$0xff]  ;;  %v562_v14 = vcombine.high %v4944_v7, %v4944_v7  ;;  %4056 = vmatpush3.msra.mxu0 %v558_v15  ;;  %4235 = vpush %v863_v57 }
  0x7c   : > { %4072 = vmatpush3.xpose.msk.msra.mxu1 %vm908_vm1, %v4947_v8  ;;  %v569_v12 = vrot.slane %v4944_v7, %v4941_v6  ;;  %4057 = vmatprep.subr.mxu0 %v557_v20  ;;  %4237 = vpush %v1179_v58 }
  0x7d   : > { %4076 = vmatprep.subr.mxu1 %v1008_v10  ;;  %v576_v19 = vrot.slane %v562_v14, %v4941_v6  ;;  %4058 = vmatpush3.msra.mxu0 %v557_v20  ;;  %v5026_v14 = vrot.slane %v556_v55, %v5018_v63 }
  0x7e   : > { %v577_v17 = vcombine.high %v569_v12, %v569_v12  ;;  %v585_v18 = vrot.slane %v569_v12, %v4941_v6  ;;  %4096 = vmatprep.subr.mxu0 %v4705_v1  ;;  %v5023_v12 = vrot.slane %v3897_v56, %v5018_v63 }
  0x7f   : > { %4074 = vmatmul.mubr.msk.f32.vlgmr.msra.gmra.mxu1 %vm908_vm1, %v4947_v8  ;;  %v592_v25 = vrot.slane %v576_v19, %v4941_v6  ;;  %v578_v26 = vcombine.high %v576_v19, %v576_v19 }
  0x80   : > { %4077 = vmatpush3.msra.mxu1 %v1008_v10  ;;  %v607_v22 = vcombine.high %v585_v18, %v585_v18  ;;  %v614_v23 = vrot.slane %v585_v18, %v4954_v13  ;;  %v599_v24 = vrot.slane %v577_v17, %v4941_v6 }
  0x81   : > { %4078 = vmatprep.subr.mxu1 %v1007_v16  ;;  %v630_v32 = vrot.slane %v592_v25, %v4954_v13  ;;  %v606_v33 = vrot.slane %v578_v26, %v4941_v6  ;;  %v608_v37 = vcombine.high %v592_v25, %v592_v25 }
  0x82   : > { %4079 = vmatpush3.msra.mxu1 %v1007_v16  ;;  %v651_v28 = vsub.f32 %v614_v23, %v4944_v7  ;;  %v618_v29 = vrot.slane %v599_v24, %v4954_v13  ;;  %v622_v30 = vrot.slane %v607_v22, %v4954_v13  ;;  %v609_v31 = vcombine.high %v599_v24, %v599_v24 }
  0x83   : > { %4080 = vmatprep.subr.mxu1 %v1006_v21  ;;  %v655_v39 = vsub.f32 %v630_v32, %v4944_v7  ;;  %v634_v40 = vrot.slane %v606_v33, %v4954_v13  ;;  %v610_v41 = vcombine.high %v606_v33, %v606_v33  ;;  %v638_v44 = vrot.slane %v608_v37, %v4954_v13 }
  0x84   : > { %4081 = vmatpush3.msra.mxu1 %v1006_v21  ;;  %v659_v34 = vmul.f32 %v651_v28, %v651_v28  ;;  %v652_v35 = vsub.f32 %v618_v29, %v4944_v7  ;;  %v653_v36 = vsub.f32 %v622_v30, %v4944_v7  ;;  %v626_v38 = vrot.slane %v609_v31, %v4954_v13 }
  0x85   : > { %4082 = vmatprep.subr.mxu1 %v1005_v27  ;;  %v656_v46 = vsub.f32 %v634_v40, %v4944_v7  ;;  %v642_v47 = vrot.slane %v610_v41, %v4954_v13  ;;  %v663_v49 = vmul.f32 %v655_v39, %v655_v39  ;;  %v657_v50 = vsub.f32 %v638_v44, %v4944_v7 }
  0x86   : > { %4059 = vmatprep.mubr.msk.f32.mxu0 %vm671_vm2, %v659_v34  ;;  %4083 = vmatpush3.msra.mxu1 %v1005_v27  ;;  %v660_v42 = vmul.f32 %v652_v35, %v652_v35  ;;  %v661_v43 = vmul.f32 %v653_v36, %v653_v36  ;;  %v654_v45 = vsub.f32 %v626_v38, %v4944_v7 }
  0x87   : > { %4084 = vmatprep.mubr.msk.f32.mxu1 %vm671_vm2, %v659_v34  ;;  %4106 = vmatprep.subr.mxu1 %v4705_v1  ;;  %v664_v51 = vmul.f32 %v656_v46, %v656_v46  ;;  %v658_v52 = vsub.f32 %v642_v47, %v4944_v7  ;;  %v665_v53 = vmul.f32 %v657_v50, %v657_v50 }
  0x88   : > { %4060 = vmatmul.mubr.msk.f32.vlgmr.msra.gmra.mxu0 %vm671_vm2, %v660_v42  ;;  %4085 = vmatmul.mubr.msk.f32.vlgmr.msra.gmra.mxu1 %vm671_vm2, %v660_v42  ;;  %v662_v48 = vmul.f32 %v654_v45, %v654_v45 }
  0x89   : > { %4062 = vmatprep.mubr.msk.f32.mxu0 %vm671_vm2, %v661_v43  ;;  %4087 = vmatprep.mubr.msk.f32.mxu1 %vm671_vm2, %v661_v43  ;;  %v666_v54 = vmul.f32 %v658_v52, %v658_v52 }
  0x8c   : > { %4063 = vmatmul.mubr.msk.f32.gmra.mxu0 %vm671_vm2, %v662_v48  ;;  %4088 = vmatmul.mubr.msk.f32.gmra.mxu1 %vm671_vm2, %v662_v48 }
  0x8d   : > { %4065 = vmatprep.mubr.msk.f32.mxu0 %vm671_vm2, %v663_v49  ;;  %4090 = vmatprep.mubr.msk.f32.mxu1 %vm671_vm2, %v663_v49 }
  0x90   : > { %4066 = vmatmul.mubr.msk.f32.gmra.mxu0 %vm671_vm2, %v664_v51  ;;  %4091 = vmatmul.mubr.msk.f32.gmra.mxu1 %vm671_vm2, %v664_v51 }
  0x91   : > { %4068 = vmatprep.mubr.msk.f32.mxu0 %vm671_vm2, %v665_v53  ;;  %4093 = vmatprep.mubr.msk.f32.mxu1 %vm671_vm2, %v665_v53 }
  0x94   : > { %4069 = vmatmul.mubr.msk.f32.gmra.mxu0 %vm671_vm2, %v666_v54  ;;  %4094 = vmatmul.mubr.msk.f32.gmra.mxu1 %vm671_vm2, %v666_v54 }
  0x95   : > { %4098 = vmatprep.mubr.msk.f32.mxu0 %vm4706_vm0, %v4705_v1  ;;  %4110 = vmatprep.mubr.msk.f32.mxu1 %vm4706_vm0, %v4705_v1 }
  0xac   : > { %s4236_s20 = spop %4235 }
  0xad   : > { %s4238_s23 = spop %4237 }
 0x13f   : > { %v5009_v59 = vpop.f32.mrf.mxu1 }
 0x141   : > { %v4075_v60 = vpop.f32.mrf.mxu1 }
 0x148   : > { %v4061_v2 = vpop.f32.mrf.mxu0  ;;  %v4086_v3 = vpop.f32.mrf.mxu1 }
 0x149   : > { %v768_v5 = vadd.f32 %v4061_v2, %v5012_v61  ;;  %v1085_v9 = vadd.f32 %v4086_v3, %v5015_v62 }
 0x14a   : > { %v762_v10 = vpop.f32.mrf.mxu0  ;;  %v1079_v11 = vpop.f32.mrf.mxu1 }
 0x14b   : > { %v810_v15 = vmul.f32 0.01, %v768_v5  ;;  %v1127_v16 = vmul.f32 0.01, %v1085_v9  ;;  %v763_v17 = vadd.f32 %v762_v10, %v5012_v61  ;;  %v1080_v18 = vadd.f32 %v1079_v11, %v5015_v62 }
 0x14c   : > { %v4064_v19 = vpop.f32.mrf.mxu0  ;;  %v4089_v20 = vpop.f32.mrf.mxu1  ;;  %vm1119_vm3 = vcmp.gt.f32.partialorder %v1085_v9, 0.0  ;;  %vm802_vm4 = vcmp.gt.f32.partialorder %v768_v5, 0.0 }
 0x14d   : > { %v778_v21 = vadd.f32 %v4064_v19, %v5012_v61  ;;  %v1095_v22 = vadd.f32 %v4089_v20, %v5015_v62  ;;  %v1135_v25 = vsel %vm1119_vm3, %v1085_v9, %v1127_v16  ;;  %v818_v26 = vsel %vm802_vm4, %v768_v5, %v810_v15 }
 0x14e   : > { %v772_v23 = vpop.f32.mrf.mxu0  ;;  %v1089_v24 = vpop.f32.mrf.mxu1  ;;  %v809_v27 = vmul.f32 0.01, %v763_v17  ;;  %v1126_v28 = vmul.f32 0.01, %v1080_v18  ;;  %v1147_v29 = vmul.f32 %v5023_v12, %v1135_v25  ;;  %v830_v30 = vmul.f32 %v5026_v14, %v818_v26 }
 0x14f   : > { %vm801_vm6 = vcmp.gt.f32.partialorder %v763_v17, 0.0  ;;  %vm1118_vm7 = vcmp.gt.f32.partialorder %v1080_v18, 0.0  ;;  %v773_v31 = vadd.f32 %v772_v23, %v5012_v61  ;;  %v1090_v34 = vadd.f32 %v1089_v24, %v5015_v62 }
 0x150   : > { %v4067_v32 = vpop.f32.mrf.mxu0  ;;  %v4092_v33 = vpop.f32.mrf.mxu1  ;;  %v812_v35 = vmul.f32 0.01, %v778_v21  ;;  %v1129_v36 = vmul.f32 0.01, %v1095_v22  ;;  %v1157_v37 = vsel %vm837_vm5, %v1147_v29, 0.0  ;;  %v841_v38 = vsel %vm837_vm5, %v830_v30, 0.0 }
 0x151   : > { %vm804_vm8 = vcmp.gt.f32.partialorder %v778_v21, 0.0  ;;  %vm1121_vm9 = vcmp.gt.f32.partialorder %v1095_v22, 0.0  ;;  %1158 = vadd.xlane.f32.xlu1 %v1157_v37  ;;  %842 = vadd.xlane.f32.xlu0 %v841_v38  ;;  %v1134_v41 = vsel %vm1118_vm7, %v1080_v18, %v1126_v28  ;;  %v817_v42 = vsel %vm801_vm6, %v763_v17, %v809_v27 }
 0x152   : > { %v782_v39 = vpop.f32.mrf.mxu0  ;;  %v1099_v40 = vpop.f32.mrf.mxu1  ;;  %vm803_vm10 = vcmp.gt.f32.partialorder %v773_v31, 0.0  ;;  %v811_v43 = vmul.f32 0.01, %v773_v31  ;;  %v1105_v44 = vadd.f32 %v4092_v33, %v5015_v62  ;;  %vm1120_vm11 = vcmp.gt.f32.partialorder %v1090_v34, 0.0 }
 0x153   : > { %v788_v47 = vadd.f32 %v4067_v32, %v5012_v61  ;;  %v1146_v48 = vmul.f32 %v5023_v12, %v1134_v41  ;;  %v829_v49 = vmul.f32 %v5026_v14, %v817_v42  ;;  %v1128_v50 = vmul.f32 0.01, %v1090_v34 }
 0x154   : > { %v4070_v45 = vpop.f32.mrf.mxu0  ;;  %v4095_v46 = vpop.f32.mrf.mxu1  ;;  %v783_v51 = vadd.f32 %v782_v39, %v5012_v61  ;;  %v1137_v52 = vsel %vm1121_vm9, %v1095_v22, %v1129_v36  ;;  %v820_v53 = vsel %vm804_vm8, %v778_v21, %v812_v35  ;;  %v1131_v58 = vmul.f32 0.01, %v1105_v44 }
 0x155   : > { %v1154_v54 = vsel %vm837_vm5, %v1146_v48, 0.0  ;;  %v838_v55 = vsel %vm837_vm5, %v829_v49, 0.0  ;;  %v1149_v56 = vmul.f32 %v5023_v12, %v1137_v52  ;;  %v832_v57 = vmul.f32 %v5026_v14, %v820_v53 }
 0x156   : > { %1155 = vadd.xlane.f32.xlu1 %v1154_v54  ;;  %839 = vadd.xlane.f32.xlu0 %v838_v55  ;;  %v1100_v60 = vadd.f32 %v1099_v40, %v5015_v62  ;;  %v792_v2 = vpop.f32.mrf.mxu0  ;;  %v1109_v3 = vpop.f32.mrf.mxu1  ;;  %v814_v5 = vmul.f32 0.01, %v788_v47  ;;  %vm1123_vm12 = vcmp.gt.f32.partialorder %v1105_v44, 0.0  ;;  %vm806_vm13 = vcmp.gt.f32.partialorder %v788_v47, 0.0 }
 0x157   : > { %v813_v9 = vmul.f32 0.01, %v783_v51  ;;  %v1136_v10 = vsel %vm1120_vm11, %v1090_v34, %v1128_v50  ;;  %v819_v11 = vsel %vm803_vm10, %v773_v31, %v811_v43  ;;  %v1163_v15 = vsel %vm837_vm5, %v1149_v56, 0.0 }
 0x158   : > { %v847_v16 = vsel %vm837_vm5, %v832_v57, 0.0  ;;  %v793_v17 = vadd.f32 %v792_v2, %v5012_v61  ;;  %v1110_v18 = vadd.f32 %v1109_v3, %v5015_v62  ;;  %v1130_v19 = vmul.f32 0.01, %v1100_v60 }
 0x159   : > { %v1148_v20 = vmul.f32 %v5023_v12, %v1136_v10  ;;  %v831_v21 = vmul.f32 %v5026_v14, %v819_v11  ;;  %v1139_v22 = vsel %vm1123_vm12, %v1105_v44, %v1131_v58  ;;  %vm805_vm14 = vcmp.gt.f32.partialorder %v783_v51, 0.0 }
 0x15a   : > { %1164 = vadd.xlane.f32.xlu1 %v1163_v15  ;;  %848 = vadd.xlane.f32.xlu0 %v847_v16  ;;  %vm1122_vm15 = vcmp.gt.f32.partialorder %v1100_v60, 0.0  ;;  %v822_v23 = vsel %vm806_vm13, %v788_v47, %v814_v5  ;;  %v798_v24 = vadd.f32 %v4070_v45, %v5012_v61  ;;  %v1115_v25 = vadd.f32 %v4095_v46, %v5015_v62 }
 0x15b   : > { %v1160_v26 = vsel %vm837_vm5, %v1148_v20, 0.0  ;;  %v844_v27 = vsel %vm837_vm5, %v831_v21, 0.0  ;;  %v1151_v28 = vmul.f32 %v5023_v12, %v1139_v22  ;;  %v834_v29 = vmul.f32 %v5026_v14, %v822_v23 }
 0x15c   : > { %v815_v30 = vmul.f32 0.01, %v793_v17  ;;  %v1132_v31 = vmul.f32 0.01, %v1110_v18  ;;  %v1138_v32 = vsel %vm1122_vm15, %v1100_v60, %v1130_v19  ;;  %v821_v33 = vsel %vm805_vm14, %v783_v51, %v813_v9 }
 0x15d   : > { %vm807_vm3 = vcmp.gt.f32.partialorder %v793_v17, 0.0  ;;  %vm1124_vm4 = vcmp.gt.f32.partialorder %v1110_v18, 0.0  ;;  %v1169_v61 = vsel %vm837_vm5, %v1151_v28, 0.0  ;;  %v853_v62 = vsel %vm837_vm5, %v834_v29, 0.0 }
 0x15e   : > { %1161 = vadd.xlane.f32.xlu1 %v1160_v26  ;;  %845 = vadd.xlane.f32.xlu0 %v844_v27  ;;  %v1150_v34 = vmul.f32 %v5023_v12, %v1138_v32  ;;  %v833_v35 = vmul.f32 %v5026_v14, %v821_v33  ;;  %v816_v36 = vmul.f32 0.01, %v798_v24  ;;  %v1133_v37 = vmul.f32 0.01, %v1115_v25 }
 0x15f   : > { %v1140_v38 = vsel %vm1124_vm4, %v1110_v18, %v1132_v31  ;;  %v823_v39 = vsel %vm807_vm3, %v793_v17, %v815_v30  ;;  %vm808_vm6 = vcmp.gt.f32.partialorder %v798_v24, 0.0  ;;  %vm1125_vm7 = vcmp.gt.f32.partialorder %v1115_v25, 0.0 }
 0x160   : > { %v1166_v40 = vsel %vm837_vm5, %v1150_v34, 0.0  ;;  %v850_v41 = vsel %vm837_vm5, %v833_v35, 0.0  ;;  %v1152_v42 = vmul.f32 %v5023_v12, %v1140_v38  ;;  %v835_v43 = vmul.f32 %v5026_v14, %v823_v39 }
 0x161   : > { %v1141_v44 = vsel %vm1125_vm7, %v1115_v25, %v1133_v37  ;;  %v824_v45 = vsel %vm808_vm6, %v798_v24, %v816_v36  ;;  %v907_v50 = vmul.f32 %v4947_v8, %v4947_v8  ;;  %v1235_v8 = vld [vmem:[%s5536_s7 + $0x8] sm:$0xf]  ;;  %vm5555_vm8 = vcmask 1043456  }
 0x162   : > { %1170 = vadd.xlane.f32.xlu1 %v1169_v61  ;;  %854 = vadd.xlane.f32.xlu0 %v853_v62  ;;  %v1172_v46 = vsel %vm837_vm5, %v1152_v42, 0.0  ;;  %v856_v47 = vsel %vm837_vm5, %v835_v43, 0.0  ;;  %v1153_v48 = vmul.f32 %v5023_v12, %v1141_v44  ;;  %v836_v49 = vmul.f32 %v5026_v14, %v824_v45  ;;  %v1233_v12 = vld [vmem:[%s5535_s6 + $0x8] sm:$0xff] }
 0x163   : > { %v909_v53 = vsel %vm908_vm1, %v907_v50, 0.0  ;;  %4097 = vmatpush3.msra.mxu0 %v1233_v12  ;;  %4107 = vmatpush3.msk.msra.mxu1 %vm5555_vm8, %v1235_v8  ;;  %v5092_v55 = vstv %s4238_s23  ;;  %v5094_v56 = vstv %s4236_s20  ;;  %vm1276_vm9 = vcmask 1041409  }
 0x164   : > { %v1175_v51 = vsel %vm837_vm5, %v1153_v48, 0.0  ;;  %v859_v52 = vsel %vm837_vm5, %v836_v49, 0.0  ;;  %4101 = vmatprep.subr.mxu0 %v4705_v1  ;;  %4108 = vmatprep.subr.mxu1 %v4705_v1  ;;  %vm1278_vm10 = vcmask 1042434   ;;  %vm1280_vm12 = vcmask 1043459  }
 0x165   : > { %vm1282_vm13 = vcmask 1044484   ;;  %vm1284_vm14 = vcmask 1045509   ;;  %vm1286_vm15 = vcmask 1046534   ;;  %vm988_vm3 = vcmp.gt.f32.partialorder %v5009_v59, 0.5 }
 0x166   : > { %1167 = vadd.xlane.f32.xlu1 %v1166_v40  ;;  %851 = vadd.xlane.f32.xlu0 %v850_v41  ;;  %vm1288_vm4 = vcmask 1047559   ;;  %vm5554_vm7 = vcmask 97280  }
 0x16a   : > { %1173 = vadd.xlane.f32.xlu1 %v1172_v46  ;;  %857 = vadd.xlane.f32.xlu0 %v856_v47 }
 0x16e   : > { %1176 = vadd.xlane.f32.xlu1 %v1175_v51  ;;  %860 = vadd.xlane.f32.xlu0 %v859_v52 }
 0x172   : > { %910 = vadd.xlane.f32.xlu0 %v909_v53 }
 0x1da   : > { %v1159_v14 = vpop.xlane.xlu1 %1158  ;;  %v843_v54 = vpop.xlane.xlu0 %842 }
 0x1db   : > { %v1184_v57 = vadd.f32 %v5092_v55, %v1159_v14  ;;  %v868_v58 = vadd.f32 %v5094_v56, %v843_v54 }
 0x1dd   : > { %v1192_v9 = vmul.f32 0.5, %v1184_v57  ;;  %v876_v10 = vmul.f32 0.5, %v868_v58 }
 0x1df   : > { %v1156_v60 = vpop.xlane.xlu1 %1155  ;;  %v840_v2 = vpop.xlane.xlu0 %839  ;;  %4358 = vtanh.f32 %v1192_v9  ;;  %v5113_v9 = vand.u32 127, %v566_v0 }
 0x1e0   : > { %v1183_v3 = vadd.f32 %v5092_v55, %v1156_v60  ;;  %v867_v5 = vadd.f32 %v5094_v56, %v840_v2  ;;  %4360 = vtanh.f32 %v876_v10 }
 0x1e2   : > { %v1191_v16 = vmul.f32 0.5, %v1183_v3  ;;  %v875_v18 = vmul.f32 0.5, %v867_v5 }
 0x1e3   : > { %v1165_v11 = vpop.xlane.xlu1 %1164  ;;  %v849_v15 = vpop.xlane.xlu0 %848 }
 0x1e4   : > { %v1186_v17 = vadd.f32 %v5092_v55, %v1165_v11  ;;  %v870_v19 = vadd.f32 %v5094_v56, %v849_v15  ;;  %4362 = vtanh.f32 %v1191_v16 }
 0x1e5   : > { %4364 = vtanh.f32 %v875_v18 }
 0x1e6   : > { %v1194_v20 = vmul.f32 0.5, %v1186_v17  ;;  %v878_v25 = vmul.f32 0.5, %v870_v19 }
 0x1e7   : > { %v1162_v21 = vpop.xlane.xlu1 %1161  ;;  %v846_v22 = vpop.xlane.xlu0 %845 }
 0x1e8   : > { %v1185_v23 = vadd.f32 %v5092_v55, %v1162_v21  ;;  %v869_v24 = vadd.f32 %v5094_v56, %v846_v22  ;;  %4366 = vtanh.f32 %v1194_v20  ;;  %v5117_v22 = vsub.s32 %v5113_v9, %v4927_v4 }
 0x1ea   : > { %v1193_v26 = vmul.f32 0.5, %v1185_v23  ;;  %v877_v27 = vmul.f32 0.5, %v869_v24 }
 0x1eb   : > { %v1171_v28 = vpop.xlane.xlu1 %1170  ;;  %v855_v29 = vpop.xlane.xlu0 %854 }
 0x1ec   : > { %4368 = vtanh.f32 %v1193_v26  ;;  %v1188_v30 = vadd.f32 %v5092_v55, %v1171_v28  ;;  %v872_v31 = vadd.f32 %v5094_v56, %v855_v29  ;;  %v4359_v38 = vpop.eup %4358 }
 0x1ed   : > { %4370 = vtanh.f32 %v877_v27  ;;  %v4361_v41 = vpop.eup %4360  ;;  %v1208_v51 = vadd.f32 1.0, %v4359_v38 }
 0x1ee   : > { %4372 = vtanh.f32 %v878_v25  ;;  %v1196_v32 = vmul.f32 0.5, %v1188_v30  ;;  %v880_v33 = vmul.f32 0.5, %v872_v31  ;;  %v892_v8 = vadd.f32 1.0, %v4361_v41 }
 0x1ef   : > { %v1168_v61 = vpop.xlane.xlu1 %1167  ;;  %v852_v62 = vpop.xlane.xlu0 %851  ;;  %v1216_v10 = vmul.f32 0.5, %v1208_v51 }
 0x1f0   : > { %v1187_v34 = vadd.f32 %v5092_v55, %v1168_v61  ;;  %v871_v35 = vadd.f32 %v5094_v56, %v852_v62  ;;  %4374 = vtanh.f32 %v1196_v32  ;;  %v900_v11 = vmul.f32 0.5, %v892_v8 }
 0x1f1   : > { %4376 = vtanh.f32 %v880_v33  ;;  %v4363_v43 = vpop.eup %4362 }
 0x1f2   : > { %v1195_v36 = vmul.f32 0.5, %v1187_v34  ;;  %v879_v37 = vmul.f32 0.5, %v871_v35  ;;  %v4365_v45 = vpop.eup %4364  ;;  %v1207_v14 = vadd.f32 1.0, %v4363_v43  ;;  %v5119_v23 = vmul.f32 %v1216_v10, %v900_v11 }
 0x1f3   : > { %v1174_v39 = vpop.xlane.xlu1 %1173  ;;  %v858_v40 = vpop.xlane.xlu0 %857  ;;  %v891_v54 = vadd.f32 1.0, %v4365_v45 }
 0x1f4   : > { %4378 = vtanh.f32 %v1195_v36  ;;  %v1189_v42 = vadd.f32 %v5092_v55, %v1174_v39  ;;  %v873_v44 = vadd.f32 %v5094_v56, %v858_v40  ;;  %v1251_v36 = vrot.slane %v5119_v23, %v5117_v22 }
 0x1f5   : > { %4380 = vtanh.f32 %v879_v37  ;;  %v4367_v50 = vpop.eup %4366  ;;  %v899_v15 = vmul.f32 0.5, %v891_v54 }
 0x1f6   : > { %v1197_v46 = vmul.f32 0.5, %v1189_v42  ;;  %v881_v47 = vmul.f32 0.5, %v873_v44 }
 0x1f7   : > { %v1177_v48 = vpop.xlane.xlu1 %1176  ;;  %v861_v49 = vpop.xlane.xlu0 %860 }
 0x1f8   : > { %4382 = vtanh.f32 %v1197_v46  ;;  %v1190_v52 = vadd.f32 %v5092_v55, %v1177_v48  ;;  %v874_v53 = vadd.f32 %v5094_v56, %v861_v49  ;;  %v1215_v55 = vmul.f32 0.5, %v1207_v14 }
 0x1f9   : > { %v4369_v12 = vpop.eup %4368  ;;  %4384 = vtanh.f32 %v881_v47  ;;  %v1210_v56 = vadd.f32 1.0, %v4367_v50 }
 0x1fa   : > { %v4371_v57 = vpop.eup %4370  ;;  %v1209_v58 = vadd.f32 1.0, %v4369_v12  ;;  %v1198_v60 = vmul.f32 0.5, %v1190_v52  ;;  %v882_v2 = vmul.f32 0.5, %v874_v53  ;;  %v5121_v0 = vmul.f32 %v1215_v55, %v899_v15 }
 0x1fb   : > { %v4373_v3 = vpop.eup %4372  ;;  %v893_v5 = vadd.f32 1.0, %v4371_v57  ;;  %v1218_v25 = vmul.f32 0.5, %v1210_v56  ;;  %v911_v34 = vpop.xlane.xlu0 %910 }
 0x1fc   : > { %4386 = vtanh.f32 %v1198_v60  ;;  %v894_v16 = vadd.f32 1.0, %v4373_v3  ;;  %v1217_v17 = vmul.f32 0.5, %v1209_v58  ;;  %v1247_v61 = vrot.slane %v5121_v0, %v5117_v22 }
 0x1fd   : > { %4388 = vtanh.f32 %v882_v2  ;;  %v901_v18 = vmul.f32 0.5, %v893_v5  ;;  %v4375_v19 = vpop.eup %4374  ;;  %vm985_vm11 = vcmp.gt.f32.partialorder %v911_v34, 0.5 }
 0x1fe   : > { %v4377_v20 = vpop.eup %4376  ;;  %v902_v26 = vmul.f32 0.5, %v894_v16  ;;  %v1212_v29 = vadd.f32 1.0, %v4375_v19  ;;  %v1277_v46 = vsel %vm1276_vm9, %v1251_v36, %v1247_v61  ;;  %v3894_v14 = vsel %vm985_vm11, 1.0, %v4705_v1  ;;  %v1232_v16 = vld [vmem:[%s5535_s6] sm:$0xff] }
 0x1ff   : > { %v5123_v27 = vmul.f32 %v1217_v17, %v901_v18  ;;  %v896_v30 = vadd.f32 1.0, %v4377_v20  ;;  %v992_v3 = vsub.f32 1.0, %v3894_v14  ;;  %v3895_v17 = vsel %vm988_vm3, 1.0, %v4705_v1  ;;  %v1234_v20 = vld [vmem:[%s5536_s7] sm:$0xff] }
 0x200   : > { %v5129_v37 = vmul.f32 %v1218_v25, %v902_v26  ;;  %v1220_v40 = vmul.f32 0.5, %v1212_v29  ;;  %v991_v19 = vmul.f32 %v3895_v17, %v3894_v14  ;;  %4109 = vmatpush3.msra.mxu1 %v1234_v20  ;;  %v1530_v61 = vld [vmem:[#allocation5] sm:$0xff]  ;;  %vm999_vm11 = vcmp.ne.s32.totalorder %v4927_v4, %v5113_v9 }
 0x201   : > { %v4379_v21 = vpop.eup %4378  ;;  %v1255_v38 = vrot.slane %v5123_v27, %v5117_v22  ;;  %v904_v41 = vmul.f32 0.5, %v896_v30  ;;  %v993_v15 = vmul.f32 0.125, %v992_v3  ;;  %4127 = vmatprep.subr.mxu1 %v4705_v1  ;;  %v5183_v34 = vsel %vm999_vm11, 1.0, %v4705_v1 }
 0x202   : > { %v4381_v24 = vpop.eup %4380  ;;  %v1211_v28 = vadd.f32 1.0, %v4379_v21  ;;  %v1259_v49 = vrot.slane %v5129_v37, %v5117_v22 }
 0x203   : > { %v895_v31 = vadd.f32 1.0, %v4381_v24  ;;  %v1279_v50 = vsel %vm1278_vm10, %v1255_v38, %v1277_v46  ;;  %v5141_v53 = vmul.f32 %v1220_v40, %v904_v41  ;;  %v994_v59 = vadd.f32 %v993_v15, %v991_v19  ;;  %v1231_v24 = vld [vmem:[#allocation8] sm:$0x3] }
 0x204   : > { %v1219_v32 = vmul.f32 0.5, %v1211_v28  ;;  %v1281_v57 = vsel %vm1280_vm12, %v1259_v49, %v1279_v50  ;;  %v1438_v26 = vrot.slane %v1231_v24, %v4954_v13  ;;  %v1900_v38 = vsub.s32 3, %v4927_v4 }
 0x205   : > { %v4383_v33 = vpop.eup %4382  ;;  %v903_v62 = vmul.f32 0.5, %v895_v31  ;;  %v1267_v5 = vrot.slane %v5141_v53, %v5117_v22  ;;  %v1446_v41 = vrot.slane %v1231_v24, %v5018_v63 }
 0x206   : > { %v4385_v35 = vpop.eup %4384  ;;  %v1213_v39 = vadd.f32 1.0, %v4383_v33  ;;  %v1901_v9 = vrot.slane %v5183_v34, %v1900_v38  ;;  %v1529_v38 = vld [vmem:[#allocation7] sm:$0x7] }
 0x207   : > { %v5133_v42 = vmul.f32 %v1219_v32, %v903_v62  ;;  %v897_v43 = vadd.f32 1.0, %v4385_v35  ;;  %v1893_v62 = vsub.s32 2, %v4927_v4  ;;  %v1887_v35 = vrot.slane %v5183_v34, %v5018_v63 }
 0x208   : > { %v1221_v44 = vmul.f32 0.5, %v1213_v39  ;;  %v1907_v39 = vsub.s32 4, %v4927_v4 }
 0x209   : > { %v4387_v45 = vpop.eup %4386  ;;  %v905_v47 = vmul.f32 0.5, %v897_v43  ;;  %v1263_v51 = vrot.slane %v5133_v42, %v5117_v22  ;;  %v1894_v36 = vrot.slane %v5183_v34, %v1893_v62  ;;  %1889 = vbcast.lane.b32.xlu0 %v1887_v35, 256 }
 0x20a   : > { %v4389_v48 = vpop.eup %4388  ;;  %v1214_v52 = vadd.f32 1.0, %v4387_v45  ;;  %v1908_v40 = vrot.slane %v5183_v34, %v1907_v39  ;;  %v1640_v39 = vrot.slane %v1529_v38, %v4954_v13 }
 0x20b   : > { %v5143_v12 = vmul.f32 %v1221_v44, %v905_v47  ;;  %v898_v8 = vadd.f32 1.0, %v4389_v48  ;;  %v1283_v60 = vsel %vm1282_vm13, %v1263_v51, %v1281_v57 }
 0x20c   : > { %v1222_v54 = vmul.f32 0.5, %v1214_v52  ;;  %v1285_v55 = vsel %vm1284_vm14, %v1267_v5, %v1283_v60 }
 0x20d   : > { %v906_v58 = vmul.f32 0.5, %v898_v8  ;;  %v1271_v2 = vrot.slane %v5143_v12, %v5117_v22 }
 0x20f   : > { %v5152_v10 = vmul.f32 %v1222_v54, %v906_v58  ;;  %v1287_v56 = vsel %vm1286_vm15, %v1271_v2, %v1285_v55 }
 0x211   : > { %v1275_v11 = vrot.slane %v5152_v10, %v5117_v22 }
 0x213   : > { %v1289_v18 = vsel %vm1288_vm4, %v1275_v11, %v1287_v56 }
 0x214   : > { %4099 = vmatmul.mubr.msk.f32.vlgmr.msra.gmra.mxu0 %vm908_vm1, %v1289_v18 }
 0x215   : > { %4102 = vmatpush3.msra.mxu0 %v1232_v16  ;;  %4103 = vmatprep.mubr.msk.f32.mxu0 %vm4706_vm0, %v4705_v1 }
 0x216   : > { %4113 = vmatprep.subr.mxu0 %v1530_v61 }
 0x218   : > { %4104 = vmatmul.mubr.msk.f32.vlgmr.msra.gmra.mxu0 %vm908_vm1, %v994_v59 }
 0x219   : > { %4114 = vmatpush3.msra.mxu0 %v1530_v61 }
 0x21a   : > { %4143 = vmatprep.subr.mxu0 %v4705_v1 }
 0x2d4   : > { %v1358_v21 = vpop.f32.mrf.mxu0 }
 0x2d6   : > { %v4100_v25 = vpop.f32.mrf.mxu0 }
 0x2d8   : > { %v1431_v28 = vpop.f32.mrf.mxu0 }
 0x2d9   : > { %v1432_v29 = vadd.f32 %v1431_v28, %v1358_v21 }
 0x2da   : > { %v4105_v30 = vpop.f32.mrf.mxu0 }
 0x2db   : > { %v1439_v31 = vadd.f32 %v1438_v26, %v1432_v29 }
 0x2dd   : > { %vm1440_vm6 = vcmp.gt.f32.partialorder %v1439_v31, 0.0  ;;  %v1441_v32 = vmul.f32 0.01, %v1439_v31 }
 0x2df   : > { %v1442_v33 = vsel %vm1440_vm6, %v1439_v31, %v1441_v32  ;;  %vm1806_vm6 = vcmask 31744  }
 0x2e0   : > { %4111 = vmatmul.mubr.msk.f32.vlgmr.msra.gmra.mxu1 %vm5554_vm7, %v1442_v33 }
 0x2e1   : > { %4128 = vmatpush3.msra.mxu1 %v4944_v7  ;;  %4129 = vmatprep.mubr.msk.f32.mxu1 %vm4706_vm0, %v4705_v1  ;;  %v1880_v7 = vrot.slane %v5183_v34, %v4954_v13 }
 0x2e2   : > { %4132 = vmatprep.subr.mxu1 %v4705_v1 }
 0x2e3   : > { %1882 = vbcast.lane.b32.xlu1 %v1880_v7, 256 }
 0x2e7   : > { %1896 = vbcast.lane.b32.xlu1 %v1894_v36, 256 }
 0x2eb   : > { %1903 = vbcast.lane.b32.xlu1 %v1901_v9, 256  ;;  %v1832_v9 = vrot.slane %v1529_v38, 2 }
 0x2ed   : > { %4239 = vpush %v1832_v9 }
 0x2ef   : > { %1910 = vbcast.lane.b32.xlu1 %v1908_v40, 256 }
 0x31e   : > { %s4240_s14 = spop %4239 }
 0x3a0   : > { %v1521_v43 = vpop.f32.mrf.mxu1 }
 0x3a1   : > { %v1522_v44 = vadd.f32 %v1521_v43, %v1446_v41 }
 0x3a2   : > { %v4112_v45 = vpop.f32.mrf.mxu1 }
 0x3a3   : > { %v1525_v46 = vmul.f32 0.5, %v1522_v44  ;;  %v1797_v44 = vrot.slane %v1529_v38, %v5018_v63 }
 0x3a5   : > { %4390 = vtanh.f32 %v1525_v46 }
 0x3b2   : > { %v4391_v47 = vpop.eup %4390 }
 0x3b3   : > { %v1527_v48 = vadd.f32 1.0, %v4391_v47 }
 0x3b5   : > { %v5195_v49 = vmul.f32 0.5, %v1527_v48 }
 0x3b7   : > { %v1539_v50 = vrot.slane %v5195_v49, %v4941_v6  ;;  %v1532_v51 = vcombine.high %v5195_v49, %v5195_v49 }
 0x3b9   : > { %v1547_v52 = vcombine.high %v1539_v50, %v1539_v50  ;;  %v1555_v8 = vrot.slane %v1539_v50, %v4941_v6  ;;  %v1546_v14 = vrot.slane %v1532_v51, %v4941_v6 }
 0x3bb   : > { %v1584_v54 = vrot.slane %v1555_v8, %v4954_v13  ;;  %v1569_v57 = vrot.slane %v1547_v52, %v4941_v6  ;;  %v1577_v58 = vcombine.high %v1555_v8, %v1555_v8  ;;  %v1562_v60 = vrot.slane %v1546_v14, %v4941_v6 }
 0x3bc   : > { %v1548_v2 = vcombine.high %v1546_v14, %v1546_v14 }
 0x3bd   : > { %v1621_v3 = vsub.f32 %v1584_v54, %v5195_v49  ;;  %v1588_v5 = vrot.slane %v1569_v57, %v4954_v13  ;;  %v1592_v11 = vrot.slane %v1577_v58, %v4954_v13  ;;  %v1579_v55 = vcombine.high %v1569_v57, %v1569_v57 }
 0x3be   : > { %v1600_v15 = vrot.slane %v1562_v60, %v4954_v13  ;;  %v1576_v56 = vrot.slane %v1548_v2, %v4941_v6  ;;  %v1578_v16 = vcombine.high %v1562_v60, %v1562_v60 }
 0x3bf   : > { %v1629_v17 = vmul.f32 %v1621_v3, %v1621_v3  ;;  %v1622_v18 = vsub.f32 %v1588_v5, %v5195_v49  ;;  %v1623_v19 = vsub.f32 %v1592_v11, %v5195_v49  ;;  %v1596_v59 = vrot.slane %v1579_v55, %v4954_v13 }
 0x3c0   : > { %v1604_v20 = vrot.slane %v1576_v56, %v4954_v13  ;;  %v1580_v26 = vcombine.high %v1576_v56, %v1576_v56  ;;  %v1625_v28 = vsub.f32 %v1600_v15, %v5195_v49  ;;  %v1608_v29 = vrot.slane %v1578_v16, %v4954_v13 }
 0x3c1   : > { %4115 = vmatprep.mubr.msk.f32.mxu0 %vm908_vm1, %v1629_v17  ;;  %v1630_v21 = vmul.f32 %v1622_v18, %v1622_v18  ;;  %v1631_v24 = vmul.f32 %v1623_v19, %v1623_v19  ;;  %v1624_v25 = vsub.f32 %v1596_v59, %v5195_v49 }
 0x3c2   : > { %v1626_v31 = vsub.f32 %v1604_v20, %v5195_v49  ;;  %v1612_v32 = vrot.slane %v1580_v26, %v4954_v13  ;;  %v1633_v33 = vmul.f32 %v1625_v28, %v1625_v28  ;;  %v1627_v61 = vsub.f32 %v1608_v29, %v5195_v49 }
 0x3c3   : > { %4116 = vmatmul.mubr.msk.f32.vlgmr.msra.gmra.mxu0 %vm908_vm1, %v1630_v21  ;;  %v1632_v30 = vmul.f32 %v1624_v25, %v1624_v25 }
 0x3c4   : > { %4118 = vmatprep.mubr.msk.f32.mxu0 %vm908_vm1, %v1631_v24  ;;  %v1634_v62 = vmul.f32 %v1626_v31, %v1626_v31  ;;  %v1628_v7 = vsub.f32 %v1612_v32, %v5195_v49  ;;  %v1635_v35 = vmul.f32 %v1627_v61, %v1627_v61 }
 0x3c6   : > { %v1636_v36 = vmul.f32 %v1628_v7, %v1628_v7 }
 0x3c7   : > { %4119 = vmatmul.mubr.msk.f32.gmra.mxu0 %vm908_vm1, %v1632_v30 }
 0x3c8   : > { %4121 = vmatprep.mubr.msk.f32.mxu0 %vm908_vm1, %v1633_v33 }
 0x3cb   : > { %4122 = vmatmul.mubr.msk.f32.gmra.mxu0 %vm908_vm1, %v1634_v62 }
 0x3cc   : > { %4124 = vmatprep.mubr.msk.f32.mxu0 %vm908_vm1, %v1635_v35 }
 0x3cf   : > { %4125 = vmatmul.mubr.msk.f32.gmra.mxu0 %vm908_vm1, %v1636_v36 }
 0x3d0   : > { %4151 = vmatprep.mubr.msk.f32.mxu0 %vm4706_vm0, %v4705_v1 }
 0x483   : > { %v4117_v40 = vpop.f32.mrf.mxu0 }
 0x484   : > { %v1737_v41 = vadd.f32 %v4117_v40, %v1640_v39 }
 0x485   : > { %v1731_v43 = vpop.f32.mrf.mxu0 }
 0x486   : > { %vm1771_vm3 = vcmp.gt.f32.partialorder %v1737_v41, 0.0  ;;  %v1779_v45 = vmul.f32 0.01, %v1737_v41  ;;  %v1732_v46 = vadd.f32 %v1731_v43, %v1640_v39  ;;  %v1914_v43 = vsub.s32 5, %v4927_v4 }
 0x487   : > { %v4120_v47 = vpop.f32.mrf.mxu0 }
 0x488   : > { %vm1770_vm11 = vcmp.gt.f32.partialorder %v1732_v46, 0.0  ;;  %v1778_v48 = vmul.f32 0.01, %v1732_v46  ;;  %v1747_v50 = vadd.f32 %v4120_v47, %v1640_v39  ;;  %v1787_v51 = vsel %vm1771_vm3, %v1737_v41, %v1779_v45 }
 0x489   : > { %v1741_v52 = vpop.f32.mrf.mxu0  ;;  %v1799_v8 = vmul.f32 %v1797_v44, %v1787_v51  ;;  %v1921_v41 = vsub.s32 6, %v4927_v4  ;;  %v1928_v47 = vsub.s32 7, %v4927_v4  ;;  %v2095_v51 = vld [vmem:[#allocation10 + $0x10] sm:$0xff]  ;;  %v2093_v4 = vld [vmem:[#allocation10] sm:$0xff] }
 0x48a   : > { %vm1773_vm7 = vcmp.gt.f32.partialorder %v1747_v50, 0.0  ;;  %v1781_v14 = vmul.f32 0.01, %v1747_v50  ;;  %v1742_v54 = vadd.f32 %v1741_v52, %v1640_v39  ;;  %v1786_v57 = vsel %vm1770_vm11, %v1732_v46, %v1778_v48  ;;  %v2094_v52 = vld [vmem:[#allocation10 + $0x8] sm:$0xff] }
 0x48b   : > { %v4123_v58 = vpop.f32.mrf.mxu0  ;;  %v1810_v60 = vsel %vm1806_vm6, %v1799_v8, 0.0  ;;  %v1798_v2 = vmul.f32 %v1797_v44, %v1786_v57  ;;  %v1922_v45 = vrot.slane %v5183_v34, %v1921_v41  ;;  %v1915_v46 = vrot.slane %v5183_v34, %v1914_v43  ;;  %v5255_v8 = vld [vmem:[%s4938_s22] sm:$0xff] }
 0x48c   : > { %vm1772_vm8 = vcmp.gt.f32.partialorder %v1742_v54, 0.0  ;;  %v1780_v3 = vmul.f32 0.01, %v1742_v54  ;;  %v1757_v5 = vadd.f32 %v4123_v58, %v1640_v39  ;;  %1811 = vadd.xlane.f32.xlu0 %v1810_v60  ;;  %v1789_v11 = vsel %vm1773_vm7, %v1747_v50, %v1781_v14  ;;  %v2096_v50 = vld [vmem:[#allocation10 + $0x18] sm:$0xff]  ;;  %v1883_v14 = vpop.permute.xlu1 %1882  ;;  %v1890_v58 = vpop.permute.xlu0 %1889 }
 0x48d   : > { %v1751_v55 = vpop.f32.mrf.mxu0  ;;  %v1807_v15 = vsel %vm1806_vm6, %v1798_v2, 0.0  ;;  %v1801_v56 = vmul.f32 %v1797_v44, %v1789_v11  ;;  %v1929_v48 = vrot.slane %v5183_v34, %v1928_v47  ;;  %4144 = vmatpush3.msra.mxu0 %v2096_v50  ;;  %v4456_v34 = vld [vmem:[%s4933_s25] sm:$0xff]  ;;  %v1834_v2 = vstv %s4240_s14 }
 0x48e   : > { %vm1775_vm3 = vcmp.gt.f32.partialorder %v1757_v5, 0.0  ;;  %v1783_v16 = vmul.f32 0.01, %v1757_v5  ;;  %v1752_v17 = vadd.f32 %v1751_v55, %v1640_v39  ;;  %1808 = vadd.xlane.f32.xlu1 %v1807_v15  ;;  %v1788_v18 = vsel %vm1772_vm8, %v1742_v54, %v1780_v3  ;;  %4145 = vmatprep.subr.mxu0 %v4705_v1 }
 0x48f   : > { %v4126_v19 = vpop.f32.mrf.mxu0  ;;  %v1816_v59 = vsel %vm1806_vm6, %v1801_v56, 0.0  ;;  %v1800_v20 = vmul.f32 %v1797_v44, %v1788_v18  ;;  %4146 = vmatpush3.msra.mxu0 %v2095_v51 }
 0x490   : > { %vm1774_vm11 = vcmp.gt.f32.partialorder %v1752_v17, 0.0  ;;  %v1782_v21 = vmul.f32 0.01, %v1752_v17  ;;  %v1767_v24 = vadd.f32 %v4126_v19, %v1640_v39  ;;  %1817 = vadd.xlane.f32.xlu0 %v1816_v59  ;;  %v1791_v25 = vsel %vm1775_vm3, %v1757_v5, %v1783_v16  ;;  %4147 = vmatprep.subr.mxu0 %v4705_v1  ;;  %v5260_v54 = vpop.permute.xlu1 %1896 }
 0x491   : > { %v1761_v26 = vpop.f32.mrf.mxu0  ;;  %v1813_v28 = vsel %vm1806_vm6, %v1800_v20, 0.0  ;;  %v1803_v29 = vmul.f32 %v1797_v44, %v1791_v25  ;;  %4148 = vmatpush3.msra.mxu0 %v2094_v52 }
 0x492   : > { %vm1777_vm7 = vcmp.gt.f32.partialorder %v1767_v24, 0.0  ;;  %v1785_v30 = vmul.f32 0.01, %v1767_v24  ;;  %v1762_v31 = vadd.f32 %v1761_v26, %v1640_v39  ;;  %1814 = vadd.xlane.f32.xlu1 %v1813_v28  ;;  %v1790_v32 = vsel %vm1774_vm11, %v1752_v17, %v1782_v21  ;;  %4149 = vmatprep.subr.mxu0 %v4705_v1 }
 0x493   : > { %v1822_v33 = vsel %vm1806_vm6, %v1803_v29, 0.0  ;;  %v1802_v61 = vmul.f32 %v1797_v44, %v1790_v32  ;;  %4150 = vmatpush3.msra.mxu0 %v2093_v4  ;;  %vm2264_vm11 = vcmask 392192  }
 0x494   : > { %vm1776_vm8 = vcmp.gt.f32.partialorder %v1762_v31, 0.0  ;;  %v1784_v62 = vmul.f32 0.01, %v1762_v31  ;;  %1823 = vadd.xlane.f32.xlu0 %v1822_v33  ;;  %v1793_v7 = vsel %vm1777_vm7, %v1767_v24, %v1785_v30  ;;  %4152 = vmatmul.mubr.msk.f32.vlgmr.msra.gmra.mxu0 %vm671_vm2, %v4456_v34  ;;  %v1904_v57 = vpop.permute.xlu1 %1903 }
 0x495   : > { %v1819_v35 = vsel %vm1806_vm6, %v1802_v61, 0.0  ;;  %v1805_v36 = vmul.f32 %v1797_v44, %v1793_v7  ;;  %4169 = vmatprep.subr.mxu0 %v4705_v1  ;;  %4171 = vmatprep.mubr.msk.f32.mxu0 %vm4706_vm0, %v4705_v1 }
 0x496   : > { %1820 = vadd.xlane.f32.xlu1 %v1819_v35  ;;  %v1792_v38 = vsel %vm1776_vm8, %v1762_v31, %v1784_v62  ;;  %4170 = vmatpush3.msra.mxu0 %v5255_v8 }
 0x497   : > { %v1828_v9 = vsel %vm1806_vm6, %v1805_v36, 0.0  ;;  %v1804_v40 = vmul.f32 %v1797_v44, %v1792_v38  ;;  %v4708_v44 = vmov 0  }
 0x498   : > { %1829 = vadd.xlane.f32.xlu0 %v1828_v9  ;;  %4356 = vset.pattern.permute.xlu1 %v4708_v44  ;;  %v5262_v60 = vpop.permute.xlu1 %1910 }
 0x499   : > { %v1825_v39 = vsel %vm1806_vm6, %v1804_v40, 0.0  ;;  %4355 = vset.pattern.permute.xlu0 %v4708_v44 }
 0x49a   : > { %1826 = vadd.xlane.f32.xlu1 %v1825_v39 }
 0x4ab   : > { %1924 = vbcast.lane.b32.xlu1 %v1922_v45, 256 }
 0x4ae   : > { %1917 = vbcast.lane.b32.xlu0 %v1915_v46, 256 }
 0x4b2   : > { %1931 = vbcast.lane.b32.xlu0 %v1929_v48, 256 }
 0x515   : > { %v1812_v3 = vpop.xlane.xlu0 %1811 }
 0x516   : > { %v1837_v5 = vadd.f32 %v1834_v2, %v1812_v3 }
 0x517   : > { %v1809_v11 = vpop.xlane.xlu1 %1808 }
 0x518   : > { %v1845_v55 = vmul.f32 0.5, %v1837_v5  ;;  %v1836_v15 = vadd.f32 %v1834_v2, %v1809_v11 }
 0x519   : > { %v1818_v56 = vpop.xlane.xlu0 %1817 }
 0x51a   : > { %4392 = vtanh.f32 %v1845_v55  ;;  %v1844_v16 = vmul.f32 0.5, %v1836_v15  ;;  %v1839_v17 = vadd.f32 %v1834_v2, %v1818_v56 }
 0x51b   : > { %v1815_v18 = vpop.xlane.xlu1 %1814 }
 0x51c   : > { %4394 = vtanh.f32 %v1844_v16  ;;  %v1847_v19 = vmul.f32 0.5, %v1839_v17  ;;  %v1838_v59 = vadd.f32 %v1834_v2, %v1815_v18 }
 0x51d   : > { %v1824_v20 = vpop.xlane.xlu0 %1823 }
 0x51e   : > { %4396 = vtanh.f32 %v1847_v19  ;;  %v1846_v21 = vmul.f32 0.5, %v1838_v59  ;;  %v1841_v24 = vadd.f32 %v1834_v2, %v1824_v20 }
 0x51f   : > { %v1821_v25 = vpop.xlane.xlu1 %1820 }
 0x520   : > { %4398 = vtanh.f32 %v1846_v21  ;;  %v1849_v26 = vmul.f32 0.5, %v1841_v24  ;;  %v1840_v28 = vadd.f32 %v1834_v2, %v1821_v25 }
 0x521   : > { %v1830_v29 = vpop.xlane.xlu0 %1829 }
 0x522   : > { %4400 = vtanh.f32 %v1849_v26  ;;  %v1848_v30 = vmul.f32 0.5, %v1840_v28  ;;  %v1843_v31 = vadd.f32 %v1834_v2, %v1830_v29 }
 0x523   : > { %v1827_v32 = vpop.xlane.xlu1 %1826 }
 0x524   : > { %4402 = vtanh.f32 %v1848_v30  ;;  %v1851_v33 = vmul.f32 0.5, %v1843_v31  ;;  %v1842_v61 = vadd.f32 %v1834_v2, %v1827_v32 }
 0x525   : > { %v1918_v17 = vpop.permute.xlu0 %1917 }
 0x526   : > { %4404 = vtanh.f32 %v1851_v33  ;;  %v1850_v62 = vmul.f32 0.5, %v1842_v61 }
 0x527   : > { %v4393_v7 = vpop.eup %4392  ;;  %v1925_v25 = vpop.permute.xlu1 %1924 }
 0x528   : > { %v1861_v35 = vadd.f32 1.0, %v4393_v7  ;;  %4406 = vtanh.f32 %v1850_v62 }
 0x529   : > { %v4395_v36 = vpop.eup %4394  ;;  %v1932_v33 = vpop.permute.xlu0 %1931 }
 0x52a   : > { %v1869_v38 = vmul.f32 0.5, %v1861_v35  ;;  %v1860_v9 = vadd.f32 1.0, %v4395_v36 }
 0x52b   : > { %v4397_v40 = vpop.eup %4396 }
 0x52c   : > { %v1868_v39 = vmul.f32 0.5, %v1860_v9  ;;  %v1863_v41 = vadd.f32 1.0, %v4397_v40  ;;  %v1942_v43 = vmul.f32 %v1890_v58, %v1869_v38  ;;  %v2357_v4 = vrot.slane %v1869_v38, %v5117_v22 }
 0x52d   : > { %v4399_v45 = vpop.eup %4398 }
 0x52e   : > { %v1871_v46 = vmul.f32 0.5, %v1863_v41  ;;  %v1862_v47 = vadd.f32 1.0, %v4399_v45  ;;  %1961 = vperm.xlu0 %4355, %v1942_v43   ;;  %v1941_v48 = vmul.f32 %v1883_v14, %v1868_v39  ;;  %v2353_v50 = vrot.slane %v1868_v39, %v5117_v22 }
 0x52f   : > { %v4401_v44 = vpop.eup %4400 }
 0x530   : > { %v1870_v51 = vmul.f32 0.5, %v1862_v47  ;;  %1958 = vperm.xlu1 %4356, %v1941_v48   ;;  %v1865_v34 = vadd.f32 1.0, %v4401_v44  ;;  %v1944_v5 = vmul.f32 %v1904_v57, %v1871_v46  ;;  %v2382_v58 = vsel %vm1276_vm9, %v2357_v4, %v2353_v50 }
 0x531   : > { %v4403_v52 = vpop.eup %4402  ;;  %v2365_v56 = vrot.slane %v1871_v46, %v5117_v22 }
 0x532   : > { %v2361_v2 = vrot.slane %v1870_v51, %v5117_v22  ;;  %v1864_v3 = vadd.f32 1.0, %v4403_v52  ;;  %v1873_v16 = vmul.f32 0.5, %v1865_v34  ;;  %v1943_v20 = vmul.f32 %v5260_v54, %v1870_v51 }
 0x533   : > { %v4405_v11 = vpop.eup %4404 }
 0x534   : > { %v2383_v55 = vsel %vm1278_vm10, %v2361_v2, %v2382_v58  ;;  %v1872_v15 = vmul.f32 0.5, %v1864_v3  ;;  %1967 = vperm.xlu1 %4356, %v1944_v5   ;;  %v1867_v18 = vadd.f32 1.0, %v4405_v11  ;;  %v2373_v29 = vrot.slane %v1873_v16, %v5117_v22 }
 0x535   : > { %v4407_v14 = vpop.eup %4406  ;;  %v2384_v21 = vsel %vm1280_vm12, %v2365_v56, %v2383_v55  ;;  %v1946_v30 = vmul.f32 %v1918_v17, %v1873_v16  ;;  %v2099_v56 = vld [vmem:[#allocation10 + $0x30] sm:$0xff]  ;;  %v2098_v16 = vld [vmem:[#allocation10 + $0x28] sm:$0xff] }
 0x536   : > { %v2369_v19 = vrot.slane %v1872_v15, %v5117_v22  ;;  %v1945_v59 = vmul.f32 %v5262_v60, %v1872_v15  ;;  %v1866_v57 = vadd.f32 1.0, %v4407_v14  ;;  %v1875_v24 = vmul.f32 0.5, %v1867_v18  ;;  %v2100_v15 = vld [vmem:[#allocation10 + $0x38] sm:$0xff]  ;;  %v2097_v18 = vld [vmem:[#allocation10 + $0x20] sm:$0xff] }
 0x538   : > { %v2385_v26 = vsel %vm1282_vm13, %v2369_v19, %v2384_v21  ;;  %1970 = vperm.xlu0 %4355, %v1945_v59   ;;  %1964 = vperm.xlu1 %4356, %v1943_v20   ;;  %v1874_v28 = vmul.f32 0.5, %v1866_v57  ;;  %v2381_v54 = vrot.slane %v1875_v24, %v5117_v22  ;;  %v1948_v7 = vmul.f32 %v1932_v33, %v1875_v24  ;;  %v2106_v59 = vld [vmem:[#allocation11 + $0x28] sm:$0xff]  ;;  %v2105_v57 = vld [vmem:[#allocation11 + $0x20] sm:$0xff]  ;;  %v2104_v24 = vld [vmem:[#allocation11 + $0x18] sm:$0xff] }
 0x539   : > { %v2386_v60 = vsel %vm1284_vm14, %v2373_v29, %v2385_v26  ;;  %v2102_v26 = vld [vmem:[#allocation11 + $0x8] sm:$0xff]  ;;  %v2092_v29 = vld [vmem:[%s5540_s11] sm:$0x3] }
 0x53a   : > { %v2377_v31 = vrot.slane %v1874_v28, %v5117_v22  ;;  %v1947_v32 = vmul.f32 %v1925_v25, %v1874_v28  ;;  %v2103_v25 = vld [vmem:[#allocation11 + $0x10] sm:$0xff]  ;;  %v2101_v28 = vld [vmem:[#allocation11] sm:$0xff] }
 0x53c   : > { %1976 = vperm.xlu0 %4355, %v1947_v32   ;;  %1973 = vperm.xlu1 %4356, %v1946_v30   ;;  %v2387_v61 = vsel %vm1286_vm15, %v2377_v31, %v2386_v60  ;;  %v2255_v30 = vrot.slane %v2092_v29, %v4954_v13 }
 0x53d   : > { %v2388_v62 = vsel %vm1288_vm4, %v2381_v54, %v2387_v61 }
 0x53e   : > { %4172 = vmatmul.mubr.msk.f32.vlgmr.msra.gmra.mxu0 %vm908_vm1, %v2388_v62  ;;  %v2479_v62 = vld [vmem:[#allocation2 + $0x58] sm:$0xff] }
 0x53f   : > { %4174 = vmatprep.subr.mxu0 %v2479_v62 }
 0x540   : > { %1979 = vperm.xlu1 %4356, %v1948_v7   ;;  %v2478_v7 = vld [vmem:[#allocation2 + $0x50] sm:$0xff]  ;;  %4175 = vmatpush3.msra.mxu0 %v2479_v62  ;;  %v3923_v62 = vld [vmem:[%s5532_s3 + $0x8] sm:$0x7] }
 0x541   : > { %4176 = vmatprep.subr.mxu0 %v2478_v7 }
 0x542   : > { %4177 = vmatpush3.msra.mxu0 %v2478_v7  ;;  %v2780_v7 = vrot.slane %v3923_v62, 2 }
 0x544   : > { %4241 = vpush %v2780_v7 }
 0x554   : > { %v5282_v35 = vpop.f32.mrf.mxu0 }
 0x556   : > { %v4153_v36 = vpop.f32.mrf.mxu0 }
 0x557   : > { %v2477_v36 = vld [vmem:[#allocation2 + $0x48] sm:$0xff] }
 0x558   : > { %4178 = vmatprep.subr.mxu0 %v2477_v36 }
 0x559   : > { %4179 = vmatpush3.msra.mxu0 %v2477_v36  ;;  %v2589_v36 = vrot.slane %v3923_v62, %v4954_v13 }
 0x575   : > { %s4242_s16 = spop %4241 }
 0x5a9   : > { %v1962_v9 = vpop.permute.xlu0 %1961 }
 0x5aa   : > { %v1988_v41 = vrot.slane %v1962_v9, %v5117_v22 }
 0x5ab   : > { %v1959_v38 = vpop.permute.xlu1 %1958 }
 0x5ac   : > { %v1984_v39 = vrot.slane %v1959_v38, %v5117_v22  ;;  %v2476_v38 = vld [vmem:[#allocation2 + $0x40] sm:$0xff] }
 0x5ad   : > { %4180 = vmatprep.subr.mxu0 %v2476_v38 }
 0x5ae   : > { %v2013_v47 = vsel %vm1276_vm9, %v1988_v41, %v1984_v39  ;;  %4181 = vmatpush3.msra.mxu0 %v2476_v38 }
 0x5af   : > { %v1968_v40 = vpop.permute.xlu1 %1967  ;;  %4225 = vmatprep.subr.mxu0 %v4705_v1 }
 0x5b0   : > { %v1996_v48 = vrot.slane %v1968_v40, %v5117_v22 }
 0x5b3   : > { %v1965_v43 = vpop.permute.xlu1 %1964  ;;  %v1971_v45 = vpop.permute.xlu0 %1970 }
 0x5b4   : > { %v1992_v46 = vrot.slane %v1965_v43, %v5117_v22  ;;  %v2000_v50 = vrot.slane %v1971_v45, %v5117_v22 }
 0x5b6   : > { %v2014_v44 = vsel %vm1278_vm10, %v1992_v46, %v2013_v47 }
 0x5b7   : > { %v2015_v51 = vsel %vm1280_vm12, %v1996_v48, %v2014_v44  ;;  %v1974_v52 = vpop.permute.xlu1 %1973  ;;  %v1977_v4 = vpop.permute.xlu0 %1976 }
 0x5b8   : > { %v2016_v34 = vsel %vm1282_vm13, %v2000_v50, %v2015_v51  ;;  %v2004_v2 = vrot.slane %v1974_v52, %v5117_v22  ;;  %v2008_v3 = vrot.slane %v1977_v4, %v5117_v22 }
 0x5ba   : > { %v2017_v5 = vsel %vm1284_vm14, %v2004_v2, %v2016_v34 }
 0x5bb   : > { %v1980_v11 = vpop.permute.xlu1 %1979  ;;  %v2018_v55 = vsel %vm1286_vm15, %v2008_v3, %v2017_v5 }
 0x5bc   : > { %v2012_v58 = vrot.slane %v1980_v11, %v5117_v22 }
 0x5be   : > { %v2019_v14 = vsel %vm1288_vm4, %v2012_v58, %v2018_v55 }
 0x5bf   : > { %4130 = vmatmul.mubr.msk.f32.vlgmr.msra.gmra.mxu1 %vm908_vm1, %v2019_v14 }
 0x5c0   : > { %4133 = vmatpush3.msra.mxu1 %v2100_v15  ;;  %4140 = vmatprep.mubr.msk.f32.mxu1 %vm4706_vm0, %v4705_v1 }
 0x5c1   : > { %4134 = vmatprep.subr.mxu1 %v4705_v1 }
 0x5c2   : > { %4135 = vmatpush3.msra.mxu1 %v2099_v56 }
 0x5c3   : > { %4136 = vmatprep.subr.mxu1 %v4705_v1 }
 0x5c4   : > { %4137 = vmatpush3.msra.mxu1 %v2098_v16 }
 0x5c5   : > { %4138 = vmatprep.subr.mxu1 %v4705_v1 }
 0x5c6   : > { %4139 = vmatpush3.msra.mxu1 %v2097_v18 }
 0x5c7   : > { %4154 = vmatprep.subr.mxu1 %v4705_v1 }
 0x5fe   : > { %v5305_v17 = vpop.f32.mrf.mxu0 }
 0x600   : > { %v4173_v19 = vpop.f32.mrf.mxu0 }
 0x67f   : > { %v2088_v20 = vpop.f32.mrf.mxu1 }
 0x680   : > { %4141 = vmatmul.mubr.msk.f32.vlgmr.msra.gmra.mxu1 %vm671_vm2, %v2088_v20 }
 0x681   : > { %v4131_v21 = vpop.f32.mrf.mxu1  ;;  %4155 = vmatpush3.msra.mxu1 %v2106_v59  ;;  %4166 = vmatprep.mubr.msk.f32.mxu1 %vm4706_vm0, %v4705_v1 }
 0x682   : > { %4156 = vmatprep.subr.mxu1 %v4705_v1 }
 0x683   : > { %4157 = vmatpush3.msra.mxu1 %v2105_v57 }
 0x684   : > { %4158 = vmatprep.subr.mxu1 %v4705_v1 }
 0x685   : > { %4159 = vmatpush3.msra.mxu1 %v2104_v24 }
 0x686   : > { %4160 = vmatprep.subr.mxu1 %v4705_v1 }
 0x687   : > { %4161 = vmatpush3.msra.mxu1 %v2103_v25 }
 0x688   : > { %4162 = vmatprep.subr.mxu1 %v4705_v1 }
 0x689   : > { %4163 = vmatpush3.msra.mxu1 %v2102_v26 }
 0x68a   : > { %4164 = vmatprep.subr.mxu1 %v4705_v1 }
 0x68b   : > { %4165 = vmatpush3.msra.mxu1 %v2101_v28 }
 0x68c   : > { %4194 = vmatprep.subr.mxu1 %v4705_v1 }
 0x740   : > { %v2176_v31 = vpop.f32.mrf.mxu1 }
 0x741   : > { %v2249_v32 = vadd.f32 %v5282_v35, %v2176_v31  ;;  %v2263_v35 = vrot.slane %v2092_v29, %v5018_v63 }
 0x742   : > { %v4142_v60 = vpop.f32.mrf.mxu1 }
 0x743   : > { %v2256_v54 = vadd.f32 %v2255_v30, %v2249_v32 }
 0x745   : > { %vm2257_vm3 = vcmp.gt.f32.partialorder %v2256_v54, 0.0  ;;  %v2258_v33 = vmul.f32 0.01, %v2256_v54 }
 0x747   : > { %v2259_v61 = vsel %vm2257_vm3, %v2256_v54, %v2258_v33 }
 0x748   : > { %4167 = vmatmul.mubr.msk.f32.vlgmr.msra.gmra.mxu1 %vm2264_vm11, %v2259_v61 }
 0x749   : > { %4196 = vmatprep.mubr.msk.f32.mxu1 %vm4706_vm0, %v4705_v1 }
 0x808   : > { %v2334_v9 = vpop.f32.mrf.mxu1 }
 0x809   : > { %v2335_v40 = vadd.f32 %v2334_v9, %v2263_v35 }
 0x80a   : > { %v4168_v39 = vpop.f32.mrf.mxu1 }
 0x80b   : > { %v2338_v41 = vmul.f32 0.5, %v2335_v40  ;;  %v2746_v40 = vrot.slane %v3923_v62, %v5018_v63 }
 0x80d   : > { %4408 = vtanh.f32 %v2338_v41 }
 0x81a   : > { %v4409_v43 = vpop.eup %4408 }
 0x81b   : > { %v2340_v45 = vadd.f32 1.0, %v4409_v43 }
 0x81d   : > { %v2341_v46 = vmul.f32 0.5, %v2340_v45 }
 0x81f   : > { %v2488_v47 = vrot.slane %v2341_v46, %v4941_v6  ;;  %v2481_v48 = vcombine.high %v2341_v46, %v2341_v46 }
 0x821   : > { %v2496_v44 = vcombine.high %v2488_v47, %v2488_v47  ;;  %v2504_v50 = vrot.slane %v2488_v47, %v4941_v6  ;;  %v2495_v51 = vrot.slane %v2481_v48, %v4941_v6 }
 0x823   : > { %v2533_v52 = vrot.slane %v2504_v50, %v4954_v13  ;;  %v2518_v4 = vrot.slane %v2496_v44, %v4941_v6  ;;  %v2526_v34 = vcombine.high %v2504_v50, %v2504_v50  ;;  %v2511_v2 = vrot.slane %v2495_v51, %v4941_v6 }
 0x824   : > { %v2497_v3 = vcombine.high %v2495_v51, %v2495_v51 }
 0x825   : > { %v2570_v5 = vsub.f32 %v2533_v52, %v2341_v46  ;;  %v2537_v11 = vrot.slane %v2518_v4, %v4954_v13  ;;  %v2541_v58 = vrot.slane %v2526_v34, %v4954_v13  ;;  %v2528_v55 = vcombine.high %v2518_v4, %v2518_v4 }
 0x826   : > { %v2549_v15 = vrot.slane %v2511_v2, %v4954_v13  ;;  %v2525_v14 = vrot.slane %v2497_v3, %v4941_v6  ;;  %v2527_v56 = vcombine.high %v2511_v2, %v2511_v2 }
 0x827   : > { %v2578_v16 = vmul.f32 %v2570_v5, %v2570_v5  ;;  %v2571_v18 = vsub.f32 %v2537_v11, %v2341_v46  ;;  %v2572_v19 = vsub.f32 %v2541_v58, %v2341_v46  ;;  %v2545_v59 = vrot.slane %v2528_v55, %v4954_v13 }
 0x828   : > { %v2553_v20 = vrot.slane %v2525_v14, %v4954_v13  ;;  %v2529_v25 = vcombine.high %v2525_v14, %v2525_v14  ;;  %v2574_v26 = vsub.f32 %v2549_v15, %v2341_v46  ;;  %v2557_v28 = vrot.slane %v2527_v56, %v4954_v13 }
 0x829   : > { %4182 = vmatprep.mubr.msk.f32.mxu0 %vm671_vm2, %v2578_v16  ;;  %v2579_v57 = vmul.f32 %v2571_v18, %v2571_v18  ;;  %v2580_v21 = vmul.f32 %v2572_v19, %v2572_v19  ;;  %v2573_v24 = vsub.f32 %v2545_v59, %v2341_v46 }
 0x82a   : > { %v2575_v30 = vsub.f32 %v2553_v20, %v2341_v46  ;;  %v2561_v31 = vrot.slane %v2529_v25, %v4954_v13  ;;  %v2582_v32 = vmul.f32 %v2574_v26, %v2574_v26  ;;  %v2576_v60 = vsub.f32 %v2557_v28, %v2341_v46 }
 0x82b   : > { %4183 = vmatmul.mubr.msk.f32.vlgmr.msra.gmra.mxu0 %vm671_vm2, %v2579_v57  ;;  %v2581_v29 = vmul.f32 %v2573_v24, %v2573_v24 }
 0x82c   : > { %4185 = vmatprep.mubr.msk.f32.mxu0 %vm671_vm2, %v2580_v21  ;;  %4226 = vmatpush3.msra.mxu0 %v5255_v8  ;;  %v2583_v54 = vmul.f32 %v2575_v30, %v2575_v30  ;;  %v2577_v33 = vsub.f32 %v2561_v31, %v2341_v46  ;;  %v2584_v61 = vmul.f32 %v2576_v60, %v2576_v60 }
 0x82d   : > { %4230 = vmatprep.subr.mxu0 %v4705_v1 }
 0x82e   : > { %v2585_v8 = vmul.f32 %v2577_v33, %v2577_v33 }
 0x82f   : > { %4186 = vmatmul.mubr.msk.f32.gmra.mxu0 %vm671_vm2, %v2581_v29 }
 0x830   : > { %4188 = vmatprep.mubr.msk.f32.mxu0 %vm671_vm2, %v2582_v32 }
 0x833   : > { %4189 = vmatmul.mubr.msk.f32.gmra.mxu0 %vm671_vm2, %v2583_v54 }
 0x834   : > { %4191 = vmatprep.mubr.msk.f32.mxu0 %vm671_vm2, %v2584_v61 }
 0x837   : > { %4192 = vmatmul.mubr.msk.f32.gmra.mxu0 %vm671_vm2, %v2585_v8 }
 0x838   : > { %4227 = vmatprep.mubr.msk.f32.mxu0 %vm4706_vm0, %v4705_v1 }
 0x8eb   : > { %v4184_v38 = vpop.f32.mrf.mxu0 }
 0x8ec   : > { %v2686_v35 = vadd.f32 %v4184_v38, %v2589_v36  ;;  %v3933_v38 = vld [vmem:[%s5535_s6 + $0x18] sm:$0xff] }
 0x8ed   : > { %v2680_v9 = vpop.f32.mrf.mxu0  ;;  %4195 = vmatpush3.msra.mxu1 %v3933_v38 }
 0x8ee   : > { %vm2720_vm7 = vcmp.gt.f32.partialorder %v2686_v35, 0.0  ;;  %v2728_v39 = vmul.f32 0.01, %v2686_v35  ;;  %v2681_v41 = vadd.f32 %v2680_v9, %v2589_v36  ;;  %4199 = vmatprep.subr.mxu1 %v4705_v1 }
 0x8ef   : > { %v4187_v43 = vpop.f32.mrf.mxu0 }
 0x8f0   : > { %vm2719_vm2 = vcmp.gt.f32.partialorder %v2681_v41, 0.0  ;;  %v2727_v45 = vmul.f32 0.01, %v2681_v41  ;;  %v2696_v46 = vadd.f32 %v4187_v43, %v2589_v36  ;;  %v2736_v47 = vsel %vm2720_vm7, %v2686_v35, %v2728_v39 }
 0x8f1   : > { %v2690_v48 = vpop.f32.mrf.mxu0  ;;  %v2748_v44 = vmul.f32 %v2746_v40, %v2736_v47  ;;  %v2782_v35 = vstv %s4242_s16 }
 0x8f2   : > { %vm2722_vm8 = vcmp.gt.f32.partialorder %v2696_v46, 0.0  ;;  %v2730_v50 = vmul.f32 0.01, %v2696_v46  ;;  %v2691_v51 = vadd.f32 %v2690_v48, %v2589_v36  ;;  %v2735_v52 = vsel %vm2719_vm2, %v2681_v41, %v2727_v45 }
 0x8f3   : > { %v4190_v4 = vpop.f32.mrf.mxu0  ;;  %v2758_v34 = vsel %vm837_vm5, %v2748_v44, 0.0  ;;  %v2747_v2 = vmul.f32 %v2746_v40, %v2735_v52 }
 0x8f4   : > { %vm2721_vm3 = vcmp.gt.f32.partialorder %v2691_v51, 0.0  ;;  %v2729_v3 = vmul.f32 0.01, %v2691_v51  ;;  %v2706_v5 = vadd.f32 %v4190_v4, %v2589_v36  ;;  %2759 = vadd.xlane.f32.xlu1 %v2758_v34  ;;  %v2738_v11 = vsel %vm2722_vm8, %v2696_v46, %v2730_v50 }
 0x8f5   : > { %v2700_v58 = vpop.f32.mrf.mxu0  ;;  %v2755_v55 = vsel %vm837_vm5, %v2747_v2, 0.0  ;;  %v2750_v15 = vmul.f32 %v2746_v40, %v2738_v11 }
 0x8f6   : > { %vm2724_vm11 = vcmp.gt.f32.partialorder %v2706_v5, 0.0  ;;  %v2732_v14 = vmul.f32 0.01, %v2706_v5  ;;  %v2701_v56 = vadd.f32 %v2700_v58, %v2589_v36  ;;  %2756 = vadd.xlane.f32.xlu0 %v2755_v55  ;;  %v2737_v16 = vsel %vm2721_vm3, %v2691_v51, %v2729_v3 }
 0x8f7   : > { %v4193_v18 = vpop.f32.mrf.mxu0  ;;  %v2764_v21 = vsel %vm837_vm5, %v2750_v15, 0.0  ;;  %v2749_v25 = vmul.f32 %v2746_v40, %v2737_v16 }
 0x8f8   : > { %vm2723_vm7 = vcmp.gt.f32.partialorder %v2701_v56, 0.0  ;;  %v2731_v19 = vmul.f32 0.01, %v2701_v56  ;;  %v2716_v59 = vadd.f32 %v4193_v18, %v2589_v36  ;;  %v2740_v20 = vsel %vm2724_vm11, %v2706_v5, %v2732_v14 }
 0x8f9   : > { %v2710_v57 = vpop.f32.mrf.mxu0  ;;  %v2752_v24 = vmul.f32 %v2746_v40, %v2740_v20  ;;  %v2761_v60 = vsel %vm837_vm5, %v2749_v25, 0.0  ;;  %vm5582_vm11 = vcmask 97280  }
 0x8fa   : > { %vm2726_vm2 = vcmp.gt.f32.partialorder %v2716_v59, 0.0  ;;  %v2734_v26 = vmul.f32 0.01, %v2716_v59  ;;  %v2711_v28 = vadd.f32 %v2710_v57, %v2589_v36  ;;  %2765 = vadd.xlane.f32.xlu0 %v2764_v21  ;;  %v2739_v29 = vsel %vm2723_vm7, %v2701_v56, %v2731_v19 }
 0x8fb   : > { %v2770_v30 = vsel %vm837_vm5, %v2752_v24, 0.0  ;;  %v2751_v33 = vmul.f32 %v2746_v40, %v2739_v29 }
 0x8fc   : > { %vm2725_vm8 = vcmp.gt.f32.partialorder %v2711_v28, 0.0  ;;  %v2733_v31 = vmul.f32 0.01, %v2711_v28  ;;  %2771 = vadd.xlane.f32.xlu1 %v2770_v30  ;;  %v2742_v32 = vsel %vm2726_vm2, %v2716_v59, %v2734_v26 }
 0x8fd   : > { %v2754_v54 = vmul.f32 %v2746_v40, %v2742_v32  ;;  %v2767_v62 = vsel %vm837_vm5, %v2751_v33, 0.0 }
 0x8fe   : > { %2762 = vadd.xlane.f32.xlu0 %v2761_v60  ;;  %v2741_v61 = vsel %vm2725_vm8, %v2711_v28, %v2733_v31 }
 0x8ff   : > { %v2776_v8 = vsel %vm837_vm5, %v2754_v54, 0.0  ;;  %v2753_v7 = vmul.f32 %v2746_v40, %v2741_v61 }
 0x900   : > { %2777 = vadd.xlane.f32.xlu1 %v2776_v8 }
 0x901   : > { %v2773_v36 = vsel %vm837_vm5, %v2753_v7, 0.0  ;;  %vm5581_vm5 = vcmask 1043456  }
 0x902   : > { %2768 = vadd.xlane.f32.xlu0 %v2767_v62 }
 0x906   : > { %2774 = vadd.xlane.f32.xlu0 %v2773_v36 }
 0x97d   : > { %v2760_v9 = vpop.xlane.xlu1 %2759 }
 0x97e   : > { %v2785_v39 = vadd.f32 %v2782_v35, %v2760_v9 }
 0x97f   : > { %v2757_v41 = vpop.xlane.xlu0 %2756 }
 0x980   : > { %v2793_v43 = vmul.f32 0.5, %v2785_v39  ;;  %v2784_v45 = vadd.f32 %v2782_v35, %v2757_v41 }
 0x982   : > { %v2792_v46 = vmul.f32 0.5, %v2784_v45  ;;  %4410 = vtanh.f32 %v2793_v43 }
 0x983   : > { %v2766_v40 = vpop.xlane.xlu0 %2765 }
 0x984   : > { %4412 = vtanh.f32 %v2792_v46  ;;  %v2787_v47 = vadd.f32 %v2782_v35, %v2766_v40 }
 0x985   : > { %v2772_v48 = vpop.xlane.xlu1 %2771 }
 0x986   : > { %v2795_v44 = vmul.f32 0.5, %v2787_v47  ;;  %v2789_v50 = vadd.f32 %v2782_v35, %v2772_v48 }
 0x987   : > { %v2763_v51 = vpop.xlane.xlu0 %2762 }
 0x988   : > { %4414 = vtanh.f32 %v2795_v44  ;;  %v2797_v52 = vmul.f32 0.5, %v2789_v50  ;;  %v2786_v4 = vadd.f32 %v2782_v35, %v2763_v51 }
 0x989   : > { %v2778_v34 = vpop.xlane.xlu1 %2777 }
 0x98a   : > { %v2794_v2 = vmul.f32 0.5, %v2786_v4  ;;  %v2791_v3 = vadd.f32 %v2782_v35, %v2778_v34  ;;  %4416 = vtanh.f32 %v2797_v52 }
 0x98b   : > { %v2769_v5 = vpop.xlane.xlu0 %2768 }
 0x98c   : > { %4418 = vtanh.f32 %v2794_v2  ;;  %v2799_v11 = vmul.f32 0.5, %v2791_v3  ;;  %v2788_v58 = vadd.f32 %v2782_v35, %v2769_v5  ;;  %v3934_v3 = vld [vmem:[%s5536_s7 + $0x10] sm:$0xff] }
 0x98e   : > { %4420 = vtanh.f32 %v2799_v11  ;;  %v2796_v55 = vmul.f32 0.5, %v2788_v58  ;;  %v2833_v11 = vld [vmem:[#allocation8 + $0x2] sm:$0x3] }
 0x98f   : > { %v2775_v15 = vpop.xlane.xlu0 %2774  ;;  %v4411_v14 = vpop.eup %4410 }
 0x990   : > { %4422 = vtanh.f32 %v2796_v55  ;;  %v2790_v56 = vadd.f32 %v2782_v35, %v2775_v15  ;;  %v2809_v59 = vadd.f32 1.0, %v4411_v14 }
 0x991   : > { %v4413_v16 = vpop.eup %4412 }
 0x992   : > { %v2808_v18 = vadd.f32 1.0, %v4413_v16  ;;  %v2798_v19 = vmul.f32 0.5, %v2790_v56  ;;  %v2817_v21 = vmul.f32 0.5, %v2809_v59  ;;  %v3042_v59 = vrot.slane %v2833_v11, %v5018_v63 }
 0x994   : > { %4424 = vtanh.f32 %v2798_v19  ;;  %v2816_v57 = vmul.f32 0.5, %v2808_v18  ;;  %v2825_v31 = vmul.f32 %v2817_v21, %v5119_v23  ;;  %v3126_v19 = vld [vmem:[#allocation5 + $0x8] sm:$0xff] }
 0x995   : > { %v4415_v20 = vpop.eup %4414 }
 0x996   : > { %v2811_v24 = vadd.f32 1.0, %v4415_v20  ;;  %v2824_v28 = vmul.f32 %v2816_v57, %v5121_v0  ;;  %v2855_v36 = vrot.slane %v2825_v31, %v5117_v22 }
 0x997   : > { %v4417_v25 = vpop.eup %4416 }
 0x998   : > { %v2819_v32 = vmul.f32 0.5, %v2811_v24  ;;  %v2813_v60 = vadd.f32 1.0, %v4417_v25  ;;  %v2851_v61 = vrot.slane %v2824_v28, %v5117_v22 }
 0x999   : > { %v4419_v26 = vpop.eup %4418 }
 0x99a   : > { %v2810_v29 = vadd.f32 1.0, %v4419_v26  ;;  %v2827_v38 = vmul.f32 %v2819_v32, %v5129_v37  ;;  %v2821_v35 = vmul.f32 0.5, %v2813_v60  ;;  %v2880_v23 = vsel %vm1276_vm9, %v2855_v36, %v2851_v61 }
 0x99b   : > { %v4421_v30 = vpop.eup %4420 }
 0x99c   : > { %v2818_v54 = vmul.f32 0.5, %v2810_v29  ;;  %v2815_v8 = vadd.f32 1.0, %v4421_v30  ;;  %v2829_v40 = vmul.f32 %v2821_v35, %v5141_v53 }
 0x99d   : > { %v4423_v33 = vpop.eup %4422 }
 0x99e   : > { %v2826_v62 = vmul.f32 %v2818_v54, %v5123_v27  ;;  %v2812_v7 = vadd.f32 1.0, %v4423_v33  ;;  %v2823_v41 = vmul.f32 0.5, %v2815_v8  ;;  %v2863_v27 = vrot.slane %v2827_v38, %v5117_v22 }
 0x99f   : > { %v2871_v52 = vrot.slane %v2829_v40, %v5117_v22 }
 0x9a0   : > { %v2859_v0 = vrot.slane %v2826_v62, %v5117_v22  ;;  %v2820_v9 = vmul.f32 0.5, %v2812_v7  ;;  %v2831_v48 = vmul.f32 %v2823_v41, %v5152_v10  ;;  %v3932_v10 = vld [vmem:[%s5535_s6 + $0x10] sm:$0xff] }
 0x9a1   : > { %v4425_v39 = vpop.eup %4424 }
 0x9a2   : > { %v2881_v43 = vsel %vm1278_vm10, %v2859_v0, %v2880_v23  ;;  %v2828_v45 = vmul.f32 %v2820_v9, %v5133_v42  ;;  %v2814_v46 = vadd.f32 1.0, %v4425_v39  ;;  %v2879_v4 = vrot.slane %v2831_v48, %v5117_v22 }
 0x9a3   : > { %v2882_v44 = vsel %vm1280_vm12, %v2863_v27, %v2881_v43 }
 0x9a4   : > { %v2867_v47 = vrot.slane %v2828_v45, %v5117_v22  ;;  %v2822_v37 = vmul.f32 0.5, %v2814_v46 }
 0x9a6   : > { %v2830_v50 = vmul.f32 %v2822_v37, %v5143_v12  ;;  %v2883_v51 = vsel %vm1282_vm13, %v2867_v47, %v2882_v44  ;;  %v3935_v12 = vld [vmem:[%s5536_s7 + $0x18] sm:$0xf] }
 0x9a7   : > { %v2884_v34 = vsel %vm1284_vm14, %v2871_v52, %v2883_v51 }
 0x9a8   : > { %v2875_v42 = vrot.slane %v2830_v50, %v5117_v22 }
 0x9aa   : > { %v2885_v53 = vsel %vm1286_vm15, %v2875_v42, %v2884_v34 }
 0x9ab   : > { %v5395_v2 = vsel %vm1288_vm4, %v2879_v4, %v2885_v53 }
 0x9ac   : > { %4197 = vmatmul.mubr.msk.f32.vlgmr.msra.gmra.mxu1 %vm908_vm1, %v5395_v2 }
 0x9ad   : > { %4200 = vmatpush3.msra.mxu1 %v3932_v10  ;;  %4201 = vmatprep.mubr.msk.f32.mxu1 %vm4706_vm0, %v4705_v1 }
 0x9ae   : > { %4204 = vmatprep.subr.mxu1 %v4705_v1 }
 0x9b0   : > { %4202 = vmatmul.mubr.msk.f32.vlgmr.msra.gmra.mxu1 %vm908_vm1, %v5195_v49  ;;  %v3034_v49 = vrot.slane %v2833_v11, %v4954_v13 }
 0x9b1   : > { %4208 = vmatprep.mubr.msk.f32.mxu1 %vm4706_vm0, %v4705_v1  ;;  %4205 = vmatpush3.msk.msra.mxu1 %vm5581_vm5, %v3935_v12  ;;  %v3124_v12 = vld [vmem:[#allocation7 + $0x4] sm:$0x7] }
 0x9b2   : > { %4206 = vmatprep.subr.mxu1 %v4705_v1 }
 0x9b3   : > { %4207 = vmatpush3.msra.mxu1 %v3934_v3  ;;  %v3427_v3 = vrot.slane %v3124_v12, 2 }
 0x9b4   : > { %4211 = vmatprep.subr.mxu1 %v3126_v19 }
 0x9b5   : > { %4243 = vpush %v3427_v3 }
 0x9e6   : > { %s4244_s14 = spop %4243 }
 0xa6c   : > { %v2955_v5 = vpop.f32.mrf.mxu1 }
 0xa6e   : > { %v4198_v58 = vpop.f32.mrf.mxu1 }
 0xa70   : > { %v3027_v55 = vpop.f32.mrf.mxu1 }
 0xa71   : > { %v3028_v15 = vadd.f32 %v3027_v55, %v2955_v5  ;;  %v3236_v5 = vrot.slane %v3124_v12, %v4954_v13  ;;  %v3393_v55 = vrot.slane %v3124_v12, %v5018_v63 }
 0xa72   : > { %v4203_v14 = vpop.f32.mrf.mxu1 }
 0xa73   : > { %v3035_v56 = vadd.f32 %v3034_v49, %v3028_v15 }
 0xa75   : > { %vm3036_vm3 = vcmp.gt.f32.partialorder %v3035_v56, 0.0  ;;  %v3037_v16 = vmul.f32 0.01, %v3035_v56 }
 0xa77   : > { %v3038_v18 = vsel %vm3036_vm3, %v3035_v56, %v3037_v16 }
 0xa78   : > { %4209 = vmatmul.mubr.msk.f32.vlgmr.msra.gmra.mxu1 %vm5582_vm11, %v3038_v18 }
 0xa79   : > { %4212 = vmatpush3.msra.mxu1 %v3126_v19 }
 0xb38   : > { %v3115_v20 = vpop.f32.mrf.mxu1 }
 0xb39   : > { %v3116_v57 = vadd.f32 %v3115_v20, %v3042_v59 }
 0xb3a   : > { %v4210_v21 = vpop.f32.mrf.mxu1 }
 0xb3b   : > { %v3119_v24 = vmul.f32 0.5, %v3116_v57 }
 0xb3d   : > { %4426 = vtanh.f32 %v3119_v24 }
 0xb4a   : > { %v4427_v25 = vpop.eup %4426 }
 0xb4b   : > { %v3121_v26 = vadd.f32 1.0, %v4427_v25 }
 0xb4d   : > { %v3122_v28 = vmul.f32 0.5, %v3121_v26 }
 0xb4f   : > { %v3135_v29 = vrot.slane %v3122_v28, %v4941_v6  ;;  %v3128_v30 = vcombine.high %v3122_v28, %v3122_v28 }
 0xb51   : > { %v3143_v31 = vcombine.high %v3135_v29, %v3135_v29  ;;  %v3151_v32 = vrot.slane %v3135_v29, %v4941_v6  ;;  %v3142_v60 = vrot.slane %v3128_v30, %v4941_v6 }
 0xb53   : > { %v3180_v54 = vrot.slane %v3151_v32, %v4954_v13  ;;  %v3165_v33 = vrot.slane %v3143_v31, %v4941_v6  ;;  %v3173_v61 = vcombine.high %v3151_v32, %v3151_v32  ;;  %v3158_v8 = vrot.slane %v3142_v60, %v4941_v6 }
 0xb54   : > { %v3144_v62 = vcombine.high %v3142_v60, %v3142_v60 }
 0xb55   : > { %v3217_v7 = vsub.f32 %v3180_v54, %v3122_v28  ;;  %v3184_v36 = vrot.slane %v3165_v33, %v4954_v13  ;;  %v3188_v38 = vrot.slane %v3173_v61, %v4954_v13  ;;  %v3175_v35 = vcombine.high %v3165_v33, %v3165_v33 }
 0xb56   : > { %v3196_v0 = vrot.slane %v3158_v8, %v4954_v13  ;;  %v3172_v9 = vrot.slane %v3144_v62, %v4941_v6  ;;  %v3174_v39 = vcombine.high %v3158_v8, %v3158_v8 }
 0xb57   : > { %v3225_v23 = vmul.f32 %v3217_v7, %v3217_v7  ;;  %v3218_v41 = vsub.f32 %v3184_v36, %v3122_v28  ;;  %v3219_v43 = vsub.f32 %v3188_v38, %v3122_v28  ;;  %v3192_v45 = vrot.slane %v3175_v35, %v4954_v13 }
 0xb58   : > { %v3200_v46 = vrot.slane %v3172_v9, %v4954_v13  ;;  %v3176_v37 = vcombine.high %v3172_v9, %v3172_v9  ;;  %v3221_v48 = vsub.f32 %v3196_v0, %v3122_v28  ;;  %v3204_v44 = vrot.slane %v3174_v39, %v4954_v13 }
 0xb59   : > { %4213 = vmatprep.mubr.msk.f32.mxu1 %vm908_vm1, %v3225_v23  ;;  %v3226_v27 = vmul.f32 %v3218_v41, %v3218_v41  ;;  %v3227_v40 = vmul.f32 %v3219_v43, %v3219_v43  ;;  %v3220_v47 = vsub.f32 %v3192_v45, %v3122_v28 }
 0xb5a   : > { %v3222_v50 = vsub.f32 %v3200_v46, %v3122_v28  ;;  %v3208_v51 = vrot.slane %v3176_v37, %v4954_v13  ;;  %v3229_v52 = vmul.f32 %v3221_v48, %v3221_v48  ;;  %v3223_v42 = vsub.f32 %v3204_v44, %v3122_v28 }
 0xb5b   : > { %4214 = vmatmul.mubr.msk.f32.vlgmr.msra.gmra.mxu1 %vm908_vm1, %v3226_v27  ;;  %v3228_v6 = vmul.f32 %v3220_v47, %v3220_v47 }
 0xb5c   : > { %4216 = vmatprep.mubr.msk.f32.mxu1 %vm908_vm1, %v3227_v40  ;;  %v3230_v4 = vmul.f32 %v3222_v50, %v3222_v50  ;;  %v3224_v34 = vsub.f32 %v3208_v51, %v3122_v28  ;;  %v3231_v53 = vmul.f32 %v3223_v42, %v3223_v42  ;;  %v2461_v50 = vsel %vm908_vm1, %v5305_v17, -inf }
 0xb5d   : > { %v3429_v51 = vstv %s4244_s14  ;;  %s4621_s14 = scalar_lea.vmem %s4620_s17, 256 }
 0xb5e   : > { %v3232_v10 = vmul.f32 %v3224_v34, %v3224_v34 }
 0xb5f   : > { %4217 = vmatmul.mubr.msk.f32.gmra.mxu1 %vm908_vm1, %v3228_v6 }
 0xb60   : > { %4219 = vmatprep.mubr.msk.f32.mxu1 %vm908_vm1, %v3229_v52 }
 0xb63   : > { %4220 = vmatmul.mubr.msk.f32.gmra.mxu1 %vm908_vm1, %v3230_v4 }
 0xb64   : > { %4222 = vmatprep.mubr.msk.f32.mxu1 %vm908_vm1, %v3231_v53 }
 0xb67   : > { %4223 = vmatmul.mubr.msk.f32.gmra.mxu1 %vm908_vm1, %v3232_v10 }
 0xc1b   : > { %v4215_v11 = vpop.f32.mrf.mxu1 }
 0xc1c   : > { %v3333_v58 = vadd.f32 %v4215_v11, %v3236_v5 }
 0xc1d   : > { %v3327_v49 = vpop.f32.mrf.mxu1 }
 0xc1e   : > { %vm3367_vm7 = vcmp.gt.f32.partialorder %v3333_v58, 0.0  ;;  %v3375_v15 = vmul.f32 0.01, %v3333_v58  ;;  %v3328_v14 = vadd.f32 %v3327_v49, %v3236_v5 }
 0xc1f   : > { %v4218_v56 = vpop.f32.mrf.mxu1 }
 0xc20   : > { %vm3366_vm2 = vcmp.gt.f32.partialorder %v3328_v14, 0.0  ;;  %v3374_v16 = vmul.f32 0.01, %v3328_v14  ;;  %v3343_v18 = vadd.f32 %v4218_v56, %v3236_v5  ;;  %v3383_v19 = vsel %vm3367_vm7, %v3333_v58, %v3375_v15 }
 0xc21   : > { %v3337_v59 = vpop.f32.mrf.mxu1  ;;  %v3395_v20 = vmul.f32 %v3393_v55, %v3383_v19 }
 0xc22   : > { %vm3369_vm8 = vcmp.gt.f32.partialorder %v3343_v18, 0.0  ;;  %v3377_v57 = vmul.f32 0.01, %v3343_v18  ;;  %v3338_v21 = vadd.f32 %v3337_v59, %v3236_v5  ;;  %v3382_v24 = vsel %vm3366_vm2, %v3328_v14, %v3374_v16 }
 0xc23   : > { %v4221_v13 = vpop.f32.mrf.mxu1  ;;  %v3405_v25 = vsel %vm1806_vm6, %v3395_v20, 0.0  ;;  %v3394_v26 = vmul.f32 %v3393_v55, %v3382_v24 }
 0xc24   : > { %vm3368_vm5 = vcmp.gt.f32.partialorder %v3338_v21, 0.0  ;;  %v3376_v63 = vmul.f32 0.01, %v3338_v21  ;;  %v3353_v28 = vadd.f32 %v4221_v13, %v3236_v5  ;;  %3406 = vadd.xlane.f32.xlu1 %v3405_v25  ;;  %v3385_v29 = vsel %vm3369_vm8, %v3343_v18, %v3377_v57 }
 0xc25   : > { %v3347_v30 = vpop.f32.mrf.mxu1  ;;  %v3402_v31 = vsel %vm1806_vm6, %v3394_v26, 0.0  ;;  %v3397_v32 = vmul.f32 %v3393_v55, %v3385_v29 }
 0xc26   : > { %vm3371_vm3 = vcmp.gt.f32.partialorder %v3353_v28, 0.0  ;;  %v3379_v60 = vmul.f32 0.01, %v3353_v28  ;;  %v3348_v54 = vadd.f32 %v3347_v30, %v3236_v5  ;;  %3403 = vadd.xlane.f32.xlu0 %v3402_v31  ;;  %v3384_v33 = vsel %vm3368_vm5, %v3338_v21, %v3376_v63 }
 0xc27   : > { %v4224_v61 = vpop.f32.mrf.mxu1  ;;  %v3411_v8 = vsel %vm1806_vm6, %v3397_v32, 0.0  ;;  %v3396_v62 = vmul.f32 %v3393_v55, %v3384_v33 }
 0xc28   : > { %vm3370_vm11 = vcmp.gt.f32.partialorder %v3348_v54, 0.0  ;;  %v3378_v7 = vmul.f32 0.01, %v3348_v54  ;;  %v3363_v36 = vadd.f32 %v4224_v61, %v3236_v5  ;;  %3412 = vadd.xlane.f32.xlu1 %v3411_v8  ;;  %v3387_v38 = vsel %vm3371_vm3, %v3353_v28, %v3379_v60 }
 0xc29   : > { %v3357_v35 = vpop.f32.mrf.mxu1  ;;  %v3408_v0 = vsel %vm1806_vm6, %v3396_v62, 0.0  ;;  %v3399_v9 = vmul.f32 %v3393_v55, %v3387_v38 }
 0xc2a   : > { %vm3373_vm7 = vcmp.gt.f32.partialorder %v3363_v36, 0.0  ;;  %v3381_v39 = vmul.f32 0.01, %v3363_v36  ;;  %v3358_v23 = vadd.f32 %v3357_v35, %v3236_v5  ;;  %3409 = vadd.xlane.f32.xlu0 %v3408_v0  ;;  %v3386_v41 = vsel %vm3370_vm11, %v3348_v54, %v3378_v7 }
 0xc2b   : > { %v3417_v43 = vsel %vm1806_vm6, %v3399_v9, 0.0  ;;  %v3398_v45 = vmul.f32 %v3393_v55, %v3386_v41 }
 0xc2c   : > { %vm3372_vm2 = vcmp.gt.f32.partialorder %v3358_v23, 0.0  ;;  %v3380_v46 = vmul.f32 0.01, %v3358_v23  ;;  %3418 = vadd.xlane.f32.xlu1 %v3417_v43  ;;  %v3389_v27 = vsel %vm3373_vm7, %v3363_v36, %v3381_v39 }
 0xc2d   : > { %v3414_v40 = vsel %vm1806_vm6, %v3398_v45, 0.0  ;;  %v3401_v47 = vmul.f32 %v3393_v55, %v3389_v27 }
 0xc2e   : > { %3415 = vadd.xlane.f32.xlu0 %v3414_v40  ;;  %v3388_v37 = vsel %vm3372_vm2, %v3358_v23, %v3380_v46 }
 0xc2f   : > { %v3423_v48 = vsel %vm1806_vm6, %v3401_v47, 0.0  ;;  %v3400_v44 = vmul.f32 %v3393_v55, %v3388_v37 }
 0xc30   : > { %3424 = vadd.xlane.f32.xlu1 %v3423_v48 }
 0xc31   : > { %v3420_v6 = vsel %vm1806_vm6, %v3400_v44, 0.0 }
 0xc32   : > { %3421 = vadd.xlane.f32.xlu0 %v3420_v6 }
 0xc34   : > { %2462 = vmax.xlane.f32.xlu1 %v2461_v50 }
 0xcad   : > { %v3407_v52 = vpop.xlane.xlu1 %3406 }
 0xcae   : > { %v3432_v42 = vadd.f32 %v3429_v51, %v3407_v52 }
 0xcaf   : > { %v3404_v4 = vpop.xlane.xlu0 %3403 }
 0xcb0   : > { %v3440_v34 = vmul.f32 0.5, %v3432_v42  ;;  %v3431_v53 = vadd.f32 %v3429_v51, %v3404_v4 }
 0xcb1   : > { %v3413_v10 = vpop.xlane.xlu1 %3412 }
 0xcb2   : > { %4428 = vtanh.f32 %v3440_v34  ;;  %v3439_v12 = vmul.f32 0.5, %v3431_v53  ;;  %v3434_v3 = vadd.f32 %v3429_v51, %v3413_v10  ;;  %v4458_v34 = vld [vmem:[%s4938_s22] sm:$0xff]  ;;  %s3955_s22 = sshll.u32 %s4924_s2, 4  ;;  %s531_s2 = sand.u32 1, %s4683_s26  }
 0xcb3   : > { %v3410_v5 = vpop.xlane.xlu0 %3409  ;;  %s5481_s21 = scalar_lea.vmem %s5542_s13, %s3955_s22  ;;  %s3879_s30 = sshll.u32 %s531_s2, 3 }
 0xcb4   : > { %4430 = vtanh.f32 %v3439_v12  ;;  %v3442_v11 = vmul.f32 0.5, %v3434_v3  ;;  %v3433_v58 = vadd.f32 %v3429_v51, %v3410_v5  ;;  %s533_s4 = scalar_lea.vmem [#allocation13], %s3879_s30  ;;  %s3686_s28 = scalar_lea.sflag [#allocation4], %s531_s2 }
 0xcb5   : > { %v3419_v49 = vpop.xlane.xlu1 %3418  ;;  %s3704_s16 = sshll.u32 %s533_s4, 4  ;;  %s3705_s16 = int_to_ptr.vmem [resolvable:$true] %s3704_s16 }
 0xcb6   : > { %4432 = vtanh.f32 %v3442_v11  ;;  %v3441_v55 = vmul.f32 0.5, %v3433_v58  ;;  %v3436_v15 = vadd.f32 %v3429_v51, %v3419_v49  ;;  %s4615_s27 = scalar_lea.vmem %s3705_s16, 128  ;;  %p4622_p9 = scmp.lt.s32.totalorder %s3705_s16, %s4620_s17 }
 0xcb7   : > { %v3416_v14 = vpop.xlane.xlu0 %3415  ;;  %p4616_p3 = scmp.ne.s32.totalorder %s3705_s16, %s4615_s27  ;;  %p4623_p13 = scmp.lt.s32.totalorder %s4621_s14, %s4615_s27 }
 0xcb8   : > { %4434 = vtanh.f32 %v3441_v55  ;;  %v3444_v56 = vmul.f32 0.5, %v3436_v15  ;;  %v3435_v16 = vadd.f32 %v3429_v51, %v3416_v14 }
 0xcb9   : > { %v3425_v18 = vpop.xlane.xlu1 %3424  ;;  %p4617_p6 = pnand %p4616_p3, %p4818_p5  ;;  %p4624_p4 = por %p4623_p13, %p4622_p9 }
 0xcba   : > { %4436 = vtanh.f32 %v3444_v56  ;;  %v3443_v19 = vmul.f32 0.5, %v3435_v16  ;;  %v3438_v59 = vadd.f32 %v3429_v51, %v3425_v18 }
 0xcbb   : > { %v3422_v20 = vpop.xlane.xlu0 %3421  ;;  %p4618_p2 = pneg %p4617_p6 }
 0xcbc   : > { %4438 = vtanh.f32 %v3443_v19  ;;  %v3446_v57 = vmul.f32 0.5, %v3438_v59  ;;  %v3437_v21 = vadd.f32 %v3429_v51, %v3422_v20 }
 0xcbd   : > { %v2463_v53 = vpop.xlane.xlu1 %2462  ;;  %p4625_p7 = pnand %p4624_p4, %p4618_p2 }
 0xcbe   : > { %4440 = vtanh.f32 %v3446_v57  ;;  %v3445_v24 = vmul.f32 0.5, %v3437_v21  ;;  %v2464_v10 = vsub.f32 %v5305_v17, %v2463_v53 }
 0xcbf   : > { %v4429_v13 = vpop.eup %4428 }
 0xcc0   : > { %4442 = vtanh.f32 %v3445_v24  ;;  %v3456_v26 = vadd.f32 1.0, %v4429_v13 }
 0xcc1   : > { %v4431_v25 = vpop.eup %4430 }
 0xcc2   : > { %v3455_v63 = vadd.f32 1.0, %v4431_v25  ;;  %v3464_v31 = vmul.f32 0.5, %v3456_v26 }
 0xcc3   : > { %v4433_v28 = vpop.eup %4432 }
 0xcc4   : > { %v3463_v29 = vmul.f32 0.5, %v3455_v63  ;;  %v3458_v32 = vadd.f32 1.0, %v4433_v28  ;;  %v3486_v62 = vrot.slane %v3464_v31, %v5117_v22 }
 0xcc5   : > { %v4435_v30 = vpop.eup %4434 }
 0xcc6   : > { %v3457_v60 = vadd.f32 1.0, %v4435_v30  ;;  %v3482_v33 = vrot.slane %v3463_v29, %v5117_v22  ;;  %v3466_v7 = vmul.f32 0.5, %v3458_v32 }
 0xcc7   : > { %v4437_v54 = vpop.eup %4436 }
 0xcc8   : > { %v3465_v61 = vmul.f32 0.5, %v3457_v60  ;;  %v3460_v36 = vadd.f32 1.0, %v4437_v54  ;;  %v3511_v9 = vsel %vm1276_vm9, %v3486_v62, %v3482_v33  ;;  %v3494_v45 = vrot.slane %v3466_v7, %v5117_v22 }
 0xcc9   : > { %v4439_v8 = vpop.eup %4438 }
 0xcca   : > { %v3490_v38 = vrot.slane %v3465_v61, %v5117_v22  ;;  %v3459_v35 = vadd.f32 1.0, %v4439_v8  ;;  %v3468_v46 = vmul.f32 0.5, %v3460_v36 }
 0xccb   : > { %v4441_v0 = vpop.eup %4440 }
 0xccc   : > { %v3512_v39 = vsel %vm1278_vm10, %v3490_v38, %v3511_v9  ;;  %v3467_v23 = vmul.f32 0.5, %v3459_v35  ;;  %v3462_v41 = vadd.f32 1.0, %v4441_v0  ;;  %v3502_v6 = vrot.slane %v3468_v46, %v5117_v22 }
 0xccd   : > { %v4443_v43 = vpop.eup %4442  ;;  %v3513_v47 = vsel %vm1280_vm12, %v3494_v45, %v3512_v39 }
 0xcce   : > { %v3498_v27 = vrot.slane %v3467_v23, %v5117_v22  ;;  %v3461_v40 = vadd.f32 1.0, %v4443_v43  ;;  %v3470_v37 = vmul.f32 0.5, %v3462_v41 }
 0xcd0   : > { %v3514_v48 = vsel %vm1282_vm13, %v3498_v27, %v3513_v47  ;;  %v3469_v44 = vmul.f32 0.5, %v3461_v40  ;;  %v3510_v51 = vrot.slane %v3470_v37, %v5117_v22 }
 0xcd1   : > { %v3515_v52 = vsel %vm1284_vm14, %v3502_v6, %v3514_v48 }
 0xcd2   : > { %v3506_v50 = vrot.slane %v3469_v44, %v5117_v22  ;;  %v2465_v22 = vmul.f32 1.442695, %v2464_v10 }
 0xcd4   : > { %v3516_v42 = vsel %vm1286_vm15, %v3506_v50, %v3515_v52  ;;  %4444 = vpow2.f32 %v2465_v22 }
 0xcd5   : > { %v3517_v4 = vsel %vm1288_vm4, %v3510_v51, %v3516_v42 }
 0xcd6   : > { %4228 = vmatmul.mubr.msk.f32.vlgmr.msra.gmra.mxu0 %vm908_vm1, %v3517_v4 }
 0xcd7   : > { %4231 = vmatpush3.msra.mxu0 %v4458_v34  ;;  %4232 = vmatprep.mubr.msk.f32.mxu0 %vm4706_vm0, %v4705_v1 }
 0xcda   : > { %4233 = vmatmul.mubr.msk.f32.vlgmr.msra.gmra.mxu0 %vm908_vm1, %v5395_v2 }
 0xce1   : > { %v4445_v55 = vpop.eup %4444 }
 0xce2   : > { %v2467_v1 = vsel %vm908_vm1, %v4445_v55, 0.0 }
 0xd96   : > { %v3586_v12 = vpop.f32.mrf.mxu0 }
 0xd97   : > { %v3590_v49 = vsel %vm908_vm1, %v3586_v12, -inf }
 0xd98   : > { %v4229_v3 = vpop.f32.mrf.mxu0 }
 0xd9a   : > { %v3669_v5 = vpop.f32.mrf.mxu0 }
 0xd9b   : > { %v3673_v11 = vsel %vm908_vm1, %v3669_v5, -inf }
 0xd9c   : > { %3674 = vmax.xlane.f32.xlu0 %v3673_v11  ;;  %v4234_v58 = vpop.f32.mrf.mxu0 }
 0xda0   : > { %3591 = vmax.xlane.f32.xlu0 %v3590_v49 }
 0xda4   : > { %2468 = vadd.xlane.f32.xlu0 %v2467_v1 }
 0xe25   : > { %v3675_v2 = vpop.xlane.xlu0 %3674 }
 0xe26   : > { %v3676_v15 = vsub.f32 %v3669_v5, %v3675_v2 }
 0xe28   : > { %v3677_v17 = vmul.f32 1.442695, %v3676_v15 }
 0xe29   : > { %v3592_v14 = vpop.xlane.xlu0 %3591 }
 0xe2a   : > { %4446 = vpow2.f32 %v3677_v17  ;;  %v3593_v56 = vsub.f32 %v3586_v12, %v3592_v14 }
 0xe2c   : > { %v3594_v16 = vmul.f32 1.442695, %v3593_v56 }
 0xe2d   : > { %v2469_v18 = vpop.xlane.xlu0 %2468 }
 0xe2e   : > { %4448 = vpow2.f32 %v3594_v16 }
 0xe2f   : > { %4450 = vrcp.f32 %v2469_v18 }
 0xe37   : > { %v4447_v19 = vpop.eup %4446 }
 0xe38   : > { %v3679_v59 = vsel %vm908_vm1, %v4447_v19, 0.0 }
 0xe39   : > { %3680 = vadd.xlane.f32.xlu1 %v3679_v59 }
 0xe3b   : > { %v4449_v20 = vpop.eup %4448 }
 0xe3c   : > { %v4451_v57 = vpop.eup %4450  ;;  %v3596_v21 = vsel %vm908_vm1, %v4449_v20, 0.0 }
 0xe3d   : > { %v2471_v24 = vmul.f32 %v4451_v57, %v4445_v55  ;;  %3597 = vadd.xlane.f32.xlu1 %v3596_v21 }
 0xe3f   : > { %2472 = vst.msk [vmem:[%s5481_s21] sm:$0xff] %vm908_vm1, %v2471_v24 }
 0xec2   : > { %v3681_v13 = vpop.xlane.xlu1 %3680 }
 0xec3   : > { %4452 = vrcp.f32 %v3681_v13 }
 0xec6   : > { %v3598_v25 = vpop.xlane.xlu1 %3597 }
 0xec7   : > { %4454 = vrcp.f32 %v3598_v25 }
 0xed0   : > { %v4453_v26 = vpop.eup %4452 }
 0xed1   : > { %v3683_v63 = vmul.f32 %v4453_v26, %v4447_v19 }
 0xed3   : > { %3684 = vst.msk [vmem:[%s533_s4] sm:$0xff] %vm908_vm1, %v3683_v63 }
 0xed4   : > { %v4455_v28 = vpop.eup %4454 }
 0xed5   : > { %4628 = shalt.err (!%p4625_p7)
}
 0xed6   : > { %s4629_s22 = scalar_lea.hbm %s5491_s15, 128  ;;  %s4633_s2 = scalar_lea.hbm %s5541_s12, 512 }
 0xed7   : > { %p4630_p8 = scmp.ne.s32.totalorder %s5491_s15, %s4629_s22  ;;  %p4634_p10 = scmp.lt.s32.totalorder %s5491_s15, %s5541_s12 }
 0xed8   : > { %p4635_p1 = scmp.lt.s32.totalorder %s4633_s2, %s4629_s22 }
 0xed9   : > { %p4631_p11 = pnand %p4630_p8, %p4818_p5 }
 0xeda   : > { %p4636_p0 = por %p4635_p1, %p4634_p10 }
 0xedb   : > { %p4632_p12 = pneg %p4631_p11 }
 0xedd   : > { %p4637_p3 = pnand %p4636_p0, %p4632_p12 }
 0xedf   : > { %4640 = shalt.err (!%p4637_p3)
}
 0xee0   : > { %4269 = dma.vmem_to_hbm [thread:$0]  (%p4818_p5), %s3705_s16, 128, %s5491_s15, %s3686_s28   ;;  %v3600_v29 = vmul.f32 %v4455_v28, %v4449_v20 }
 0xee2   : > { %3949 = vst.msk [vmem:[%s5481_s21 + $0x8] sm:$0xff] %vm908_vm1, %v3600_v29 }
 0xee3 PF: > { %s5583_s4 = sld [smem:[#allocation21_spill]] }
 0xee4   : > { %s5584_s20 = sld [smem:[#allocation19_spill]] }
 0xee5   : > { %s5585_s23 = sld [smem:[#allocation24_spill]] }
 0xee9   : > { %p4306_p6 = scmp.ge.s32.totalorder %s5583_s4, 2 }
 0xeea   : > { %s3719_s27 = sand.u32 1, %s5584_s20  }
 0xeeb   : > { %p5586_p2 = scmp.ne.s32.totalorder %s5585_s23, 0  ;;  %s3720_s29 = scalar_lea.sflag [#allocation4], %s3719_s27 }
 0xeed   : > { %p4291_p9 = pnand %p4306_p6, %p5586_p2 }
 0xeef   : > { %p4292_p13 = pneg %p4291_p9 }
 0xef1   : > { %4674 = dma.done.wait (%p4292_p13), %s3720_s29, 128  }
 0xef2   : > { %4676 = vsyncadd (%p4292_p13), %s3720_s29, 4294967168  ;;  %s5587_s28 = sld [smem:[#allocation22_spill]]  ;;  %s5590_s25 = smov %s4683_s26 }
 0xef3   : > { %s5588_s18 = sld [smem:[#allocation20_spill]] }
 0xef4   : > { %s5589_s27 = sld [smem:[#allocation23_spill]] }
 0xef8   : > { %p28_p5 = scmp.ge.s32.totalorder %s5587_s28, 6  }
 0xef9   : > { %s5591_s26 = smov %s5588_s18 }
 0xefa   :  { %30 = sbr.rel (!%p28_p5) target bundleno = 10 (0xa), region = 153 }
 0xeff   :  { %3733 = vsyncpa [#allocation3], 1 }
 0xf00   :  { %3735 = vsyncpa [#allocation3 + $0x1], 1 }
 0xf01   :  { %3736 = vsyncpa [#allocation6], 1 }
 0xf02   :  { %3737 = vsyncpa [#allocation9], 1 }
 0xf03   :  { %3738 = vsyncpa [#allocation12], 1 }
 0xf04   :  { %3739 = vsyncpa [#allocation4], 1 }
 0xf05   :  { %3741 = vsyncpa [#allocation4 + $0x1], 1 }

</bundles_post_ra>
